<compile_context>
chip_gen: v7x
topology: tpu7x:2x2x1
jax: 0.10.0
libtpu: 0.0.40
codegen_flags: <defaults>
</compile_context>

<pallas_src>
import functools

import jax
import jax.numpy as jnp
from jax.experimental import pallas as pl
from jax.experimental.pallas import tpu as pltpu

# Flip to jnp.bfloat16 on v6e/v7x for full-rate MXU (accumulation stays f32).
COMPUTE_DTYPE = jnp.float32


# ---------------------------------------------------------------------------
# Fused Conv3x3(pad=1, stride=1) + bias + ReLU + MaxPool2d(2) kernel (NHWC).
# One grid step = one batch element.
# ---------------------------------------------------------------------------
def _conv_relu_pool_kernel(xf_ref, w_ref, b_ref, o_ref, acc_ref, *, H, W, Wp, Ho, Wo):
    """
    xf_ref : (1, (H+3)*Wp, C)  zero-padded input, spatially flattened
             (row r = padded pixel (r // Wp, r % Wp); channels on lanes).
    w_ref  : (9, C, O)         conv weights, tap-major (k = di*3 + dj).
    b_ref  : (1, O)            conv bias.
    o_ref  : (1, Ho, Wo, O)    pooled output (NHWC).
    acc_ref: (H*Wp, O) f32     VMEM scratch holding the ReLU'd conv output.
    """
    O = o_ref.shape[-1]
    R = H * Wp

    # --- conv as 9 shifted matmuls over the flattened padded image ----------
    # acc[r] is the conv output at pixel (r // Wp, r % Wp); rows with
    # (r % Wp) >= W are wrap-around garbage and are never read below.
    acc = jnp.zeros((R, O), jnp.float32)
    for k in range(9):
        di, dj = k // 3, k % 3
        patch = xf_ref[0, pl.ds(di * Wp + dj, R), :]          # [R, C] in VMEM
        acc = acc + jnp.dot(patch, w_ref[k], preferred_element_type=jnp.float32)
    acc_ref[...] = jnp.maximum(acc + b_ref[...], 0.0)         # bias + ReLU

    # --- fused 2x2 max-pool epilogue -----------------------------------------
    # sel picks the even columns (w == 2*pj): pooled_row = sel @ pairwise_max.
    wi = jax.lax.broadcasted_iota(jnp.int32, (Wo, W), 1)
    pj = jax.lax.broadcasted_iota(jnp.int32, (Wo, W), 0)
    sel = (wi == 2 * pj).astype(jnp.float32)                  # [Wo, W] constant

    for pi in range(Ho):
        b0 = 2 * pi * Wp
        a00 = acc_ref[pl.ds(b0, W), :]
        a01 = acc_ref[pl.ds(b0 + 1, W), :]
        a10 = acc_ref[pl.ds(b0 + Wp, W), :]
        a11 = acc_ref[pl.ds(b0 + Wp + 1, W), :]
        m = jnp.maximum(jnp.maximum(a00, a01), jnp.maximum(a10, a11))  # [W, O]
        o_ref[0, pi, :, :] = jnp.dot(
            sel, m, preferred_element_type=jnp.float32).astype(o_ref.dtype)


def conv3x3_relu_pool(x_nhwc, w_taps, bias_row):
    """x: [B, H, W, C]; w_taps: [9, C, O]; bias_row: [1, O] -> [B, H//2, W//2, O]."""
    B, H, W, C = x_nhwc.shape
    O = w_taps.shape[-1]
    assert H % 2 == 0 and W % 2 == 0
    Wp = W + 2
    Ho, Wo = H // 2, W // 2

    # pad=1 conv halo plus one extra zero row so every shifted slice is in-bounds.
    xp = jnp.pad(x_nhwc.astype(COMPUTE_DTYPE), ((0, 0), (1, 2), (1, 1), (0, 0)))
    xf = xp.reshape(B, (H + 3) * Wp, C)

    kernel = functools.partial(_conv_relu_pool_kernel, H=H, W=W, Wp=Wp, Ho=Ho, Wo=Wo)
    return pl.pallas_call(
        kernel,
        out_shape=jax.ShapeDtypeStruct((B, Ho, Wo, O), jnp.float32),
        grid=(B,),
        in_specs=[
            pl.BlockSpec((1, (H + 3) * Wp, C), lambda b: (b, 0, 0)),
            pl.BlockSpec((9, C, O), lambda b: (0, 0, 0)),
            pl.BlockSpec((1, O), lambda b: (0, 0)),
        ],
        out_specs=pl.BlockSpec((1, Ho, Wo, O), lambda b: (b, 0, 0, 0)),
        scratch_shapes=[pltpu.VMEM((H * Wp, O), jnp.float32)],
        compiler_params=pltpu.CompilerParams(dimension_semantics=("parallel",)),
    )(xf, w_taps, bias_row)


# ---------------------------------------------------------------------------
# Fused fc1 + fc2 kernel (no activation between them, matching the module).
# ---------------------------------------------------------------------------
def _mlp_kernel(x_ref, w1_ref, b1_ref, w2_ref, b2_ref, o_ref):
    h = jnp.dot(x_ref[...], w1_ref[...], preferred_element_type=jnp.float32)
    h = h + b1_ref[...]
    h = h.astype(w2_ref.dtype)
    out = jnp.dot(h, w2_ref[...], preferred_element_type=jnp.float32) + b2_ref[...]
    o_ref[...] = out.astype(o_ref.dtype)


def mlp(x, w1, b1, w2, b2):
    """x: [B, K]; w1: [K, N1]; b1: [1, N1]; w2: [N1, N2]; b2: [1, N2] -> [B, N2]."""
    B, K = x.shape
    N1 = w1.shape[1]
    N2 = w2.shape[1]
    tm = B if B <= 256 else 256        # M-tiles keep VMEM bounded at large batch
    return pl.pallas_call(
        _mlp_kernel,
        out_shape=jax.ShapeDtypeStruct((B, N2), jnp.float32),
        grid=(pl.cdiv(B, tm),),
        in_specs=[
            pl.BlockSpec((tm, K), lambda i: (i, 0)),
            pl.BlockSpec((K, N1), lambda i: (0, 0)),
            pl.BlockSpec((1, N1), lambda i: (0, 0)),
            pl.BlockSpec((N1, N2), lambda i: (0, 0)),
            pl.BlockSpec((1, N2), lambda i: (0, 0)),
        ],
        out_specs=pl.BlockSpec((tm, N2), lambda i: (i, 0)),
        compiler_params=pltpu.CompilerParams(dimension_semantics=("parallel",)),
    )(x.astype(COMPUTE_DTYPE), w1, b1, w2, b2)


# ---------------------------------------------------------------------------
# Parameters (PyTorch-default uniform init, PyTorch layouts) + one-time packing.
# ---------------------------------------------------------------------------
def init_params(key):
    ks = jax.random.split(key, 8)

    def u(k, shape, fan_in):
        bound = 1.0 / float(fan_in) ** 0.5
        return jax.random.uniform(k, shape, jnp.float32, -bound, bound)

    return {
        "conv1_w": u(ks[0], (16, 3, 3, 3), 3 * 9),          # [O, C, kh, kw]
        "conv1_b": u(ks[1], (16,), 3 * 9),
        "conv2_w": u(ks[2], (16, 16, 3, 3), 16 * 9),
        "conv2_b": u(ks[3], (16,), 16 * 9),
        "fc1_w": u(ks[4], (256, 16 * 3 * 3), 16 * 3 * 3),   # [out, in], in is CHW-order
        "fc1_b": u(ks[5], (256,), 16 * 3 * 3),
        "fc2_w": u(ks[6], (2, 256), 256),
        "fc2_b": u(ks[7], (2,), 256),
    }


def pack_params(p):
    """One-time layout/dtype prep so the forward pass has zero weight glue."""
    def conv_taps(w):  # [O, C, 3, 3] -> [9, C, O], tap-major (k = di*3 + dj)
        O, C = w.shape[0], w.shape[1]
        return jnp.transpose(w, (2, 3, 1, 0)).reshape(9, C, O).astype(COMPUTE_DTYPE)

    # fc1 consumed a CHW flatten in PyTorch; permute its columns once so it
    # accepts our NHWC flatten (h, w, c) directly.
    n1, kin = p["fc1_w"].shape
    c2 = p["conv2_w"].shape[0]
    s = int(round((kin // c2) ** 0.5))
    fc1 = p["fc1_w"].reshape(n1, c2, s, s)                     # [N, C, H, W]
    fc1 = jnp.transpose(fc1, (0, 2, 3, 1)).reshape(n1, kin)    # [N, HWC]
    return {
        "conv1_wk": conv_taps(p["conv1_w"]),
        "conv1_b": p["conv1_b"].reshape(1, -1).astype(jnp.float32),
        "conv2_wk": conv_taps(p["conv2_w"]),
        "conv2_b": p["conv2_b"].reshape(1, -1).astype(jnp.float32),
        "fc1_wT": fc1.T.astype(COMPUTE_DTYPE),                 # [144, 256]
        "fc1_b": p["fc1_b"].reshape(1, -1).astype(jnp.float32),
        "fc2_wT": p["fc2_w"].T.astype(COMPUTE_DTYPE),          # [256, 2]
        "fc2_b": p["fc2_b"].reshape(1, -1).astype(jnp.float32),
    }


# ---------------------------------------------------------------------------
# Forward pass (mirrors CNN.forward), NHWC internally.
# ---------------------------------------------------------------------------
def cnn_forward(packed, x_nchw):
    x = jnp.transpose(x_nchw, (0, 2, 3, 1))                                # one NCHW->NHWC
    x = conv3x3_relu_pool(x, packed["conv1_wk"], packed["conv1_b"])        # [B, H/2, W/2, 16]
    x = conv3x3_relu_pool(x, packed["conv2_wk"], packed["conv2_b"])        # [B, H/4, W/4, 16]
    x = x.reshape(x.shape[0], -1)                                          # NHWC flatten
    return mlp(x, packed["fc1_wT"], packed["fc1_b"], packed["fc2_wT"], packed["fc2_b"])


# ---------------------------------------------------------------------------
# Pure-JAX reference (PyTorch semantics) for correctness checking.
# ---------------------------------------------------------------------------
def reference_forward(p, x):
    def conv(x, w, b):
        y = jax.lax.conv_general_dilated(
            x, w, window_strides=(1, 1), padding="SAME",
            dimension_numbers=("NCHW", "OIHW", "NCHW"))
        return jax.nn.relu(y + b[None, :, None, None])

    def pool(x):
        return jax.lax.reduce_window(x, -jnp.inf, jax.lax.max,
                                     (1, 1, 2, 2), (1, 1, 2, 2), "VALID")

    x = pool(conv(x, p["conv1_w"], p["conv1_b"]))
    x = pool(conv(x, p["conv2_w"], p["conv2_b"]))
    x = x.reshape(x.shape[0], -1)
    x = x @ p["fc1_w"].T + p["fc1_b"]
    return x @ p["fc2_w"].T + p["fc2_b"]


if __name__ == "__main__":
    key = jax.random.PRNGKey(0)
    pkey, xkey = jax.random.split(key)
    raw = init_params(pkey)
    packed = pack_params(raw)
    # 12x12 spatial so two 2x pools give 3x3 -> 16*3*3 = 144 = fc1 in-features.
    x = jax.random.normal(xkey, (2, 3, 12, 12), jnp.float32)

    out = jax.jit(cnn_forward)(packed, x)
    jax.block_until_ready(out)
    assert out.shape == (2, 2) and out.dtype == jnp.float32

    ref = reference_forward(raw, x)
    tol = 1e-3 if COMPUTE_DTYPE == jnp.float32 else 5e-2
    assert jnp.allclose(out, ref, atol=tol, rtol=tol)
    print("KERNEL_OK")
</pallas_src>

<mosaic_0001>
module attributes {stable_mosaic.version = 11 : i64} {
  func.func @_conv_relu_pool_kernel(%arg0: i32, %arg1: memref<1x210x3xf32, #tpu.memory_space<vmem>>, %arg2: memref<9x3x16xf32, #tpu.memory_space<vmem>>, %arg3: memref<1x16xf32, #tpu.memory_space<vmem>>, %arg4: memref<1x6x6x16xf32, #tpu.memory_space<vmem>>, %arg5: memref<168x16xf32, #tpu.memory_space<vmem>>) attributes {dimension_semantics = [#tpu.dimension_semantics<parallel>], iteration_bounds = array<i64: 2>, scalar_prefetch = 0 : i64, scratch_operands = 1 : i64, tpu.core_type = #tpu.core_type<tc>, window_params = [{transform_indices = @transform_0, window_bounds = array<i64: 1, 210, 3>}, {pipeline_mode = #tpu.pipeline_mode<synchronous>, transform_indices = @transform_1, window_bounds = array<i64: 9, 3, 16>}, {pipeline_mode = #tpu.pipeline_mode<synchronous>, transform_indices = @transform_2, window_bounds = array<i64: 1, 16>}, {transform_indices = @transform_3, window_bounds = array<i64: 1, 6, 6, 16>}]} {
    %cst = arith.constant 0.000000e+00 : f32
    %0 = vector.broadcast %cst : f32 to vector<168x16xf32>
    %c0 = arith.constant 0 : index
    %c0_0 = arith.constant 0 : index
    %c0_1 = arith.constant 0 : index
    %1 = vector.load %arg1[%c0, %c0_0, %c0_1] : memref<1x210x3xf32, #tpu.memory_space<vmem>>, vector<1x168x3xf32>
    %2 = vector.shape_cast %1 : vector<1x168x3xf32> to vector<168x3xf32>
    %c0_2 = arith.constant 0 : index
    %c0_3 = arith.constant 0 : index
    %c0_4 = arith.constant 0 : index
    %3 = vector.load %arg2[%c0_2, %c0_3, %c0_4] : memref<9x3x16xf32, #tpu.memory_space<vmem>>, vector<1x3x16xf32>
    %4 = vector.shape_cast %3 : vector<1x3x16xf32> to vector<3x16xf32>
    %cst_5 = arith.constant dense<0.000000e+00> : vector<168x16xf32>
    %5 = tpu.matmul %2, %4, %cst_5 {dimension_numbers = #tpu.dot_dimension_numbers<[1], [0], [0], [1], [0, 0, 1, 1], [], []>} : vector<168x3xf32>, vector<3x16xf32>, vector<168x16xf32> -> vector<168x16xf32>
    %6 = arith.addf %0, %5 : vector<168x16xf32>
    %c0_6 = arith.constant 0 : index
    %c1 = arith.constant 1 : index
    %c0_7 = arith.constant 0 : index
    %7 = vector.load %arg1[%c0_6, %c1, %c0_7] : memref<1x210x3xf32, #tpu.memory_space<vmem>>, vector<1x168x3xf32>
    %8 = vector.shape_cast %7 : vector<1x168x3xf32> to vector<168x3xf32>
    %c1_8 = arith.constant 1 : index
    %c0_9 = arith.constant 0 : index
    %c0_10 = arith.constant 0 : index
    %9 = vector.load %arg2[%c1_8, %c0_9, %c0_10] : memref<9x3x16xf32, #tpu.memory_space<vmem>>, vector<1x3x16xf32>
    %10 = vector.shape_cast %9 : vector<1x3x16xf32> to vector<3x16xf32>
    %cst_11 = arith.constant dense<0.000000e+00> : vector<168x16xf32>
    %11 = tpu.matmul %8, %10, %cst_11 {dimension_numbers = #tpu.dot_dimension_numbers<[1], [0], [0], [1], [0, 0, 1, 1], [], []>} : vector<168x3xf32>, vector<3x16xf32>, vector<168x16xf32> -> vector<168x16xf32>
    %12 = arith.addf %6, %11 : vector<168x16xf32>
    %c0_12 = arith.constant 0 : index
    %c2 = arith.constant 2 : index
    %c0_13 = arith.constant 0 : index
    %13 = vector.load %arg1[%c0_12, %c2, %c0_13] : memref<1x210x3xf32, #tpu.memory_space<vmem>>, vector<1x168x3xf32>
    %14 = vector.shape_cast %13 : vector<1x168x3xf32> to vector<168x3xf32>
    %c2_14 = arith.constant 2 : index
    %c0_15 = arith.constant 0 : index
    %c0_16 = arith.constant 0 : index
    %15 = vector.load %arg2[%c2_14, %c0_15, %c0_16] : memref<9x3x16xf32, #tpu.memory_space<vmem>>, vector<1x3x16xf32>
    %16 = vector.shape_cast %15 : vector<1x3x16xf32> to vector<3x16xf32>
    %cst_17 = arith.constant dense<0.000000e+00> : vector<168x16xf32>
    %17 = tpu.matmul %14, %16, %cst_17 {dimension_numbers = #tpu.dot_dimension_numbers<[1], [0], [0], [1], [0, 0, 1, 1], [], []>} : vector<168x3xf32>, vector<3x16xf32>, vector<168x16xf32> -> vector<168x16xf32>
    %18 = arith.addf %12, %17 : vector<168x16xf32>
    %c0_18 = arith.constant 0 : index
    %c14 = arith.constant 14 : index
    %c0_19 = arith.constant 0 : index
    %19 = vector.load %arg1[%c0_18, %c14, %c0_19] : memref<1x210x3xf32, #tpu.memory_space<vmem>>, vector<1x168x3xf32>
    %20 = vector.shape_cast %19 : vector<1x168x3xf32> to vector<168x3xf32>
    %c3 = arith.constant 3 : index
    %c0_20 = arith.constant 0 : index
    %c0_21 = arith.constant 0 : index
    %21 = vector.load %arg2[%c3, %c0_20, %c0_21] : memref<9x3x16xf32, #tpu.memory_space<vmem>>, vector<1x3x16xf32>
    %22 = vector.shape_cast %21 : vector<1x3x16xf32> to vector<3x16xf32>
    %cst_22 = arith.constant dense<0.000000e+00> : vector<168x16xf32>
    %23 = tpu.matmul %20, %22, %cst_22 {dimension_numbers = #tpu.dot_dimension_numbers<[1], [0], [0], [1], [0, 0, 1, 1], [], []>} : vector<168x3xf32>, vector<3x16xf32>, vector<168x16xf32> -> vector<168x16xf32>
    %24 = arith.addf %18, %23 : vector<168x16xf32>
    %c0_23 = arith.constant 0 : index
    %c15 = arith.constant 15 : index
    %c0_24 = arith.constant 0 : index
    %25 = vector.load %arg1[%c0_23, %c15, %c0_24] : memref<1x210x3xf32, #tpu.memory_space<vmem>>, vector<1x168x3xf32>
    %26 = vector.shape_cast %25 : vector<1x168x3xf32> to vector<168x3xf32>
    %c4 = arith.constant 4 : index
    %c0_25 = arith.constant 0 : index
    %c0_26 = arith.constant 0 : index
    %27 = vector.load %arg2[%c4, %c0_25, %c0_26] : memref<9x3x16xf32, #tpu.memory_space<vmem>>, vector<1x3x16xf32>
    %28 = vector.shape_cast %27 : vector<1x3x16xf32> to vector<3x16xf32>
    %cst_27 = arith.constant dense<0.000000e+00> : vector<168x16xf32>
    %29 = tpu.matmul %26, %28, %cst_27 {dimension_numbers = #tpu.dot_dimension_numbers<[1], [0], [0], [1], [0, 0, 1, 1], [], []>} : vector<168x3xf32>, vector<3x16xf32>, vector<168x16xf32> -> vector<168x16xf32>
    %30 = arith.addf %24, %29 : vector<168x16xf32>
    %c0_28 = arith.constant 0 : index
    %c16 = arith.constant 16 : index
    %c0_29 = arith.constant 0 : index
    %31 = vector.load %arg1[%c0_28, %c16, %c0_29] : memref<1x210x3xf32, #tpu.memory_space<vmem>>, vector<1x168x3xf32>
    %32 = vector.shape_cast %31 : vector<1x168x3xf32> to vector<168x3xf32>
    %c5 = arith.constant 5 : index
    %c0_30 = arith.constant 0 : index
    %c0_31 = arith.constant 0 : index
    %33 = vector.load %arg2[%c5, %c0_30, %c0_31] : memref<9x3x16xf32, #tpu.memory_space<vmem>>, vector<1x3x16xf32>
    %34 = vector.shape_cast %33 : vector<1x3x16xf32> to vector<3x16xf32>
    %cst_32 = arith.constant dense<0.000000e+00> : vector<168x16xf32>
    %35 = tpu.matmul %32, %34, %cst_32 {dimension_numbers = #tpu.dot_dimension_numbers<[1], [0], [0], [1], [0, 0, 1, 1], [], []>} : vector<168x3xf32>, vector<3x16xf32>, vector<168x16xf32> -> vector<168x16xf32>
    %36 = arith.addf %30, %35 : vector<168x16xf32>
    %c0_33 = arith.constant 0 : index
    %c28 = arith.constant 28 : index
    %c0_34 = arith.constant 0 : index
    %37 = vector.load %arg1[%c0_33, %c28, %c0_34] : memref<1x210x3xf32, #tpu.memory_space<vmem>>, vector<1x168x3xf32>
    %38 = vector.shape_cast %37 : vector<1x168x3xf32> to vector<168x3xf32>
    %c6 = arith.constant 6 : index
    %c0_35 = arith.constant 0 : index
    %c0_36 = arith.constant 0 : index
    %39 = vector.load %arg2[%c6, %c0_35, %c0_36] : memref<9x3x16xf32, #tpu.memory_space<vmem>>, vector<1x3x16xf32>
    %40 = vector.shape_cast %39 : vector<1x3x16xf32> to vector<3x16xf32>
    %cst_37 = arith.constant dense<0.000000e+00> : vector<168x16xf32>
    %41 = tpu.matmul %38, %40, %cst_37 {dimension_numbers = #tpu.dot_dimension_numbers<[1], [0], [0], [1], [0, 0, 1, 1], [], []>} : vector<168x3xf32>, vector<3x16xf32>, vector<168x16xf32> -> vector<168x16xf32>
    %42 = arith.addf %36, %41 : vector<168x16xf32>
    %c0_38 = arith.constant 0 : index
    %c29 = arith.constant 29 : index
    %c0_39 = arith.constant 0 : index
    %43 = vector.load %arg1[%c0_38, %c29, %c0_39] : memref<1x210x3xf32, #tpu.memory_space<vmem>>, vector<1x168x3xf32>
    %44 = vector.shape_cast %43 : vector<1x168x3xf32> to vector<168x3xf32>
    %c7 = arith.constant 7 : index
    %c0_40 = arith.constant 0 : index
    %c0_41 = arith.constant 0 : index
    %45 = vector.load %arg2[%c7, %c0_40, %c0_41] : memref<9x3x16xf32, #tpu.memory_space<vmem>>, vector<1x3x16xf32>
    %46 = vector.shape_cast %45 : vector<1x3x16xf32> to vector<3x16xf32>
    %cst_42 = arith.constant dense<0.000000e+00> : vector<168x16xf32>
    %47 = tpu.matmul %44, %46, %cst_42 {dimension_numbers = #tpu.dot_dimension_numbers<[1], [0], [0], [1], [0, 0, 1, 1], [], []>} : vector<168x3xf32>, vector<3x16xf32>, vector<168x16xf32> -> vector<168x16xf32>
    %48 = arith.addf %42, %47 : vector<168x16xf32>
    %c0_43 = arith.constant 0 : index
    %c30 = arith.constant 30 : index
    %c0_44 = arith.constant 0 : index
    %49 = vector.load %arg1[%c0_43, %c30, %c0_44] : memref<1x210x3xf32, #tpu.memory_space<vmem>>, vector<1x168x3xf32>
    %50 = vector.shape_cast %49 : vector<1x168x3xf32> to vector<168x3xf32>
    %c8 = arith.constant 8 : index
    %c0_45 = arith.constant 0 : index
    %c0_46 = arith.constant 0 : index
    %51 = vector.load %arg2[%c8, %c0_45, %c0_46] : memref<9x3x16xf32, #tpu.memory_space<vmem>>, vector<1x3x16xf32>
    %52 = vector.shape_cast %51 : vector<1x3x16xf32> to vector<3x16xf32>
    %cst_47 = arith.constant dense<0.000000e+00> : vector<168x16xf32>
    %53 = tpu.matmul %50, %52, %cst_47 {dimension_numbers = #tpu.dot_dimension_numbers<[1], [0], [0], [1], [0, 0, 1, 1], [], []>} : vector<168x3xf32>, vector<3x16xf32>, vector<168x16xf32> -> vector<168x16xf32>
    %54 = arith.addf %48, %53 : vector<168x16xf32>
    %c0_48 = arith.constant 0 : index
    %c0_49 = arith.constant 0 : index
    %55 = vector.load %arg3[%c0_48, %c0_49] : memref<1x16xf32, #tpu.memory_space<vmem>>, vector<1x16xf32>
    %56 = vector.broadcast %55 : vector<1x16xf32> to vector<168x16xf32>
    %57 = arith.addf %54, %56 : vector<168x16xf32>
    %cst_50 = arith.constant 0.000000e+00 : f32
    %58 = vector.broadcast %cst_50 : f32 to vector<168x16xf32>
    %59 = arith.maximumf %57, %58 : vector<168x16xf32>
    %c0_51 = arith.constant 0 : index
    %c0_52 = arith.constant 0 : index
    %60 = vector.load %arg5[%c0_51, %c0_52] : memref<168x16xf32, #tpu.memory_space<vmem>>, vector<168x16xf32>
    tpu.vector_store %arg5[%c0_51, %c0_52], %59 {strides = array<i32>} : memref<168x16xf32, #tpu.memory_space<vmem>>, vector<168x16xf32>,
    %61 = tpu.iota {dimensions = array<i32: 1>} : vector<6x12xi32>
    %62 = tpu.iota {dimensions = array<i32: 0>} : vector<6x12xi32>
    %c2_i32 = arith.constant 2 : i32
    %63 = vector.broadcast %c2_i32 : i32 to vector<6x12xi32>
    %64 = arith.muli %63, %62 : vector<6x12xi32>
    %65 = arith.cmpi eq, %61, %64 : vector<6x12xi32>
    %66 = arith.extui %65 : vector<6x12xi1> to vector<6x12xi32>
    %67 = arith.sitofp %66 : vector<6x12xi32> to vector<6x12xf32>
    %c0_53 = arith.constant 0 : index
    %c0_54 = arith.constant 0 : index
    %68 = vector.load %arg5[%c0_53, %c0_54] : memref<168x16xf32, #tpu.memory_space<vmem>>, vector<12x16xf32>
    %c1_55 = arith.constant 1 : index
    %c0_56 = arith.constant 0 : index
    %69 = vector.load %arg5[%c1_55, %c0_56] : memref<168x16xf32, #tpu.memory_space<vmem>>, vector<12x16xf32>
    %c14_57 = arith.constant 14 : index
    %c0_58 = arith.constant 0 : index
    %70 = vector.load %arg5[%c14_57, %c0_58] : memref<168x16xf32, #tpu.memory_space<vmem>>, vector<12x16xf32>
    %c15_59 = arith.constant 15 : index
    %c0_60 = arith.constant 0 : index
    %71 = vector.load %arg5[%c15_59, %c0_60] : memref<168x16xf32, #tpu.memory_space<vmem>>, vector<12x16xf32>
    %72 = arith.maximumf %68, %69 : vector<12x16xf32>
    %73 = arith.maximumf %70, %71 : vector<12x16xf32>
    %74 = arith.maximumf %72, %73 : vector<12x16xf32>
    %cst_61 = arith.constant dense<0.000000e+00> : vector<6x16xf32>
    %75 = tpu.matmul %67, %74, %cst_61 {dimension_numbers = #tpu.dot_dimension_numbers<[1], [0], [0], [1], [0, 0, 1, 1], [], []>} : vector<6x12xf32>, vector<12x16xf32>, vector<6x16xf32> -> vector<6x16xf32>
    %c0_62 = arith.constant 0 : index
    %c0_63 = arith.constant 0 : index
    %c0_64 = arith.constant 0 : index
    %c0_65 = arith.constant 0 : index
    %76 = vector.load %arg4[%c0_62, %c0_63, %c0_64, %c0_65] : memref<1x6x6x16xf32, #tpu.memory_space<vmem>>, vector<1x1x6x16xf32>
    %77 = vector.shape_cast %76 : vector<1x1x6x16xf32> to vector<6x16xf32>
    %78 = vector.shape_cast %75 : vector<6x16xf32> to vector<1x1x6x16xf32>
    tpu.vector_store %arg4[%c0_62, %c0_63, %c0_64, %c0_65], %78 {strides = array<i32>} : memref<1x6x6x16xf32, #tpu.memory_space<vmem>>, vector<1x1x6x16xf32>,
    %c28_66 = arith.constant 28 : index
    %c0_67 = arith.constant 0 : index
    %79 = vector.load %arg5[%c28_66, %c0_67] : memref<168x16xf32, #tpu.memory_space<vmem>>, vector<12x16xf32>
    %c29_68 = arith.constant 29 : index
    %c0_69 = arith.constant 0 : index
    %80 = vector.load %arg5[%c29_68, %c0_69] : memref<168x16xf32, #tpu.memory_space<vmem>>, vector<12x16xf32>
    %c42 = arith.constant 42 : index
    %c0_70 = arith.constant 0 : index
    %81 = vector.load %arg5[%c42, %c0_70] : memref<168x16xf32, #tpu.memory_space<vmem>>, vector<12x16xf32>
    %c43 = arith.constant 43 : index
    %c0_71 = arith.constant 0 : index
    %82 = vector.load %arg5[%c43, %c0_71] : memref<168x16xf32, #tpu.memory_space<vmem>>, vector<12x16xf32>
    %83 = arith.maximumf %79, %80 : vector<12x16xf32>
    %84 = arith.maximumf %81, %82 : vector<12x16xf32>
    %85 = arith.maximumf %83, %84 : vector<12x16xf32>
    %cst_72 = arith.constant dense<0.000000e+00> : vector<6x16xf32>
    %86 = tpu.matmul %67, %85, %cst_72 {dimension_numbers = #tpu.dot_dimension_numbers<[1], [0], [0], [1], [0, 0, 1, 1], [], []>} : vector<6x12xf32>, vector<12x16xf32>, vector<6x16xf32> -> vector<6x16xf32>
    %c0_73 = arith.constant 0 : index
    %c1_74 = arith.constant 1 : index
    %c0_75 = arith.constant 0 : index
    %c0_76 = arith.constant 0 : index
    %87 = vector.load %arg4[%c0_73, %c1_74, %c0_75, %c0_76] : memref<1x6x6x16xf32, #tpu.memory_space<vmem>>, vector<1x1x6x16xf32>
    %88 = vector.shape_cast %87 : vector<1x1x6x16xf32> to vector<6x16xf32>
    %89 = vector.shape_cast %86 : vector<6x16xf32> to vector<1x1x6x16xf32>
    tpu.vector_store %arg4[%c0_73, %c1_74, %c0_75, %c0_76], %89 {strides = array<i32>} : memref<1x6x6x16xf32, #tpu.memory_space<vmem>>, vector<1x1x6x16xf32>,
    %c56 = arith.constant 56 : index
    %c0_77 = arith.constant 0 : index
    %90 = vector.load %arg5[%c56, %c0_77] : memref<168x16xf32, #tpu.memory_space<vmem>>, vector<12x16xf32>
    %c57 = arith.constant 57 : index
    %c0_78 = arith.constant 0 : index
    %91 = vector.load %arg5[%c57, %c0_78] : memref<168x16xf32, #tpu.memory_space<vmem>>, vector<12x16xf32>
    %c70 = arith.constant 70 : index
    %c0_79 = arith.constant 0 : index
    %92 = vector.load %arg5[%c70, %c0_79] : memref<168x16xf32, #tpu.memory_space<vmem>>, vector<12x16xf32>
    %c71 = arith.constant 71 : index
    %c0_80 = arith.constant 0 : index
    %93 = vector.load %arg5[%c71, %c0_80] : memref<168x16xf32, #tpu.memory_space<vmem>>, vector<12x16xf32>
    %94 = arith.maximumf %90, %91 : vector<12x16xf32>
    %95 = arith.maximumf %92, %93 : vector<12x16xf32>
    %96 = arith.maximumf %94, %95 : vector<12x16xf32>
    %cst_81 = arith.constant dense<0.000000e+00> : vector<6x16xf32>
    %97 = tpu.matmul %67, %96, %cst_81 {dimension_numbers = #tpu.dot_dimension_numbers<[1], [0], [0], [1], [0, 0, 1, 1], [], []>} : vector<6x12xf32>, vector<12x16xf32>, vector<6x16xf32> -> vector<6x16xf32>
    %c0_82 = arith.constant 0 : index
    %c2_83 = arith.constant 2 : index
    %c0_84 = arith.constant 0 : index
    %c0_85 = arith.constant 0 : index
    %98 = vector.load %arg4[%c0_82, %c2_83, %c0_84, %c0_85] : memref<1x6x6x16xf32, #tpu.memory_space<vmem>>, vector<1x1x6x16xf32>
    %99 = vector.shape_cast %98 : vector<1x1x6x16xf32> to vector<6x16xf32>
    %100 = vector.shape_cast %97 : vector<6x16xf32> to vector<1x1x6x16xf32>
    tpu.vector_store %arg4[%c0_82, %c2_83, %c0_84, %c0_85], %100 {strides = array<i32>} : memref<1x6x6x16xf32, #tpu.memory_space<vmem>>, vector<1x1x6x16xf32>,
    %c84 = arith.constant 84 : index
    %c0_86 = arith.constant 0 : index
    %101 = vector.load %arg5[%c84, %c0_86] : memref<168x16xf32, #tpu.memory_space<vmem>>, vector<12x16xf32>
    %c85 = arith.constant 85 : index
    %c0_87 = arith.constant 0 : index
    %102 = vector.load %arg5[%c85, %c0_87] : memref<168x16xf32, #tpu.memory_space<vmem>>, vector<12x16xf32>
    %c98 = arith.constant 98 : index
    %c0_88 = arith.constant 0 : index
    %103 = vector.load %arg5[%c98, %c0_88] : memref<168x16xf32, #tpu.memory_space<vmem>>, vector<12x16xf32>
    %c99 = arith.constant 99 : index
    %c0_89 = arith.constant 0 : index
    %104 = vector.load %arg5[%c99, %c0_89] : memref<168x16xf32, #tpu.memory_space<vmem>>, vector<12x16xf32>
    %105 = arith.maximumf %101, %102 : vector<12x16xf32>
    %106 = arith.maximumf %103, %104 : vector<12x16xf32>
    %107 = arith.maximumf %105, %106 : vector<12x16xf32>
    %cst_90 = arith.constant dense<0.000000e+00> : vector<6x16xf32>
    %108 = tpu.matmul %67, %107, %cst_90 {dimension_numbers = #tpu.dot_dimension_numbers<[1], [0], [0], [1], [0, 0, 1, 1], [], []>} : vector<6x12xf32>, vector<12x16xf32>, vector<6x16xf32> -> vector<6x16xf32>
    %c0_91 = arith.constant 0 : index
    %c3_92 = arith.constant 3 : index
    %c0_93 = arith.constant 0 : index
    %c0_94 = arith.constant 0 : index
    %109 = vector.load %arg4[%c0_91, %c3_92, %c0_93, %c0_94] : memref<1x6x6x16xf32, #tpu.memory_space<vmem>>, vector<1x1x6x16xf32>
    %110 = vector.shape_cast %109 : vector<1x1x6x16xf32> to vector<6x16xf32>
    %111 = vector.shape_cast %108 : vector<6x16xf32> to vector<1x1x6x16xf32>
    tpu.vector_store %arg4[%c0_91, %c3_92, %c0_93, %c0_94], %111 {strides = array<i32>} : memref<1x6x6x16xf32, #tpu.memory_space<vmem>>, vector<1x1x6x16xf32>,
    %c112 = arith.constant 112 : index
    %c0_95 = arith.constant 0 : index
    %112 = vector.load %arg5[%c112, %c0_95] : memref<168x16xf32, #tpu.memory_space<vmem>>, vector<12x16xf32>
    %c113 = arith.constant 113 : index
    %c0_96 = arith.constant 0 : index
    %113 = vector.load %arg5[%c113, %c0_96] : memref<168x16xf32, #tpu.memory_space<vmem>>, vector<12x16xf32>
    %c126 = arith.constant 126 : index
    %c0_97 = arith.constant 0 : index
    %114 = vector.load %arg5[%c126, %c0_97] : memref<168x16xf32, #tpu.memory_space<vmem>>, vector<12x16xf32>
    %c127 = arith.constant 127 : index
    %c0_98 = arith.constant 0 : index
    %115 = vector.load %arg5[%c127, %c0_98] : memref<168x16xf32, #tpu.memory_space<vmem>>, vector<12x16xf32>
    %116 = arith.maximumf %112, %113 : vector<12x16xf32>
    %117 = arith.maximumf %114, %115 : vector<12x16xf32>
    %118 = arith.maximumf %116, %117 : vector<12x16xf32>
    %cst_99 = arith.constant dense<0.000000e+00> : vector<6x16xf32>
    %119 = tpu.matmul %67, %118, %cst_99 {dimension_numbers = #tpu.dot_dimension_numbers<[1], [0], [0], [1], [0, 0, 1, 1], [], []>} : vector<6x12xf32>, vector<12x16xf32>, vector<6x16xf32> -> vector<6x16xf32>
    %c0_100 = arith.constant 0 : index
    %c4_101 = arith.constant 4 : index
    %c0_102 = arith.constant 0 : index
    %c0_103 = arith.constant 0 : index
    %120 = vector.load %arg4[%c0_100, %c4_101, %c0_102, %c0_103] : memref<1x6x6x16xf32, #tpu.memory_space<vmem>>, vector<1x1x6x16xf32>
    %121 = vector.shape_cast %120 : vector<1x1x6x16xf32> to vector<6x16xf32>
    %122 = vector.shape_cast %119 : vector<6x16xf32> to vector<1x1x6x16xf32>
    tpu.vector_store %arg4[%c0_100, %c4_101, %c0_102, %c0_103], %122 {strides = array<i32>} : memref<1x6x6x16xf32, #tpu.memory_space<vmem>>, vector<1x1x6x16xf32>,
    %c140 = arith.constant 140 : index
    %c0_104 = arith.constant 0 : index
    %123 = vector.load %arg5[%c140, %c0_104] : memref<168x16xf32, #tpu.memory_space<vmem>>, vector<12x16xf32>
    %c141 = arith.constant 141 : index
    %c0_105 = arith.constant 0 : index
    %124 = vector.load %arg5[%c141, %c0_105] : memref<168x16xf32, #tpu.memory_space<vmem>>, vector<12x16xf32>
    %c154 = arith.constant 154 : index
    %c0_106 = arith.constant 0 : index
    %125 = vector.load %arg5[%c154, %c0_106] : memref<168x16xf32, #tpu.memory_space<vmem>>, vector<12x16xf32>
    %c155 = arith.constant 155 : index
    %c0_107 = arith.constant 0 : index
    %126 = vector.load %arg5[%c155, %c0_107] : memref<168x16xf32, #tpu.memory_space<vmem>>, vector<12x16xf32>
    %127 = arith.maximumf %123, %124 : vector<12x16xf32>
    %128 = arith.maximumf %125, %126 : vector<12x16xf32>
    %129 = arith.maximumf %127, %128 : vector<12x16xf32>
    %cst_108 = arith.constant dense<0.000000e+00> : vector<6x16xf32>
    %130 = tpu.matmul %67, %129, %cst_108 {dimension_numbers = #tpu.dot_dimension_numbers<[1], [0], [0], [1], [0, 0, 1, 1], [], []>} : vector<6x12xf32>, vector<12x16xf32>, vector<6x16xf32> -> vector<6x16xf32>
    %c0_109 = arith.constant 0 : index
    %c5_110 = arith.constant 5 : index
    %c0_111 = arith.constant 0 : index
    %c0_112 = arith.constant 0 : index
    %131 = vector.load %arg4[%c0_109, %c5_110, %c0_111, %c0_112] : memref<1x6x6x16xf32, #tpu.memory_space<vmem>>, vector<1x1x6x16xf32>
    %132 = vector.shape_cast %131 : vector<1x1x6x16xf32> to vector<6x16xf32>
    %133 = vector.shape_cast %130 : vector<6x16xf32> to vector<1x1x6x16xf32>
    tpu.vector_store %arg4[%c0_109, %c5_110, %c0_111, %c0_112], %133 {strides = array<i32>} : memref<1x6x6x16xf32, #tpu.memory_space<vmem>>, vector<1x1x6x16xf32>,
    return
  }
  func.func @transform_0(%arg0: i32) -> (i32, i32, i32) {
    %c0_i32 = arith.constant 0 : i32
    %c0_i32_0 = arith.constant 0 : i32
    %c0_i32_1 = arith.constant 0 : i32
    return %arg0, %c0_i32, %c0_i32_0 : i32, i32, i32
  }
  func.func @transform_1(%arg0: i32) -> (i32, i32, i32) {
    %c0_i32 = arith.constant 0 : i32
    %c0_i32_0 = arith.constant 0 : i32
    %c0_i32_1 = arith.constant 0 : i32
    %c0_i32_2 = arith.constant 0 : i32
    return %c0_i32, %c0_i32_0, %c0_i32_1 : i32, i32, i32
  }
  func.func @transform_2(%arg0: i32) -> (i32, i32) {
    %c0_i32 = arith.constant 0 : i32
    %c0_i32_0 = arith.constant 0 : i32
    %c0_i32_1 = arith.constant 0 : i32
    return %c0_i32, %c0_i32_0 : i32, i32
  }
  func.func @transform_3(%arg0: i32) -> (i32, i32, i32, i32) {
    %c0_i32 = arith.constant 0 : i32
    %c0_i32_0 = arith.constant 0 : i32
    %c0_i32_1 = arith.constant 0 : i32
    %c0_i32_2 = arith.constant 0 : i32
    return %arg0, %c0_i32, %c0_i32_0, %c0_i32_1 : i32, i32, i32, i32
  }
}

module attributes {stable_mosaic.version = 11 : i64} {
  func.func @_conv_relu_pool_kernel(%arg0: i32, %arg1: memref<1x72x16xf32, #tpu.memory_space<vmem>>, %arg2: memref<9x16x16xf32, #tpu.memory_space<vmem>>, %arg3: memref<1x16xf32, #tpu.memory_space<vmem>>, %arg4: memref<1x3x3x16xf32, #tpu.memory_space<vmem>>, %arg5: memref<48x16xf32, #tpu.memory_space<vmem>>) attributes {dimension_semantics = [#tpu.dimension_semantics<parallel>], iteration_bounds = array<i64: 2>, scalar_prefetch = 0 : i64, scratch_operands = 1 : i64, tpu.core_type = #tpu.core_type<tc>, window_params = [{transform_indices = @transform_0, window_bounds = array<i64: 1, 72, 16>}, {pipeline_mode = #tpu.pipeline_mode<synchronous>, transform_indices = @transform_1, window_bounds = array<i64: 9, 16, 16>}, {pipeline_mode = #tpu.pipeline_mode<synchronous>, transform_indices = @transform_2, window_bounds = array<i64: 1, 16>}, {transform_indices = @transform_3, window_bounds = array<i64: 1, 3, 3, 16>}]} {
    %cst = arith.constant 0.000000e+00 : f32
    %0 = vector.broadcast %cst : f32 to vector<48x16xf32>
    %c0 = arith.constant 0 : index
    %c0_0 = arith.constant 0 : index
    %c0_1 = arith.constant 0 : index
    %1 = vector.load %arg1[%c0, %c0_0, %c0_1] : memref<1x72x16xf32, #tpu.memory_space<vmem>>, vector<1x48x16xf32>
    %2 = vector.shape_cast %1 : vector<1x48x16xf32> to vector<48x16xf32>
    %c0_2 = arith.constant 0 : index
    %c0_3 = arith.constant 0 : index
    %c0_4 = arith.constant 0 : index
    %3 = vector.load %arg2[%c0_2, %c0_3, %c0_4] : memref<9x16x16xf32, #tpu.memory_space<vmem>>, vector<1x16x16xf32>
    %4 = vector.shape_cast %3 : vector<1x16x16xf32> to vector<16x16xf32>
    %cst_5 = arith.constant dense<0.000000e+00> : vector<48x16xf32>
    %5 = tpu.matmul %2, %4, %cst_5 {dimension_numbers = #tpu.dot_dimension_numbers<[1], [0], [0], [1], [0, 0, 1, 1], [], []>} : vector<48x16xf32>, vector<16x16xf32>, vector<48x16xf32> -> vector<48x16xf32>
    %6 = arith.addf %0, %5 : vector<48x16xf32>
    %c0_6 = arith.constant 0 : index
    %c1 = arith.constant 1 : index
    %c0_7 = arith.constant 0 : index
    %7 = vector.load %arg1[%c0_6, %c1, %c0_7] : memref<1x72x16xf32, #tpu.memory_space<vmem>>, vector<1x48x16xf32>
    %8 = vector.shape_cast %7 : vector<1x48x16xf32> to vector<48x16xf32>
    %c1_8 = arith.constant 1 : index
    %c0_9 = arith.constant 0 : index
    %c0_10 = arith.constant 0 : index
    %9 = vector.load %arg2[%c1_8, %c0_9, %c0_10] : memref<9x16x16xf32, #tpu.memory_space<vmem>>, vector<1x16x16xf32>
    %10 = vector.shape_cast %9 : vector<1x16x16xf32> to vector<16x16xf32>
    %cst_11 = arith.constant dense<0.000000e+00> : vector<48x16xf32>
    %11 = tpu.matmul %8, %10, %cst_11 {dimension_numbers = #tpu.dot_dimension_numbers<[1], [0], [0], [1], [0, 0, 1, 1], [], []>} : vector<48x16xf32>, vector<16x16xf32>, vector<48x16xf32> -> vector<48x16xf32>
    %12 = arith.addf %6, %11 : vector<48x16xf32>
    %c0_12 = arith.constant 0 : index
    %c2 = arith.constant 2 : index
    %c0_13 = arith.constant 0 : index
    %13 = vector.load %arg1[%c0_12, %c2, %c0_13] : memref<1x72x16xf32, #tpu.memory_space<vmem>>, vector<1x48x16xf32>
    %14 = vector.shape_cast %13 : vector<1x48x16xf32> to vector<48x16xf32>
    %c2_14 = arith.constant 2 : index
    %c0_15 = arith.constant 0 : index
    %c0_16 = arith.constant 0 : index
    %15 = vector.load %arg2[%c2_14, %c0_15, %c0_16] : memref<9x16x16xf32, #tpu.memory_space<vmem>>, vector<1x16x16xf32>
    %16 = vector.shape_cast %15 : vector<1x16x16xf32> to vector<16x16xf32>
    %cst_17 = arith.constant dense<0.000000e+00> : vector<48x16xf32>
    %17 = tpu.matmul %14, %16, %cst_17 {dimension_numbers = #tpu.dot_dimension_numbers<[1], [0], [0], [1], [0, 0, 1, 1], [], []>} : vector<48x16xf32>, vector<16x16xf32>, vector<48x16xf32> -> vector<48x16xf32>
    %18 = arith.addf %12, %17 : vector<48x16xf32>
    %c0_18 = arith.constant 0 : index
    %c8 = arith.constant 8 : index
    %c0_19 = arith.constant 0 : index
    %19 = vector.load %arg1[%c0_18, %c8, %c0_19] : memref<1x72x16xf32, #tpu.memory_space<vmem>>, vector<1x48x16xf32>
    %20 = vector.shape_cast %19 : vector<1x48x16xf32> to vector<48x16xf32>
    %c3 = arith.constant 3 : index
    %c0_20 = arith.constant 0 : index
    %c0_21 = arith.constant 0 : index
    %21 = vector.load %arg2[%c3, %c0_20, %c0_21] : memref<9x16x16xf32, #tpu.memory_space<vmem>>, vector<1x16x16xf32>
    %22 = vector.shape_cast %21 : vector<1x16x16xf32> to vector<16x16xf32>
    %cst_22 = arith.constant dense<0.000000e+00> : vector<48x16xf32>
    %23 = tpu.matmul %20, %22, %cst_22 {dimension_numbers = #tpu.dot_dimension_numbers<[1], [0], [0], [1], [0, 0, 1, 1], [], []>} : vector<48x16xf32>, vector<16x16xf32>, vector<48x16xf32> -> vector<48x16xf32>
    %24 = arith.addf %18, %23 : vector<48x16xf32>
    %c0_23 = arith.constant 0 : index
    %c9 = arith.constant 9 : index
    %c0_24 = arith.constant 0 : index
    %25 = vector.load %arg1[%c0_23, %c9, %c0_24] : memref<1x72x16xf32, #tpu.memory_space<vmem>>, vector<1x48x16xf32>
    %26 = vector.shape_cast %25 : vector<1x48x16xf32> to vector<48x16xf32>
    %c4 = arith.constant 4 : index
    %c0_25 = arith.constant 0 : index
    %c0_26 = arith.constant 0 : index
    %27 = vector.load %arg2[%c4, %c0_25, %c0_26] : memref<9x16x16xf32, #tpu.memory_space<vmem>>, vector<1x16x16xf32>
    %28 = vector.shape_cast %27 : vector<1x16x16xf32> to vector<16x16xf32>
    %cst_27 = arith.constant dense<0.000000e+00> : vector<48x16xf32>
    %29 = tpu.matmul %26, %28, %cst_27 {dimension_numbers = #tpu.dot_dimension_numbers<[1], [0], [0], [1], [0, 0, 1, 1], [], []>} : vector<48x16xf32>, vector<16x16xf32>, vector<48x16xf32> -> vector<48x16xf32>
    %30 = arith.addf %24, %29 : vector<48x16xf32>
    %c0_28 = arith.constant 0 : index
    %c10 = arith.constant 10 : index
    %c0_29 = arith.constant 0 : index
    %31 = vector.load %arg1[%c0_28, %c10, %c0_29] : memref<1x72x16xf32, #tpu.memory_space<vmem>>, vector<1x48x16xf32>
    %32 = vector.shape_cast %31 : vector<1x48x16xf32> to vector<48x16xf32>
    %c5 = arith.constant 5 : index
    %c0_30 = arith.constant 0 : index
    %c0_31 = arith.constant 0 : index
    %33 = vector.load %arg2[%c5, %c0_30, %c0_31] : memref<9x16x16xf32, #tpu.memory_space<vmem>>, vector<1x16x16xf32>
    %34 = vector.shape_cast %33 : vector<1x16x16xf32> to vector<16x16xf32>
    %cst_32 = arith.constant dense<0.000000e+00> : vector<48x16xf32>
    %35 = tpu.matmul %32, %34, %cst_32 {dimension_numbers = #tpu.dot_dimension_numbers<[1], [0], [0], [1], [0, 0, 1, 1], [], []>} : vector<48x16xf32>, vector<16x16xf32>, vector<48x16xf32> -> vector<48x16xf32>
    %36 = arith.addf %30, %35 : vector<48x16xf32>
    %c0_33 = arith.constant 0 : index
    %c16 = arith.constant 16 : index
    %c0_34 = arith.constant 0 : index
    %37 = vector.load %arg1[%c0_33, %c16, %c0_34] : memref<1x72x16xf32, #tpu.memory_space<vmem>>, vector<1x48x16xf32>
    %38 = vector.shape_cast %37 : vector<1x48x16xf32> to vector<48x16xf32>
    %c6 = arith.constant 6 : index
    %c0_35 = arith.constant 0 : index
    %c0_36 = arith.constant 0 : index
    %39 = vector.load %arg2[%c6, %c0_35, %c0_36] : memref<9x16x16xf32, #tpu.memory_space<vmem>>, vector<1x16x16xf32>
    %40 = vector.shape_cast %39 : vector<1x16x16xf32> to vector<16x16xf32>
    %cst_37 = arith.constant dense<0.000000e+00> : vector<48x16xf32>
    %41 = tpu.matmul %38, %40, %cst_37 {dimension_numbers = #tpu.dot_dimension_numbers<[1], [0], [0], [1], [0, 0, 1, 1], [], []>} : vector<48x16xf32>, vector<16x16xf32>, vector<48x16xf32> -> vector<48x16xf32>
    %42 = arith.addf %36, %41 : vector<48x16xf32>
    %c0_38 = arith.constant 0 : index
    %c17 = arith.constant 17 : index
    %c0_39 = arith.constant 0 : index
    %43 = vector.load %arg1[%c0_38, %c17, %c0_39] : memref<1x72x16xf32, #tpu.memory_space<vmem>>, vector<1x48x16xf32>
    %44 = vector.shape_cast %43 : vector<1x48x16xf32> to vector<48x16xf32>
    %c7 = arith.constant 7 : index
    %c0_40 = arith.constant 0 : index
    %c0_41 = arith.constant 0 : index
    %45 = vector.load %arg2[%c7, %c0_40, %c0_41] : memref<9x16x16xf32, #tpu.memory_space<vmem>>, vector<1x16x16xf32>
    %46 = vector.shape_cast %45 : vector<1x16x16xf32> to vector<16x16xf32>
    %cst_42 = arith.constant dense<0.000000e+00> : vector<48x16xf32>
    %47 = tpu.matmul %44, %46, %cst_42 {dimension_numbers = #tpu.dot_dimension_numbers<[1], [0], [0], [1], [0, 0, 1, 1], [], []>} : vector<48x16xf32>, vector<16x16xf32>, vector<48x16xf32> -> vector<48x16xf32>
    %48 = arith.addf %42, %47 : vector<48x16xf32>
    %c0_43 = arith.constant 0 : index
    %c18 = arith.constant 18 : index
    %c0_44 = arith.constant 0 : index
    %49 = vector.load %arg1[%c0_43, %c18, %c0_44] : memref<1x72x16xf32, #tpu.memory_space<vmem>>, vector<1x48x16xf32>
    %50 = vector.shape_cast %49 : vector<1x48x16xf32> to vector<48x16xf32>
    %c8_45 = arith.constant 8 : index
    %c0_46 = arith.constant 0 : index
    %c0_47 = arith.constant 0 : index
    %51 = vector.load %arg2[%c8_45, %c0_46, %c0_47] : memref<9x16x16xf32, #tpu.memory_space<vmem>>, vector<1x16x16xf32>
    %52 = vector.shape_cast %51 : vector<1x16x16xf32> to vector<16x16xf32>
    %cst_48 = arith.constant dense<0.000000e+00> : vector<48x16xf32>
    %53 = tpu.matmul %50, %52, %cst_48 {dimension_numbers = #tpu.dot_dimension_numbers<[1], [0], [0], [1], [0, 0, 1, 1], [], []>} : vector<48x16xf32>, vector<16x16xf32>, vector<48x16xf32> -> vector<48x16xf32>
    %54 = arith.addf %48, %53 : vector<48x16xf32>
    %c0_49 = arith.constant 0 : index
    %c0_50 = arith.constant 0 : index
    %55 = vector.load %arg3[%c0_49, %c0_50] : memref<1x16xf32, #tpu.memory_space<vmem>>, vector<1x16xf32>
    %56 = vector.broadcast %55 : vector<1x16xf32> to vector<48x16xf32>
    %57 = arith.addf %54, %56 : vector<48x16xf32>
    %cst_51 = arith.constant 0.000000e+00 : f32
    %58 = vector.broadcast %cst_51 : f32 to vector<48x16xf32>
    %59 = arith.maximumf %57, %58 : vector<48x16xf32>
    %c0_52 = arith.constant 0 : index
    %c0_53 = arith.constant 0 : index
    %60 = vector.load %arg5[%c0_52, %c0_53] : memref<48x16xf32, #tpu.memory_space<vmem>>, vector<48x16xf32>
    tpu.vector_store %arg5[%c0_52, %c0_53], %59 {strides = array<i32>} : memref<48x16xf32, #tpu.memory_space<vmem>>, vector<48x16xf32>,
    %61 = tpu.iota {dimensions = array<i32: 1>} : vector<3x6xi32>
    %62 = tpu.iota {dimensions = array<i32: 0>} : vector<3x6xi32>
    %c2_i32 = arith.constant 2 : i32
    %63 = vector.broadcast %c2_i32 : i32 to vector<3x6xi32>
    %64 = arith.muli %63, %62 : vector<3x6xi32>
    %65 = arith.cmpi eq, %61, %64 : vector<3x6xi32>
    %66 = arith.extui %65 : vector<3x6xi1> to vector<3x6xi32>
    %67 = arith.sitofp %66 : vector<3x6xi32> to vector<3x6xf32>
    %c0_54 = arith.constant 0 : index
    %c0_55 = arith.constant 0 : index
    %68 = vector.load %arg5[%c0_54, %c0_55] : memref<48x16xf32, #tpu.memory_space<vmem>>, vector<6x16xf32>
    %c1_56 = arith.constant 1 : index
    %c0_57 = arith.constant 0 : index
    %69 = vector.load %arg5[%c1_56, %c0_57] : memref<48x16xf32, #tpu.memory_space<vmem>>, vector<6x16xf32>
    %c8_58 = arith.constant 8 : index
    %c0_59 = arith.constant 0 : index
    %70 = vector.load %arg5[%c8_58, %c0_59] : memref<48x16xf32, #tpu.memory_space<vmem>>, vector<6x16xf32>
    %c9_60 = arith.constant 9 : index
    %c0_61 = arith.constant 0 : index
    %71 = vector.load %arg5[%c9_60, %c0_61] : memref<48x16xf32, #tpu.memory_space<vmem>>, vector<6x16xf32>
    %72 = arith.maximumf %68, %69 : vector<6x16xf32>
    %73 = arith.maximumf %70, %71 : vector<6x16xf32>
    %74 = arith.maximumf %72, %73 : vector<6x16xf32>
    %cst_62 = arith.constant dense<0.000000e+00> : vector<3x16xf32>
    %75 = tpu.matmul %67, %74, %cst_62 {dimension_numbers = #tpu.dot_dimension_numbers<[1], [0], [0], [1], [0, 0, 1, 1], [], []>} : vector<3x6xf32>, vector<6x16xf32>, vector<3x16xf32> -> vector<3x16xf32>
    %c0_63 = arith.constant 0 : index
    %c0_64 = arith.constant 0 : index
    %c0_65 = arith.constant 0 : index
    %c0_66 = arith.constant 0 : index
    %76 = vector.load %arg4[%c0_63, %c0_64, %c0_65, %c0_66] : memref<1x3x3x16xf32, #tpu.memory_space<vmem>>, vector<1x1x3x16xf32>
    %77 = vector.shape_cast %76 : vector<1x1x3x16xf32> to vector<3x16xf32>
    %78 = vector.shape_cast %75 : vector<3x16xf32> to vector<1x1x3x16xf32>
    tpu.vector_store %arg4[%c0_63, %c0_64, %c0_65, %c0_66], %78 {strides = array<i32>} : memref<1x3x3x16xf32, #tpu.memory_space<vmem>>, vector<1x1x3x16xf32>,
    %c16_67 = arith.constant 16 : index
    %c0_68 = arith.constant 0 : index
    %79 = vector.load %arg5[%c16_67, %c0_68] : memref<48x16xf32, #tpu.memory_space<vmem>>, vector<6x16xf32>
    %c17_69 = arith.constant 17 : index
    %c0_70 = arith.constant 0 : index
    %80 = vector.load %arg5[%c17_69, %c0_70] : memref<48x16xf32, #tpu.memory_space<vmem>>, vector<6x16xf32>
    %c24 = arith.constant 24 : index
    %c0_71 = arith.constant 0 : index
    %81 = vector.load %arg5[%c24, %c0_71] : memref<48x16xf32, #tpu.memory_space<vmem>>, vector<6x16xf32>
    %c25 = arith.constant 25 : index
    %c0_72 = arith.constant 0 : index
    %82 = vector.load %arg5[%c25, %c0_72] : memref<48x16xf32, #tpu.memory_space<vmem>>, vector<6x16xf32>
    %83 = arith.maximumf %79, %80 : vector<6x16xf32>
    %84 = arith.maximumf %81, %82 : vector<6x16xf32>
    %85 = arith.maximumf %83, %84 : vector<6x16xf32>
    %cst_73 = arith.constant dense<0.000000e+00> : vector<3x16xf32>
    %86 = tpu.matmul %67, %85, %cst_73 {dimension_numbers = #tpu.dot_dimension_numbers<[1], [0], [0], [1], [0, 0, 1, 1], [], []>} : vector<3x6xf32>, vector<6x16xf32>, vector<3x16xf32> -> vector<3x16xf32>
    %c0_74 = arith.constant 0 : index
    %c1_75 = arith.constant 1 : index
    %c0_76 = arith.constant 0 : index
    %c0_77 = arith.constant 0 : index
    %87 = vector.load %arg4[%c0_74, %c1_75, %c0_76, %c0_77] : memref<1x3x3x16xf32, #tpu.memory_space<vmem>>, vector<1x1x3x16xf32>
    %88 = vector.shape_cast %87 : vector<1x1x3x16xf32> to vector<3x16xf32>
    %89 = vector.shape_cast %86 : vector<3x16xf32> to vector<1x1x3x16xf32>
    tpu.vector_store %arg4[%c0_74, %c1_75, %c0_76, %c0_77], %89 {strides = array<i32>} : memref<1x3x3x16xf32, #tpu.memory_space<vmem>>, vector<1x1x3x16xf32>,
    %c32 = arith.constant 32 : index
    %c0_78 = arith.constant 0 : index
    %90 = vector.load %arg5[%c32, %c0_78] : memref<48x16xf32, #tpu.memory_space<vmem>>, vector<6x16xf32>
    %c33 = arith.constant 33 : index
    %c0_79 = arith.constant 0 : index
    %91 = vector.load %arg5[%c33, %c0_79] : memref<48x16xf32, #tpu.memory_space<vmem>>, vector<6x16xf32>
    %c40 = arith.constant 40 : index
    %c0_80 = arith.constant 0 : index
    %92 = vector.load %arg5[%c40, %c0_80] : memref<48x16xf32, #tpu.memory_space<vmem>>, vector<6x16xf32>
    %c41 = arith.constant 41 : index
    %c0_81 = arith.constant 0 : index
    %93 = vector.load %arg5[%c41, %c0_81] : memref<48x16xf32, #tpu.memory_space<vmem>>, vector<6x16xf32>
    %94 = arith.maximumf %90, %91 : vector<6x16xf32>
    %95 = arith.maximumf %92, %93 : vector<6x16xf32>
    %96 = arith.maximumf %94, %95 : vector<6x16xf32>
    %cst_82 = arith.constant dense<0.000000e+00> : vector<3x16xf32>
    %97 = tpu.matmul %67, %96, %cst_82 {dimension_numbers = #tpu.dot_dimension_numbers<[1], [0], [0], [1], [0, 0, 1, 1], [], []>} : vector<3x6xf32>, vector<6x16xf32>, vector<3x16xf32> -> vector<3x16xf32>
    %c0_83 = arith.constant 0 : index
    %c2_84 = arith.constant 2 : index
    %c0_85 = arith.constant 0 : index
    %c0_86 = arith.constant 0 : index
    %98 = vector.load %arg4[%c0_83, %c2_84, %c0_85, %c0_86] : memref<1x3x3x16xf32, #tpu.memory_space<vmem>>, vector<1x1x3x16xf32>
    %99 = vector.shape_cast %98 : vector<1x1x3x16xf32> to vector<3x16xf32>
    %100 = vector.shape_cast %97 : vector<3x16xf32> to vector<1x1x3x16xf32>
    tpu.vector_store %arg4[%c0_83, %c2_84, %c0_85, %c0_86], %100 {strides = array<i32>} : memref<1x3x3x16xf32, #tpu.memory_space<vmem>>, vector<1x1x3x16xf32>,
    return
  }
  func.func @transform_0(%arg0: i32) -> (i32, i32, i32) {
    %c0_i32 = arith.constant 0 : i32
    %c0_i32_0 = arith.constant 0 : i32
    %c0_i32_1 = arith.constant 0 : i32
    return %arg0, %c0_i32, %c0_i32_0 : i32, i32, i32
  }
  func.func @transform_1(%arg0: i32) -> (i32, i32, i32) {
    %c0_i32 = arith.constant 0 : i32
    %c0_i32_0 = arith.constant 0 : i32
    %c0_i32_1 = arith.constant 0 : i32
    %c0_i32_2 = arith.constant 0 : i32
    return %c0_i32, %c0_i32_0, %c0_i32_1 : i32, i32, i32
  }
  func.func @transform_2(%arg0: i32) -> (i32, i32) {
    %c0_i32 = arith.constant 0 : i32
    %c0_i32_0 = arith.constant 0 : i32
    %c0_i32_1 = arith.constant 0 : i32
    return %c0_i32, %c0_i32_0 : i32, i32
  }
  func.func @transform_3(%arg0: i32) -> (i32, i32, i32, i32) {
    %c0_i32 = arith.constant 0 : i32
    %c0_i32_0 = arith.constant 0 : i32
    %c0_i32_1 = arith.constant 0 : i32
    %c0_i32_2 = arith.constant 0 : i32
    return %arg0, %c0_i32, %c0_i32_0, %c0_i32_1 : i32, i32, i32, i32
  }
}

module attributes {stable_mosaic.version = 11 : i64} {
  func.func @_mlp_kernel(%arg0: i32, %arg1: memref<2x144xf32, #tpu.memory_space<vmem>>, %arg2: memref<144x256xf32, #tpu.memory_space<vmem>>, %arg3: memref<1x256xf32, #tpu.memory_space<vmem>>, %arg4: memref<256x2xf32, #tpu.memory_space<vmem>>, %arg5: memref<1x2xf32, #tpu.memory_space<vmem>>, %arg6: memref<2x2xf32, #tpu.memory_space<vmem>>) attributes {dimension_semantics = [#tpu.dimension_semantics<parallel>], iteration_bounds = array<i64: 1>, scalar_prefetch = 0 : i64, scratch_operands = 0 : i64, tpu.core_type = #tpu.core_type<tc>, window_params = [{transform_indices = @transform_0, window_bounds = array<i64: 2, 144>}, {pipeline_mode = #tpu.pipeline_mode<synchronous>, transform_indices = @transform_1, window_bounds = array<i64: 144, 256>}, {pipeline_mode = #tpu.pipeline_mode<synchronous>, transform_indices = @transform_2, window_bounds = array<i64: 1, 256>}, {pipeline_mode = #tpu.pipeline_mode<synchronous>, transform_indices = @transform_3, window_bounds = array<i64: 256, 2>}, {pipeline_mode = #tpu.pipeline_mode<synchronous>, transform_indices = @transform_4, window_bounds = array<i64: 1, 2>}, {transform_indices = @transform_5, window_bounds = array<i64: 2, 2>}]} {
    %c0 = arith.constant 0 : index
    %c0_0 = arith.constant 0 : index
    %0 = vector.load %arg1[%c0, %c0_0] : memref<2x144xf32, #tpu.memory_space<vmem>>, vector<2x144xf32>
    %c0_1 = arith.constant 0 : index
    %c0_2 = arith.constant 0 : index
    %1 = vector.load %arg2[%c0_1, %c0_2] : memref<144x256xf32, #tpu.memory_space<vmem>>, vector<144x256xf32>
    %cst = arith.constant dense<0.000000e+00> : vector<2x256xf32>
    %2 = tpu.matmul %0, %1, %cst {dimension_numbers = #tpu.dot_dimension_numbers<[1], [0], [0], [1], [0, 0, 1, 1], [], []>} : vector<2x144xf32>, vector<144x256xf32>, vector<2x256xf32> -> vector<2x256xf32>
    %c0_3 = arith.constant 0 : index
    %c0_4 = arith.constant 0 : index
    %3 = vector.load %arg3[%c0_3, %c0_4] : memref<1x256xf32, #tpu.memory_space<vmem>>, vector<1x256xf32>
    %4 = vector.broadcast %3 : vector<1x256xf32> to vector<2x256xf32>
    %5 = arith.addf %2, %4 : vector<2x256xf32>
    %c0_5 = arith.constant 0 : index
    %c0_6 = arith.constant 0 : index
    %6 = vector.load %arg4[%c0_5, %c0_6] : memref<256x2xf32, #tpu.memory_space<vmem>>, vector<256x2xf32>
    %cst_7 = arith.constant dense<0.000000e+00> : vector<2x2xf32>
    %7 = tpu.matmul %5, %6, %cst_7 {dimension_numbers = #tpu.dot_dimension_numbers<[1], [0], [0], [1], [0, 0, 1, 1], [], []>} : vector<2x256xf32>, vector<256x2xf32>, vector<2x2xf32> -> vector<2x2xf32>
    %c0_8 = arith.constant 0 : index
    %c0_9 = arith.constant 0 : index
    %8 = vector.load %arg5[%c0_8, %c0_9] : memref<1x2xf32, #tpu.memory_space<vmem>>, vector<1x2xf32>
    %9 = vector.broadcast %8 : vector<1x2xf32> to vector<2x2xf32>
    %10 = arith.addf %7, %9 : vector<2x2xf32>
    %c0_10 = arith.constant 0 : index
    %c0_11 = arith.constant 0 : index
    %11 = vector.load %arg6[%c0_10, %c0_11] : memref<2x2xf32, #tpu.memory_space<vmem>>, vector<2x2xf32>
    tpu.vector_store %arg6[%c0_10, %c0_11], %10 {strides = array<i32>} : memref<2x2xf32, #tpu.memory_space<vmem>>, vector<2x2xf32>,
    return
  }
  func.func @transform_0(%arg0: i32) -> (i32, i32) {
    %c0_i32 = arith.constant 0 : i32
    %c0_i32_0 = arith.constant 0 : i32
    return %arg0, %c0_i32 : i32, i32
  }
  func.func @transform_1(%arg0: i32) -> (i32, i32) {
    %c0_i32 = arith.constant 0 : i32
    %c0_i32_0 = arith.constant 0 : i32
    %c0_i32_1 = arith.constant 0 : i32
    return %c0_i32, %c0_i32_0 : i32, i32
  }
  func.func @transform_2(%arg0: i32) -> (i32, i32) {
    %c0_i32 = arith.constant 0 : i32
    %c0_i32_0 = arith.constant 0 : i32
    %c0_i32_1 = arith.constant 0 : i32
    return %c0_i32, %c0_i32_0 : i32, i32
  }
  func.func @transform_3(%arg0: i32) -> (i32, i32) {
    %c0_i32 = arith.constant 0 : i32
    %c0_i32_0 = arith.constant 0 : i32
    %c0_i32_1 = arith.constant 0 : i32
    return %c0_i32, %c0_i32_0 : i32, i32
  }
  func.func @transform_4(%arg0: i32) -> (i32, i32) {
    %c0_i32 = arith.constant 0 : i32
    %c0_i32_0 = arith.constant 0 : i32
    %c0_i32_1 = arith.constant 0 : i32
    return %c0_i32, %c0_i32_0 : i32, i32
  }
  func.func @transform_5(%arg0: i32) -> (i32, i32) {
    %c0_i32 = arith.constant 0 : i32
    %c0_i32_0 = arith.constant 0 : i32
    return %arg0, %c0_i32 : i32, i32
  }
}

</mosaic_0001>

<bundles_post_ra>
// kernel: cnn_forward.5
= control target key start
LH: loop header
LB: loop body
LE: loop exit
PB: predicated region body
PF: predicated region fallthrough
CT: control target
= control target key end

     0   :  { %vm80_vm0 = vcmask 130048   ;;  %s672_s0 = inlined_call_operand.vmem [shape: f32[2,144], index: 0, kind: input, shape index: {}]   ;;  %s673_s1 = inlined_call_operand.vmem [shape: f32[144,256], index: 1, kind: input, shape index: {}]   ;;  %s674_s2 = inlined_call_operand.vmem [shape: f32[1,256], index: 2, kind: input, shape index: {}]   ;;  %s675_s3 = inlined_call_operand.vmem [shape: f32[256,2], index: 3, kind: input, shape index: {}]   ;;  %s676_s4 = inlined_call_operand.vmem [shape: f32[1,2], index: 4, kind: input, shape index: {}]   ;;  %s677_s5 = inlined_call_operand.hbm [shape: f32[2,2], index: 5, kind: output, shape index: {}]  }
   0x1   :  { %v23_v0 = vld [vmem:[%s673_s1 + $0x8] sm:$0xff]  ;;  %v25_v1 = vld [vmem:[%s673_s1 + $0x18] sm:$0xff]  ;;  %v22_v2 = vld [vmem:[%s673_s1] sm:$0xff] }
   0x2   :  { %v317_v3 = vpack.c.bf16 %v25_v1, %v23_v0  ;;  %v24_v4 = vld [vmem:[%s673_s1 + $0x10] sm:$0xff]  ;;  %v27_v5 = vld [vmem:[%s673_s1 + $0x28] sm:$0xff]  ;;  %v29_v6 = vld [vmem:[%s673_s1 + $0x38] sm:$0xff] }
   0x3   :  { %v319_v7 = vpack.c.bf16 %v24_v4, %v22_v2  ;;  %v321_v8 = vpack.c.bf16 %v29_v6, %v27_v5  ;;  %v26_v9 = vld [vmem:[%s673_s1 + $0x20] sm:$0xff]  ;;  %v28_v10 = vld [vmem:[%s673_s1 + $0x30] sm:$0xff]  ;;  %v31_v11 = vld [vmem:[%s673_s1 + $0x48] sm:$0xff] }
   0x4   :  { %318 = vmatprep.subr.bf16.mxu0 %v317_v3  ;;  %v33_v12 = vld [vmem:[%s673_s1 + $0x58] sm:$0xff]  ;;  %v323_v13 = vpack.c.bf16 %v28_v10, %v26_v9  ;;  %v30_v15 = vld [vmem:[%s673_s1 + $0x40] sm:$0xff]  ;;  %v32_v16 = vld [vmem:[%s673_s1 + $0x50] sm:$0xff] }
   0x5   :  { %320 = vmatpush1.bf16.msra.mxu0 %v319_v7  ;;  %v325_v14 = vpack.c.bf16 %v33_v12, %v31_v11  ;;  %v35_v17 = vld [vmem:[%s673_s1 + $0x68] sm:$0xff]  ;;  %v37_v18 = vld [vmem:[%s673_s1 + $0x78] sm:$0xff]  ;;  %v327_v19 = vpack.c.bf16 %v32_v16, %v30_v15  ;;  %v34_v21 = vld [vmem:[%s673_s1 + $0x60] sm:$0xff] }
   0x6   :  { %322 = vmatprep.subr.bf16.mxu0 %v321_v8  ;;  %v329_v20 = vpack.c.bf16 %v37_v18, %v35_v17  ;;  %v36_v22 = vld [vmem:[%s673_s1 + $0x70] sm:$0xff]  ;;  %v39_v23 = vld [vmem:[%s673_s1 + $0x88] sm:$0xff]  ;;  %v41_v24 = vld [vmem:[%s673_s1 + $0x98] sm:$0xff] }
   0x7   :  { %v38_v25 = vld [vmem:[%s673_s1 + $0x80] sm:$0xff]  ;;  %v40_v26 = vld [vmem:[%s673_s1 + $0x90] sm:$0xff]  ;;  %v331_v27 = vpack.c.bf16 %v36_v22, %v34_v21  ;;  %v43_v28 = vld [vmem:[%s673_s1 + $0xa8] sm:$0xff]  ;;  %v333_v33 = vpack.c.bf16 %v41_v24, %v39_v23 }
   0x8   :  { %v45_v29 = vld [vmem:[%s673_s1 + $0xb8] sm:$0xff]  ;;  %v510_v30 = vld.sshfl [vmem:[%s672_s0] sm:$0x33 pattern:$0x76325410]  ;;  %v171_v32 = vld [vmem:[%s675_s3 + $0x88] sm:$0xff]  ;;  %v335_v46 = vpack.c.bf16 %v40_v26, %v38_v25 }
   0x9   :  { %324 = vmatpush1.bf16.msra.mxu0 %v323_v13  ;;  %v170_v31 = vld [vmem:[%s675_s3 + $0x80] sm:$0xff]  ;;  %v78_v34 = vcombine.high %v510_v30, %v510_v30  ;;  %v155_v37 = vld [vmem:[%s675_s3 + $0x8] sm:$0xff]  ;;  %v172_v38 = vld [vmem:[%s675_s3 + $0x90] sm:$0xff]  ;;  %v337_v50 = vpack.c.bf16 %v45_v29, %v43_v28 }
   0xa   :  { %326 = vmatprep.subr.bf16.mxu0 %v325_v14  ;;  %v353_v35 = vpack.c.bf16 %v171_v32, %v170_v31  ;;  %v154_v36 = vld [vmem:[%s675_s3] sm:$0xff]  ;;  %v173_v40 = vld [vmem:[%s675_s3 + $0x98] sm:$0xff]  ;;  %v156_v41 = vld [vmem:[%s675_s3 + $0x10] sm:$0xff] }
   0xb   :  { %v355_v39 = vpack.c.bf16 %v155_v37, %v154_v36  ;;  %v157_v42 = vld [vmem:[%s675_s3 + $0x18] sm:$0xff]  ;;  %280 = vmatprep.mubr.msk.f32.mxu0 %vm80_vm0, %v78_v34  ;;  %v357_v43 = vpack.c.bf16 %v173_v40, %v172_v38  ;;  %v174_v44 = vld [vmem:[%s675_s3 + $0xa0] sm:$0xff]  ;;  %v175_v45 = vld [vmem:[%s675_s3 + $0xa8] sm:$0xff] }
   0xc   :  { %354 = vmatprep.subr.bf16.mxu1 %v353_v35  ;;  %v42_v47 = vld [vmem:[%s673_s1 + $0xa0] sm:$0xff]  ;;  %v44_v48 = vld [vmem:[%s673_s1 + $0xb0] sm:$0xff]  ;;  %v359_v49 = vpack.c.bf16 %v157_v42, %v156_v41  ;;  %v47_v51 = vld [vmem:[%s673_s1 + $0xc8] sm:$0xff]  ;;  %v361_v52 = vpack.c.bf16 %v175_v45, %v174_v44 }
   0xd   :  { %328 = vmatpush1.bf16.msra.mxu0 %v327_v19  ;;  %356 = vmatpush3.bf16.msra.mxu1 %v355_v39  ;;  %v158_v53 = vld [vmem:[%s675_s3 + $0x20] sm:$0xff]  ;;  %v159_v54 = vld [vmem:[%s675_s3 + $0x28] sm:$0xff]  ;;  %v49_v55 = vld [vmem:[%s673_s1 + $0xd8] sm:$0xff]  ;;  %v339_v58 = vpack.c.bf16 %v44_v48, %v42_v47 }
   0xe   :  { %330 = vmatprep.subr.bf16.mxu0 %v329_v20  ;;  %358 = vmatprep.subr.bf16.mxu1 %v357_v43  ;;  %v176_v56 = vld [vmem:[%s675_s3 + $0xb0] sm:$0xff]  ;;  %v177_v57 = vld [vmem:[%s675_s3 + $0xb8] sm:$0xff]  ;;  %v46_v59 = vld [vmem:[%s673_s1 + $0xc0] sm:$0xff]  ;;  %v363_v62 = vpack.c.bf16 %v159_v54, %v158_v53  ;;  %v341_v63 = vpack.c.bf16 %v49_v55, %v47_v51 }
   0xf   :  { %v48_v60 = vld [vmem:[%s673_s1 + $0xd0] sm:$0xff]  ;;  %v51_v61 = vld [vmem:[%s673_s1 + $0xe8] sm:$0xff]  ;;  %v53_v0 = vld [vmem:[%s673_s1 + $0xf8] sm:$0xff]  ;;  %v365_v1 = vpack.c.bf16 %v177_v57, %v176_v56 }
  0x10   :  { %v160_v2 = vld [vmem:[%s675_s3 + $0x30] sm:$0xff]  ;;  %v161_v3 = vld [vmem:[%s675_s3 + $0x38] sm:$0xff]  ;;  %v178_v4 = vld [vmem:[%s675_s3 + $0xc0] sm:$0xff] }
  0x11   :  { %332 = vmatpush1.bf16.msra.mxu0 %v331_v27  ;;  %360 = vmatpush3.bf16.msra.mxu1 %v359_v49  ;;  %v179_v5 = vld [vmem:[%s675_s3 + $0xc8] sm:$0xff] }
  0x12   :  { %334 = vmatprep.subr.bf16.mxu0 %v333_v33  ;;  %362 = vmatprep.subr.bf16.mxu1 %v361_v52 }
  0x15   :  { %336 = vmatpush1.bf16.msra.mxu0 %v335_v46 }
  0x16   :  { %338 = vmatprep.subr.bf16.mxu0 %v337_v50 }
  0x17   :  { %10 = vsyncpa [#allocation3], 0  ;;  %v343_v6 = vpack.c.bf16 %v48_v60, %v46_v59  ;;  %v50_v7 = vld [vmem:[%s673_s1 + $0xe0] sm:$0xff]  ;;  %v52_v8 = vld [vmem:[%s673_s1 + $0xf0] sm:$0xff]  ;;  %364 = vmatpush3.bf16.msra.mxu1 %v363_v62  ;;  %v367_v9 = vpack.c.bf16 %v161_v3, %v160_v2  ;;  %v345_v10 = vpack.c.bf16 %v53_v0, %v51_v61  ;;  %v369_v12 = vpack.c.bf16 %v179_v5, %v178_v4  ;;  %s410_s29 = smov [#allocation2]  }
  0x18   :  { %v55_v11 = vld [vmem:[%s673_s1 + $0x108] sm:$0xff]  ;;  %366 = vmatprep.subr.bf16.mxu1 %v365_v1  ;;  %v162_v13 = vld [vmem:[%s675_s3 + $0x40] sm:$0xff]  ;;  %v57_v15 = vld [vmem:[%s673_s1 + $0x118] sm:$0xff]  ;;  %v347_v18 = vpack.c.bf16 %v52_v8, %v50_v7  ;;  %s271_s30 = sshll.u32 %s410_s29, 4  ;;  %vm263_vm1 = vcmask 9216   ;;  %s272_s30 = int_to_ptr.vmem [resolvable:$true] %s271_s30 }
  0x19   :  { %340 = vmatpush1.bf16.msra.mxu0 %v339_v58  ;;  %v163_v14 = vld [vmem:[%s675_s3 + $0x48] sm:$0xff]  ;;  %v180_v16 = vld [vmem:[%s675_s3 + $0xd0] sm:$0xff]  ;;  %v181_v17 = vld [vmem:[%s675_s3 + $0xd8] sm:$0xff]  ;;  %v349_v21 = vpack.c.bf16 %v57_v15, %v55_v11  ;;  %p391_p1 = scmp.lt.s32.totalorder %s272_s30, %s272_s30 }
  0x1a   :  { %342 = vmatprep.subr.bf16.mxu0 %v341_v63  ;;  %v54_v19 = vld [vmem:[%s673_s1 + $0x100] sm:$0xff]  ;;  %v371_v20 = vpack.c.bf16 %v163_v14, %v162_v13  ;;  %v56_v22 = vld [vmem:[%s673_s1 + $0x110] sm:$0xff]  ;;  %v373_v23 = vpack.c.bf16 %v181_v17, %v180_v16  ;;  %v165_v25 = vld [vmem:[%s675_s3 + $0x58] sm:$0xff] }
  0x1b   :  { %368 = vmatpush3.bf16.msra.mxu1 %v367_v9  ;;  %v164_v24 = vld [vmem:[%s675_s3 + $0x50] sm:$0xff]  ;;  %v182_v26 = vld [vmem:[%s675_s3 + $0xe0] sm:$0xff]  ;;  %v183_v27 = vld [vmem:[%s675_s3 + $0xe8] sm:$0xff]  ;;  %v351_v28 = vpack.c.bf16 %v56_v22, %v54_v19 }
  0x1c   :  { %370 = vmatprep.subr.bf16.mxu1 %v369_v12  ;;  %v375_v29 = vpack.c.bf16 %v165_v25, %v164_v24  ;;  %v377_v31 = vpack.c.bf16 %v183_v27, %v182_v26  ;;  %v166_v32 = vld [vmem:[%s675_s3 + $0x60] sm:$0xff]  ;;  %v167_v33 = vld [vmem:[%s675_s3 + $0x68] sm:$0xff]  ;;  %v184_v35 = vld [vmem:[%s675_s3 + $0xf0] sm:$0xff] }
  0x1d   :  { %344 = vmatpush1.bf16.msra.mxu0 %v343_v6  ;;  %v379_v34 = vpack.c.bf16 %v167_v33, %v166_v32  ;;  %v185_v36 = vld [vmem:[%s675_s3 + $0xf8] sm:$0xff]  ;;  %v168_v38 = vld [vmem:[%s675_s3 + $0x70] sm:$0xff]  ;;  %v58_v43 = vld [vmem:[%s674_s2] sm:$0x3]  ;;  %s386_s2 = scalar_lea.vmem %s272_s30, 32 }
  0x1e   :  { %346 = vmatprep.subr.bf16.mxu0 %v345_v10  ;;  %v381_v37 = vpack.c.bf16 %v185_v36, %v184_v35  ;;  %v169_v39 = vld [vmem:[%s675_s3 + $0x78] sm:$0xff]  ;;  %v281_v52 = vld [vmem:[%s676_s4] ss:$0 sm:$0xff]  ;;  %p387_p0 = scmp.ne.s32.totalorder %s272_s30, %s386_s2  ;;  %p392_p2 = scmp.lt.s32.totalorder %s386_s2, %s386_s2 }
  0x1f   :  { %372 = vmatpush3.bf16.msra.mxu1 %v371_v20  ;;  %v383_v40 = vpack.c.bf16 %v169_v39, %v168_v38 }
  0x20   :  { %374 = vmatprep.subr.bf16.mxu1 %v373_v23  ;;  %p393_p3 = por %p392_p2, %p391_p1 }
  0x21   :  { %348 = vmatpush1.bf16.msra.mxu0 %v347_v18 }
  0x22   :  { %350 = vmatprep.subr.bf16.mxu0 %v349_v21  ;;  %p394_p4 = pnand %p393_p3, %p387_p0 }
  0x23   :  { %376 = vmatpush3.bf16.msra.mxu1 %v375_v29 }
  0x24   :  { %378 = vmatprep.subr.bf16.mxu1 %v377_v31 }
  0x25   :  { %352 = vmatpush1.bf16.msra.mxu0 %v351_v28 }
  0x27   :  { %380 = vmatpush3.bf16.msra.mxu1 %v379_v34 }
  0x28   :  { %148 = vmatmul.mubr.f32.vlgmr.msra.gmra.mrb[0].mxu0 %v510_v30  ;;  %382 = vmatprep.subr.bf16.mxu1 %v381_v37  ;;  %v60_v30 = vlaneseq }
  0x2a   :  { %v61_v41 = vshrl.u32 %v60_v30, 7 }
  0x2b   :  { %384 = vmatpush3.bf16.msra.mxu1 %v383_v40 }
  0x2c   :  { %v66_v42 = vsub.s32 1, %v61_v41  ;;  %v62_v44 = vsub.s32 0, %v61_v41 }
  0x2e   :  { %v67_v45 = vrot.slane %v58_v43, %v66_v42  ;;  %v63_v46 = vrot.slane %v58_v43, %v62_v44 }
  0xfb   :  { %v149_v47 = vpop.f32.mrb[0].mxu0 }
  0xfc   :  { %v151_v48 = vpop.f32.mrb[1].mxu0  ;;  %v150_v50 = vadd.f32 %v149_v47, %v63_v46 }
  0xfd   :  { %v152_v49 = vadd.f32 %v151_v48, %v67_v45 }
  0xff   :  { %257 = vmatprep.mubr.f32.mxu1 %v152_v49 }
 0x100   :  { %258 = vmatmul.mubr.f32.vlgmr.msra.gmra.mrb[0].mxu1 %v150_v50 }
 0x1d3   :  { %v314_v51 = vpop.f32.mrb[0].mxu1 }
 0x1d4   :  { %v315_v53 = vpop.f32.mrb[1].mxu1 }
 0x1d5   :  { %v316_v54 = vadd.f32 %v315_v53, %v314_v51 }
 0x1d7   :  { %v260_v55 = vadd.f32 %v316_v54, %v281_v52 }
 0x1d9   :  { %264 = vst.msk [vmem:[#allocation2] sm:$0x3] %vm263_vm1, %v260_v55 }
 0x1da   :  { %397 = shalt.err (!%p394_p4)
}
 0x1db   :  { %s398_s8 = scalar_lea.hbm %s677_s5, 32 }
 0x1dc   :  { %p399_p5 = scmp.ne.s32.totalorder %s677_s5, %s398_s8  ;;  %p402_p6 = scmp.lt.u32.totalorder %s398_s8, %s677_s5 }
 0x1de   :  { %p404_p7 = pnand %p402_p6, %p399_p5 }
 0x1e0   :  { %407 = shalt.err (!%p404_p7)
}
 0x1e1   :  { %274 = dma.vmem_to_hbm [thread:$0]  %s272_s30, 32, %s677_s5, [#allocation3]  }
 0x1e2   :  { %408 = dma.done.wait [#allocation3], 32  }
 0x1e3   :  { %409 = vsyncadd [#allocation3], 4294967264 }
 0x1e4   :  { %278 = vsyncpa [#allocation3], 1 }

// kernel: cnn_forward.4
= control target key start
LH: loop header
LB: loop body
LE: loop exit
PB: predicated region body
PF: predicated region fallthrough
CT: control target
= control target key end

     0   :  { %s2075_s12 = smov 0   ;;  %s2279_s0 = inlined_call_operand.vmem [shape: f32[2,72,16], index: 0, kind: input, shape index: {}]   ;;  %s2280_s1 = inlined_call_operand.vmem [shape: f32[9,16,16], index: 1, kind: input, shape index: {}]   ;;  %s2281_s2 = inlined_call_operand.vmem [shape: f32[1,16], index: 2, kind: input, shape index: {}]   ;;  %s2282_s3 = inlined_call_operand.vmem [shape: f32[2,3,3,16], index: 3, kind: output, shape index: {}]  }
   0x1 LB: > { %s1650_s13 = sadd.s32 4294967295, %s2051_s12   ;;  %p1654_p0 = scmp.ge.s32.totalorder %s2051_s12, 1  ;;  %s2051_s12 = sphi %s2075_s12, %s13_s12  }
   0x2   : > { %p137_p1 = scmp.lt.s32.totalorder %s2051_s12, 3 }
   0x4   : > { %p138_p2 = pnand %p1654_p0, %p137_p1 }
   0x5   : > { %v1657_v0 = vld [vmem:[%s2280_s1 + $0x10] sm:$0xff] (!%p138_p2)  ;;  %v1658_v1 = vld [vmem:[%s2280_s1 + $0x18] sm:$0xff] (!%p138_p2)  ;;  %v1687_v2 = vld [vmem:[%s2280_s1 + $0x40] sm:$0xff] (!%p138_p2)  ;;  %p161_p3 = scmp.lt.s32.totalorder (!%p138_p2), %s1650_s13, 1  ;;  %vm188_vm0 = vcmask (!%p138_p2), 130048   ;;  %v2053_v51 = vmov (!%p138_p2), 0.0  }
   0x6   : > { %141 = sbr.rel (%p138_p2) target bundleno = 521 (0x209), region = 32  ;;  %v1949_v3 = vpack.c.bf16 (!%p138_p2), %v1658_v1, %v1657_v0  ;;  %v1688_v4 = vld [vmem:[%s2280_s1 + $0x48] sm:$0xff] (!%p138_p2)  ;;  %v177_v5 = vld [vmem:[%s2280_s1] sm:$0xff] (!%p138_p2)  ;;  %v1695_v9 = vld [vmem:[%s2280_s1 + $0x50] sm:$0xff] (!%p138_p2)  ;;  %vm2054_vm1 = vmmov (!%p138_p2), 0   ;;  %v1336_v0 = vlaneseq (!%p138_p2)  ;;  %vm1355_vm3 = vcmask (!%p138_p2), 1045504  }
   0x7   : > { %v178_v6 = vld [vmem:[%s2280_s1 + $0x8] sm:$0xff] (!%p138_p2)  ;;  %v1965_v7 = vpack.c.bf16 (!%p138_p2), %v1688_v4, %v1687_v2  ;;  %v1696_v10 = vld [vmem:[%s2280_s1 + $0x58] sm:$0xff] (!%p138_p2)  ;;  %v1671_v12 = vld [vmem:[%s2280_s1 + $0x20] sm:$0xff] (!%p138_p2)  ;;  %vm1351_vm4 = vcmask (!%p138_p2), 48128   ;;  %vm1429_vm5 = vcmask (!%p138_p2), 124928  }
   0x8   : > { %v1953_v8 = vpack.c.bf16 (!%p138_p2), %v178_v6, %v177_v5  ;;  %1950 = vmatprep.subr.bf16.mxu1 (!%p138_p2), %v1949_v3  ;;  %v1969_v11 = vpack.c.bf16 (!%p138_p2), %v1696_v10, %v1695_v9  ;;  %v1672_v13 = vld [vmem:[%s2280_s1 + $0x28] sm:$0xff] (!%p138_p2)  ;;  %v1703_v14 = vld [vmem:[%s2280_s1 + $0x60] sm:$0xff] (!%p138_p2)  ;;  %v1679_v27 = vld [vmem:[%s2280_s1 + $0x30] sm:$0xff] (!%p138_p2)  ;;  %v1339_v9 = vshrl.u32 (!%p138_p2), %v1336_v0, 7 }
   0x9   : > { %1966 = vmatprep.subr.bf16.mxu0 (!%p138_p2), %v1965_v7  ;;  %1952 = vmatpush3.bf16.msra.mxu1 (!%p138_p2), %v1949_v3  ;;  %v1704_v15 = vld [vmem:[%s2280_s1 + $0x68] sm:$0xff] (!%p138_p2)  ;;  %v1957_v20 = vpack.c.bf16 (!%p138_p2), %v1672_v13, %v1671_v12  ;;  %v1680_v28 = vld [vmem:[%s2280_s1 + $0x38] sm:$0xff] (!%p138_p2)  ;;  %v1711_v29 = vld [vmem:[%s2280_s1 + $0x70] sm:$0xff] (!%p138_p2) }
   0xa   : > { %1968 = vmatpush3.bf16.msra.mxu0 (!%p138_p2), %v1965_v7  ;;  %1954 = vmatprep.subr.bf16.mxu1 (!%p138_p2), %v1953_v8  ;;  %v1973_v21 = vpack.c.bf16 (!%p138_p2), %v1704_v15, %v1703_v14  ;;  %v1712_v30 = vld [vmem:[%s2280_s1 + $0x78] sm:$0xff] (!%p138_p2)  ;;  %v1961_v35 = vpack.c.bf16 (!%p138_p2), %v1680_v28, %v1679_v27  ;;  %v1719_v44 = vld [vmem:[%s2280_s1 + $0x80] sm:$0xff] (!%p138_p2)  ;;  %v1720_v45 = vld [vmem:[%s2280_s1 + $0x88] sm:$0xff] (!%p138_p2) }
   0xb   : > { %1970 = vmatprep.subr.bf16.mxu0 (!%p138_p2), %v1969_v11  ;;  %v1977_v36 = vpack.c.bf16 (!%p138_p2), %v1712_v30, %v1711_v29  ;;  %v1981_v46 = vpack.c.bf16 (!%p138_p2), %v1720_v45, %v1719_v44  ;;  %v1727_v59 = vld [vmem:[%s2281_s2] ss:$0 sm:$0xff] (!%p138_p2) }
   0xd   : > { %s2284_s13 = smov (!%p161_p3, %s1650_s13), 1 }
   0xe   : > { %s2033_s30 = smul.u32 72, %s2284_s13 }
   0xf   : > { %s2034_s4 = smul.u32 12, %s2284_s13 }
  0x10   : > { %s2125_s16 = scalar_lea.vmem %s2279_s0, %s2033_s30 }
  0x11   : > { %v179_v16 = vld [vmem:[%s2125_s16 + $0x1] sm:$0xff]  ;;  %v671_v17 = vld [vmem:[%s2125_s16 + $0x9] sm:$0xff]  ;;  %v2130_v18 = vld [vmem:[%s2125_s16 + $0x11] sm:$0xff]  ;;  %s170_s7 = scalar_lea.vmem %s2282_s3, %s2034_s4 }
  0x12   : > { %1821 = vmatprep.mubr.msk.f32.mxu1 %vm188_vm0, %v179_v16  ;;  %1873 = vmatprep.mubr.msk.f32.mxu0 %vm188_vm0, %v671_v17  ;;  %v2135_v19 = vld [vmem:[%s2125_s16 + $0x19] sm:$0xff]  ;;  %v2145_v22 = vld [vmem:[%s2125_s16 + $0x21] sm:$0xff]  ;;  %v2148_v23 = vld [vmem:[%s2125_s16 + $0x29] sm:$0xff] }
  0x13   : > { %1822 = vmatmul.mubr.msk.f32.vlgmr.msra.gmra.mrb[0].mxu1 %vm188_vm0, %v671_v17  ;;  %1874 = vmatmul.mubr.msk.f32.vlgmr.msra.gmra.mrb[0].mxu0 %vm188_vm0, %v2130_v18  ;;  %v2159_v24 = vld [vmem:[%s2125_s16 + $0x31] sm:$0xff]  ;;  %v171_v25 = vld [vmem:[%s2125_s16] sm:$0xff]  ;;  %v172_v31 = vld [vmem:[%s2125_s16 + $0x8] sm:$0xff] }
  0x14   : > { %1824 = vmatprep.mubr.msk.f32.mxu1 %vm188_vm0, %v2130_v18  ;;  %1876 = vmatprep.mubr.msk.f32.mxu0 %vm188_vm0, %v2135_v19  ;;  %v799_v26 = vld [vmem:[%s2125_s16 + $0xa] sm:$0xff]  ;;  %v800_v32 = vld [vmem:[%s2125_s16 + $0x12] sm:$0xff]  ;;  %v801_v34 = vld [vmem:[%s2125_s16 + $0x1a] sm:$0xff] }
  0x15   : > { %1956 = vmatpush3.bf16.msra.mxu1 %v1953_v8  ;;  %1972 = vmatpush3.bf16.msra.mxu0 %v1969_v11  ;;  %v173_v33 = vld [vmem:[%s2125_s16 + $0x10] sm:$0xff]  ;;  %v174_v37 = vld [vmem:[%s2125_s16 + $0x18] sm:$0xff]  ;;  %v802_v38 = vld [vmem:[%s2125_s16 + $0x22] sm:$0xff] }
  0x16   : > { %1958 = vmatprep.subr.bf16.mxu1 %v1957_v20  ;;  %1974 = vmatprep.subr.bf16.mxu0 %v1973_v21  ;;  %v175_v39 = vld [vmem:[%s2125_s16 + $0x20] sm:$0xff]  ;;  %v803_v40 = vld [vmem:[%s2125_s16 + $0x2a] sm:$0xff]  ;;  %v804_v42 = vld [vmem:[%s2125_s16 + $0x32] sm:$0xff] }
  0x17   : > { %1825 = vmatmul.mubr.msk.f32.gmra.mrb[2].mxu1 %vm188_vm0, %v2135_v19  ;;  %1877 = vmatmul.mubr.msk.f32.gmra.mrb[2].mxu0 %vm188_vm0, %v2145_v22  ;;  %v176_v41 = vld [vmem:[%s2125_s16 + $0x28] sm:$0xff]  ;;  %v931_v47 = vld [vmem:[%s2125_s16 + $0x30] sm:$0xff]  ;;  %v932_v48 = vld [vmem:[%s2125_s16 + $0x38] sm:$0xff] }
  0x18   : > { %1827 = vmatprep.mubr.msk.f32.mxu1 %vm188_vm0, %v2145_v22  ;;  %1879 = vmatprep.mubr.msk.f32.mxu0 %vm188_vm0, %v2148_v23  ;;  %v415_v43 = vld [vmem:[%s2125_s16 + $0x2] sm:$0xff]  ;;  %v1060_v49 = vld [vmem:[%s2125_s16 + $0x39] sm:$0xff] }
  0x19   : > { %v1188_v50 = vld [vmem:[%s2125_s16 + $0x3a] sm:$0xff] }
  0x1b   : > { %1828 = vmatmul.mubr.msk.f32.gmra.mrb[4].mxu1 %vm188_vm0, %v2148_v23  ;;  %1880 = vmatmul.mubr.msk.f32.gmra.mrb[4].mxu0 %vm188_vm0, %v2159_v24 }
  0x1c   : > { %1834 = vmatprep.mubr.msk.f32.mxu1 %vm188_vm0, %v171_v25  ;;  %1886 = vmatprep.mubr.msk.f32.mxu0 %vm188_vm0, %v799_v26 }
  0x1f   : > { %1835 = vmatmul.mubr.msk.f32.vlgmr.msra.gmra.mrb[0].mxu1 %vm188_vm0, %v172_v31  ;;  %1887 = vmatmul.mubr.msk.f32.vlgmr.msra.gmra.mrb[0].mxu0 %vm188_vm0, %v800_v32 }
  0x20   : > { %1837 = vmatprep.mubr.msk.f32.mxu1 %vm188_vm0, %v173_v33  ;;  %1889 = vmatprep.mubr.msk.f32.mxu0 %vm188_vm0, %v801_v34 }
  0x21   : > { %1960 = vmatpush3.bf16.msra.mxu1 %v1957_v20  ;;  %1976 = vmatpush3.bf16.msra.mxu0 %v1973_v21 }
  0x22   : > { %1962 = vmatprep.subr.bf16.mxu1 %v1961_v35  ;;  %1978 = vmatprep.subr.bf16.mxu0 %v1977_v36 }
  0x23   : > { %1838 = vmatmul.mubr.msk.f32.gmra.mrb[2].mxu1 %vm188_vm0, %v174_v37  ;;  %1890 = vmatmul.mubr.msk.f32.gmra.mrb[2].mxu0 %vm188_vm0, %v802_v38 }
  0x24   : > { %1840 = vmatprep.mubr.msk.f32.mxu1 %vm188_vm0, %v175_v39  ;;  %1892 = vmatprep.mubr.msk.f32.mxu0 %vm188_vm0, %v803_v40 }
  0x27   : > { %1841 = vmatmul.mubr.msk.f32.gmra.mrb[4].mxu1 %vm188_vm0, %v176_v41  ;;  %1893 = vmatmul.mubr.msk.f32.gmra.mrb[4].mxu0 %vm188_vm0, %v804_v42 }
  0x28   : > { %1847 = vmatprep.mubr.msk.f32.mxu1 %vm188_vm0, %v415_v43  ;;  %1899 = vmatprep.mubr.msk.f32.mxu0 %vm188_vm0, %v173_v33 }
  0x2b   : > { %1848 = vmatmul.mubr.msk.f32.vlgmr.msra.gmra.mrb[0].mxu1 %vm188_vm0, %v799_v26  ;;  %1900 = vmatmul.mubr.msk.f32.vlgmr.msra.gmra.mrb[0].mxu0 %vm188_vm0, %v174_v37 }
  0x2c   : > { %1850 = vmatprep.mubr.msk.f32.mxu1 %vm188_vm0, %v800_v32  ;;  %1902 = vmatprep.mubr.msk.f32.mxu0 %vm188_vm0, %v175_v39 }
  0x2d   : > { %1964 = vmatpush3.bf16.msra.mxu1 %v1961_v35  ;;  %1980 = vmatpush3.bf16.msra.mxu0 %v1977_v36 }
  0x2e   : > { %1982 = vmatprep.subr.bf16.mxu0 %v1981_v46  ;;  %1934 = vmatprep.subr.mxu1 %v2053_v51 }
  0x2f   : > { %1851 = vmatmul.mubr.msk.f32.gmra.mrb[2].mxu1 %vm188_vm0, %v801_v34  ;;  %1903 = vmatmul.mubr.msk.f32.gmra.mrb[2].mxu0 %vm188_vm0, %v176_v41 }
  0x30   : > { %1853 = vmatprep.mubr.msk.f32.mxu1 %vm188_vm0, %v802_v38  ;;  %1905 = vmatprep.mubr.msk.f32.mxu0 %vm188_vm0, %v931_v47 }
  0x33   : > { %1854 = vmatmul.mubr.msk.f32.gmra.mrb[4].mxu1 %vm188_vm0, %v803_v40  ;;  %1906 = vmatmul.mubr.msk.f32.gmra.mrb[4].mxu0 %vm188_vm0, %v932_v48 }
  0x34   : > { %1860 = vmatprep.mubr.msk.f32.mxu1 %vm188_vm0, %v172_v31  ;;  %1912 = vmatprep.mubr.msk.f32.mxu0 %vm188_vm0, %v2130_v18  ;;  %v1337_v18 = vand.u32 127, %v1336_v0 }
  0x37   : > { %1861 = vmatmul.mubr.msk.f32.vlgmr.msra.gmra.mrb[0].mxu1 %vm188_vm0, %v173_v33  ;;  %1913 = vmatmul.mubr.msk.f32.vlgmr.msra.gmra.mrb[0].mxu0 %vm188_vm0, %v2135_v19  ;;  %v1340_v19 = vmul.u32 2, %v1339_v9 }
  0x38   : > { %1863 = vmatprep.mubr.msk.f32.mxu1 %vm188_vm0, %v174_v37  ;;  %1915 = vmatprep.mubr.msk.f32.mxu0 %vm188_vm0, %v2145_v22 }
  0x39   : > { %1984 = vmatpush3.bf16.msra.mxu0 %v1981_v46  ;;  %vm1341_vm2 = vcmp.eq.s32.totalorder %v1337_v18, %v1340_v19 }
  0x3a   : > { %v1728_v30 = vsel %vm1341_vm2, 1.0, %v2053_v51 }
  0x3b   : > { %1864 = vmatmul.mubr.msk.f32.gmra.mrb[2].mxu1 %vm188_vm0, %v175_v39  ;;  %1916 = vmatmul.mubr.msk.f32.gmra.mrb[2].mxu0 %vm188_vm0, %v2148_v23 }
  0x3c   : > { %1866 = vmatprep.mubr.msk.f32.mxu1 %vm188_vm0, %v176_v41  ;;  %1918 = vmatprep.mubr.msk.f32.mxu0 %vm188_vm0, %v2159_v24 }
  0x3f   : > { %1867 = vmatmul.mubr.msk.f32.gmra.mrb[4].mxu1 %vm188_vm0, %v931_v47  ;;  %1919 = vmatmul.mubr.msk.f32.gmra.mrb[4].mxu0 %vm188_vm0, %v1060_v49 }
  0x40   : > { %1925 = vmatprep.mubr.msk.f32.mxu0 %vm188_vm0, %v800_v32  ;;  %1936 = vmatprep.mubr.msk.f32.mxu1 %vm2054_vm1, %v2053_v51 }
  0x43   : > { %1926 = vmatmul.mubr.msk.f32.vlgmr.msra.gmra.mrb[0].mxu0 %vm188_vm0, %v801_v34 }
  0x44   : > { %1928 = vmatprep.mubr.msk.f32.mxu0 %vm188_vm0, %v802_v38 }
  0x47   : > { %1929 = vmatmul.mubr.msk.f32.gmra.mrb[2].mxu0 %vm188_vm0, %v803_v40 }
  0x48   : > { %1931 = vmatprep.mubr.msk.f32.mxu0 %vm188_vm0, %v804_v42 }
  0x4b   : > { %1932 = vmatmul.mubr.msk.f32.gmra.mrb[4].mxu0 %vm188_vm0, %v1188_v50 }
 0x10a   : > { %v1862_v52 = vpop.f32.mrb[0].mxu1 }
 0x10b   : > { %v636_v53 = vpop.f32.mrb[1].mxu1 }
 0x10e   : > { %v1865_v54 = vpop.f32.mrb[2].mxu1 }
 0x10f   : > { %v646_v55 = vpop.f32.mrb[3].mxu1 }
 0x112   : > { %v1868_v56 = vpop.f32.mrb[4].mxu1 }
 0x113   : > { %v656_v57 = vpop.f32.mrb[5].mxu1 }
 0x116   : > { %v1927_v58 = vpop.f32.mrb[0].mxu0 }
 0x117   : > { %v1985_v60 = vadd.f32 %v1927_v58, %v1862_v52  ;;  %v1276_v61 = vpop.f32.mrb[1].mxu0 }
 0x118   : > { %v1986_v62 = vadd.f32 %v1276_v61, %v636_v53 }
 0x119   : > { %v1319_v63 = vadd.f32 %v1985_v60, %v1727_v59 }
 0x11a   : > { %v1318_v1 = vadd.f32 %v1986_v62, %v1727_v59  ;;  %v1930_v2 = vpop.f32.mrb[2].mxu0 }
 0x11b   : > { %v1325_v3 = vmax.f32 %v1319_v63, 0.0  ;;  %v1987_v4 = vadd.f32 %v1930_v2, %v1865_v54  ;;  %v1286_v5 = vpop.f32.mrb[3].mxu0 }
 0x11c   : > { %v1324_v6 = vmax.f32 %v1318_v1, 0.0  ;;  %v1988_v7 = vadd.f32 %v1286_v5, %v646_v55 }
 0x11d   : > { %1331 = vst.msk [vmem:[#allocation2 + $0x8] sm:$0xff] %vm188_vm0, %v1325_v3  ;;  %v1321_v8 = vadd.f32 %v1987_v4, %v1727_v59 }
 0x11e   : > { %1330 = vst.msk [vmem:[#allocation2] sm:$0xff] %vm188_vm0, %v1324_v6  ;;  %v1320_v10 = vadd.f32 %v1988_v7, %v1727_v59  ;;  %v1933_v11 = vpop.f32.mrb[4].mxu0 }
 0x11f   : > { %v1327_v12 = vmax.f32 %v1321_v8, 0.0  ;;  %v1989_v13 = vadd.f32 %v1933_v11, %v1868_v56  ;;  %v1296_v14 = vpop.f32.mrb[5].mxu0 }
 0x120   : > { %v1326_v15 = vmax.f32 %v1320_v10, 0.0  ;;  %v1990_v16 = vadd.f32 %v1296_v14, %v656_v57 }
 0x121   : > { %1333 = vst.msk [vmem:[#allocation2 + $0x18] sm:$0xff] %vm188_vm0, %v1327_v12  ;;  %v1323_v17 = vadd.f32 %v1989_v13, %v1727_v59 }
 0x122   : > { %1332 = vst.msk [vmem:[#allocation2 + $0x10] sm:$0xff] %vm188_vm0, %v1326_v15  ;;  %v1322_v20 = vadd.f32 %v1990_v16, %v1727_v59 }
 0x123   : > { %v1329_v21 = vmax.f32 %v1323_v17, 0.0 }
 0x124   : > { %v1328_v22 = vmax.f32 %v1322_v20, 0.0  ;;  %v1346_v23 = vld [vmem:[#allocation2 + $0x8] sm:$0x3f] }
 0x125   : > { %v1347_v24 = vld [vmem:[#allocation2 + $0x9] sm:$0x3f]  ;;  %1335 = vst.msk [vmem:[#allocation2 + $0x28] sm:$0xff] %vm188_vm0, %v1329_v21  ;;  %v1344_v25 = vld [vmem:[#allocation2] sm:$0x3f] }
 0x126   : > { %v1345_v26 = vld [vmem:[#allocation2 + $0x1] sm:$0x3f]  ;;  %v1349_v27 = vmax.f32 %v1346_v23, %v1347_v24  ;;  %1334 = vst.msk [vmem:[#allocation2 + $0x20] sm:$0xff] %vm188_vm0, %v1328_v22 }
 0x127   : > { %v1348_v28 = vmax.f32 %v1344_v25, %v1345_v26 }
 0x128   : > { %v1433_v31 = vld [vmem:[#allocation2 + $0x18] sm:$0x3f] }
 0x129   : > { %v1350_v29 = vmax.f32 %v1348_v28, %v1349_v27  ;;  %v1434_v32 = vld [vmem:[#allocation2 + $0x19] sm:$0x3f]  ;;  %v1431_v33 = vld [vmem:[#allocation2 + $0x10] sm:$0x3f] }
 0x12a   : > { %v1432_v34 = vld [vmem:[#allocation2 + $0x11] sm:$0x3f]  ;;  %v1436_v35 = vmax.f32 %v1433_v31, %v1434_v32 }
 0x12b   : > { %1935 = vmatpush3.msk.msra.mxu1 %vm1355_vm3, %v1350_v29  ;;  %v1435_v36 = vmax.f32 %v1431_v33, %v1432_v34 }
 0x12c   : > { %1939 = vmatprep.subr.mxu1 %v2053_v51  ;;  %1937 = vmatmul.mubr.msk.f32.vlgmr.msra.gmra.mrb[6].mxu1 %vm1351_vm4, %v1728_v30  ;;  %v1515_v38 = vld [vmem:[#allocation2 + $0x28] sm:$0x3f] }
 0x12d   : > { %v1437_v37 = vmax.f32 %v1435_v36, %v1436_v35  ;;  %1941 = vmatprep.mubr.msk.f32.mxu1 %vm2054_vm1, %v2053_v51  ;;  %v1516_v39 = vld [vmem:[#allocation2 + $0x29] sm:$0x3f]  ;;  %v1513_v40 = vld [vmem:[#allocation2 + $0x20] sm:$0x3f] }
 0x12e   : > { %v1514_v41 = vld [vmem:[#allocation2 + $0x21] sm:$0x3f]  ;;  %v1518_v42 = vmax.f32 %v1515_v38, %v1516_v39 }
 0x12f   : > { %1940 = vmatpush3.msk.msra.mxu1 %vm1355_vm3, %v1437_v37  ;;  %v1517_v43 = vmax.f32 %v1513_v40, %v1514_v41 }
 0x130   : > { %1944 = vmatprep.subr.mxu1 %v2053_v51  ;;  %1942 = vmatmul.mubr.msk.f32.vlgmr.msra.gmra.mrb[8].mxu1 %vm1351_vm4, %v1728_v30 }
 0x131   : > { %v1519_v44 = vmax.f32 %v1517_v43, %v1518_v42  ;;  %1946 = vmatprep.mubr.msk.f32.mxu1 %vm2054_vm1, %v2053_v51 }
 0x133   : > { %1945 = vmatpush3.msk.msra.mxu1 %vm1355_vm3, %v1519_v44 }
 0x134   : > { %1947 = vmatmul.mubr.msk.f32.vlgmr.msra.gmra.mrb[10].mxu1 %vm1351_vm4, %v1728_v30 }
 0x1ff   : > { %v1425_v45 = vpop.f32.mrb[6].mxu1 }
 0x200   : > { %1430 = vst.msk [vmem:[%s170_s7] sm:$0x7] %vm1429_vm5, %v1425_v45  ;;  %v1938_v46 = vpop.f32.mrb[7].mxu1 }
 0x203   : > { %v1507_v47 = vpop.f32.mrb[8].mxu1 }
 0x204   : > { %1733 = vst.msk [vmem:[%s170_s7 + $0x4] sm:$0x7] %vm1429_vm5, %v1507_v47  ;;  %v1943_v48 = vpop.f32.mrb[9].mxu1 }
 0x207   : > { %v1589_v49 = vpop.f32.mrb[10].mxu1 }
 0x208   : > { %1736 = vst.msk [vmem:[%s170_s7 + $0x8] sm:$0x7] %vm1429_vm5, %v1589_v49  ;;  %v1948_v50 = vpop.f32.mrb[11].mxu1 }
 0x209 PF: > { %s13_s12 = sadd.s32 1, %s2051_s12  }
 0x20a   : > { %p10_p4 = scmp.ge.s32.totalorder %s13_s12, 4  }
 0x20c   :  { %12 = sbr.rel (!%p10_p4) target bundleno = 1 (0x1), region = 72 }

// kernel: cnn_forward.3
= control target key start
LH: loop header
LB: loop body
LE: loop exit
PB: predicated region body
PF: predicated region fallthrough
CT: control target
= control target key end

     0   :  { %s4472_s12 = smov 0   ;;  %s5902_s0 = inlined_call_operand.vmem [shape: f32[2,210,3], index: 0, kind: input, shape index: {}]   ;;  %s5903_s1 = inlined_call_operand.vmem [shape: f32[9,3,16], index: 1, kind: input, shape index: {}]   ;;  %s5904_s2 = inlined_call_operand.vmem [shape: f32[1,16], index: 2, kind: input, shape index: {}]   ;;  %s5905_s3 = inlined_call_operand.vmem [shape: f32[2,6,6,16], index: 3, kind: output, shape index: {}]  }
   0x1 LB: > { %s3323_s13 = sadd.s32 4294967295, %s4446_s12   ;;  %p3327_p0 = scmp.ge.s32.totalorder %s4446_s12, 1  ;;  %s4446_s12 = sphi %s4472_s12, %s13_s12  }
   0x2   : > { %p137_p1 = scmp.lt.s32.totalorder %s4446_s12, 3 }
   0x4   : > { %p138_p2 = pnand %p3327_p0, %p137_p1 }
   0x5   : > { %v3330_v0 = vld [vmem:[%s5903_s1 + $0x4] sm:$0x7] (!%p138_p2)  ;;  %vm280_vm0 = vcmask (!%p138_p2), 1042432   ;;  %p161_p3 = scmp.lt.s32.totalorder (!%p138_p2), %s3323_s13, 1  ;;  %v4448_v1 = vmov (!%p138_p2), 0.0   ;;  %vm4449_vm1 = vmmov (!%p138_p2), 0  }
   0x6   : > { %141 = sbr.rel (%p138_p2) target bundleno = 855 (0x357), region = 32  ;;  %3773 = vmatprep.subr.mxu0 (!%p138_p2), %v4448_v1  ;;  %4424 = vmatprep.subr.mxu1 (!%p138_p2), %v4448_v1  ;;  %vm216_vm2 = vcmask (!%p138_p2), 23552   ;;  %v192_v2 = vld [vmem:[%s5903_s1] sm:$0x7] (!%p138_p2)  ;;  %v3375_v5 = vld [vmem:[%s5903_s1 + $0x8] sm:$0x7] (!%p138_p2) }
   0x7   : > { %3774 = vmatpush3.msk.msra.mxu0 (!%p138_p2), %vm280_vm0, %v3330_v0  ;;  %4425 = vmatpush3.msk.msra.mxu1 (!%p138_p2), %vm280_vm0, %v3330_v0  ;;  %v3398_v20 = vld [vmem:[%s5903_s1 + $0xc] sm:$0x7] (!%p138_p2)  ;;  %v3421_v35 = vld [vmem:[%s5903_s1 + $0x10] sm:$0x7] (!%p138_p2)  ;;  %v3444_v0 = vld [vmem:[%s5903_s1 + $0x14] sm:$0x7] (!%p138_p2) }
   0x8   : > { %3775 = vmatprep.mubr.msk.f32.mxu0 (!%p138_p2), %vm4449_vm1, %v4448_v1  ;;  %3817 = vmatprep.mubr.msk.f32.mxu1 (!%p138_p2), %vm4449_vm1, %v4448_v1  ;;  %vm2699_vm3 = vcmask (!%p138_p2), 130048   ;;  %vm2747_vm4 = vcmask (!%p138_p2), 1043456   ;;  %vm4451_vm6 = vmmov (!%p138_p2), 1   ;;  %vm2743_vm8 = vcmask (!%p138_p2), 97280  }
   0x9   : > { %3838 = vmatprep.subr.mxu1 (!%p138_p2), %v4448_v1  ;;  %3903 = vmatprep.subr.mxu0 (!%p138_p2), %v4448_v1  ;;  %vm5783_vm7 = vmpackc.low (!%p138_p2), %vm2747_vm4, %vm4451_vm6  ;;  %vm2821_vm9 = vcmask (!%p138_p2), 128000  }
   0xd   : > { %s5909_s13 = smov (!%p161_p3, %s3323_s13), 1 }
   0xe   : > { %s4426_s16 = smul.u32 216, %s5909_s13 }
   0xf   : > { %s4427_s11 = smul.u32 48, %s5909_s13 }
  0x10   : > { %s4499_s19 = scalar_lea.vmem %s5902_s0, %s4426_s16 }
  0x11   : > { %v193_v3 = vld [vmem:[%s4499_s19 + $0x1] sm:$0xff]  ;;  %v207_v4 = vld [vmem:[%s4499_s19 + $0x71] sm:$0xff]  ;;  %v194_v6 = vld [vmem:[%s4499_s19 + $0x9] sm:$0xff]  ;;  %s170_s16 = scalar_lea.vmem %s5905_s3, %s4427_s11 }
  0x12   : > { %3776 = vmatmul.mubr.msk.f32.vlgmr.msra.gmra.mrb[0].mxu0 %vm216_vm2, %v193_v3  ;;  %3818 = vmatmul.mubr.msk.f32.vlgmr.msra.gmra.mrb[0].mxu1 %vm216_vm2, %v207_v4  ;;  %v208_v7 = vld [vmem:[%s4499_s19 + $0x79] sm:$0xff]  ;;  %v195_v8 = vld [vmem:[%s4499_s19 + $0x11] sm:$0xff]  ;;  %v209_v9 = vld [vmem:[%s4499_s19 + $0x81] sm:$0xff] }
  0x13   : > { %3778 = vmatprep.mubr.msk.f32.mxu0 %vm4449_vm1, %v4448_v1  ;;  %3820 = vmatprep.mubr.msk.f32.mxu1 %vm4449_vm1, %v4448_v1  ;;  %v196_v10 = vld [vmem:[%s4499_s19 + $0x19] sm:$0xff]  ;;  %v210_v11 = vld [vmem:[%s4499_s19 + $0x89] sm:$0xff]  ;;  %v197_v12 = vld [vmem:[%s4499_s19 + $0x21] sm:$0xff] }
  0x14   : > { %3839 = vmatpush3.msk.msra.mxu1 %vm280_vm0, %v192_v2  ;;  %3904 = vmatpush3.msk.msra.mxu0 %vm280_vm0, %v3375_v5  ;;  %v211_v13 = vld [vmem:[%s4499_s19 + $0x91] sm:$0xff]  ;;  %v198_v14 = vld [vmem:[%s4499_s19 + $0x29] sm:$0xff]  ;;  %v212_v15 = vld [vmem:[%s4499_s19 + $0x99] sm:$0xff] }
  0x15   : > { %3968 = vmatprep.subr.mxu1 %v4448_v1  ;;  %4033 = vmatprep.subr.mxu0 %v4448_v1  ;;  %v199_v16 = vld [vmem:[%s4499_s19 + $0x31] sm:$0xff]  ;;  %v213_v17 = vld [vmem:[%s4499_s19 + $0xa1] sm:$0xff]  ;;  %v200_v18 = vld [vmem:[%s4499_s19 + $0x39] sm:$0xff] }
  0x16   : > { %3779 = vmatmul.mubr.msk.f32.gmra.mrb[2].mxu0 %vm216_vm2, %v194_v6  ;;  %3821 = vmatmul.mubr.msk.f32.gmra.mrb[2].mxu1 %vm216_vm2, %v208_v7  ;;  %v171_v19 = vld [vmem:[%s4499_s19] sm:$0xff]  ;;  %v172_v22 = vld [vmem:[%s4499_s19 + $0x8] sm:$0xff]  ;;  %v4590_v24 = vld [vmem:[%s4499_s19 + $0x10] sm:$0xff] }
  0x17   : > { %3781 = vmatprep.mubr.msk.f32.mxu0 %vm4449_vm1, %v4448_v1  ;;  %3823 = vmatprep.mubr.msk.f32.mxu1 %vm4449_vm1, %v4448_v1  ;;  %v201_v21 = vld [vmem:[%s4499_s19 + $0x41] sm:$0xff]  ;;  %v202_v23 = vld [vmem:[%s4499_s19 + $0x49] sm:$0xff]  ;;  %v203_v25 = vld [vmem:[%s4499_s19 + $0x51] sm:$0xff] }
  0x18   : > { %v4601_v26 = vld [vmem:[%s4499_s19 + $0x18] sm:$0xff]  ;;  %v4612_v28 = vld [vmem:[%s4499_s19 + $0x20] sm:$0xff]  ;;  %v4623_v30 = vld [vmem:[%s4499_s19 + $0x28] sm:$0xff] }
  0x19   : > { %v204_v27 = vld [vmem:[%s4499_s19 + $0x59] sm:$0xff]  ;;  %v205_v29 = vld [vmem:[%s4499_s19 + $0x61] sm:$0xff]  ;;  %v206_v31 = vld [vmem:[%s4499_s19 + $0x69] sm:$0xff] }
  0x1a   : > { %3782 = vmatmul.mubr.msk.f32.gmra.mrb[4].mxu0 %vm216_vm2, %v195_v8  ;;  %3824 = vmatmul.mubr.msk.f32.gmra.mrb[4].mxu1 %vm216_vm2, %v209_v9  ;;  %v4634_v32 = vld [vmem:[%s4499_s19 + $0x30] sm:$0xff]  ;;  %v4644_v33 = vld [vmem:[%s4499_s19 + $0x38] sm:$0xff]  ;;  %v690_v34 = vld [vmem:[%s4499_s19 + $0x2] sm:$0xff] }
  0x1b   : > { %3784 = vmatprep.mubr.msk.f32.mxu0 %vm4449_vm1, %v4448_v1  ;;  %3826 = vmatprep.mubr.msk.f32.mxu1 %vm4449_vm1, %v4448_v1  ;;  %v4658_v36 = vld [vmem:[%s4499_s19 + $0x40] sm:$0xff]  ;;  %v691_v37 = vld [vmem:[%s4499_s19 + $0xa] sm:$0xff]  ;;  %v692_v39 = vld [vmem:[%s4499_s19 + $0x12] sm:$0xff] }
  0x1c   : > { %v4671_v38 = vld [vmem:[%s4499_s19 + $0x48] sm:$0xff]  ;;  %v4682_v40 = vld [vmem:[%s4499_s19 + $0x50] sm:$0xff]  ;;  %v693_v41 = vld [vmem:[%s4499_s19 + $0x1a] sm:$0xff] }
  0x1d   : > { %v4693_v42 = vld [vmem:[%s4499_s19 + $0x58] sm:$0xff]  ;;  %v694_v43 = vld [vmem:[%s4499_s19 + $0x22] sm:$0xff]  ;;  %v695_v45 = vld [vmem:[%s4499_s19 + $0x2a] sm:$0xff] }
  0x1e   : > { %3785 = vmatmul.mubr.msk.f32.gmra.mrb[6].mxu0 %vm216_vm2, %v196_v10  ;;  %3827 = vmatmul.mubr.msk.f32.gmra.mrb[6].mxu1 %vm216_vm2, %v210_v11  ;;  %v4704_v44 = vld [vmem:[%s4499_s19 + $0x60] sm:$0xff]  ;;  %v4715_v46 = vld [vmem:[%s4499_s19 + $0x68] sm:$0xff]  ;;  %v696_v47 = vld [vmem:[%s4499_s19 + $0x32] sm:$0xff] }
  0x1f   : > { %3787 = vmatprep.mubr.msk.f32.mxu0 %vm4449_vm1, %v4448_v1  ;;  %3829 = vmatprep.mubr.msk.f32.mxu1 %vm4449_vm1, %v4448_v1  ;;  %v4726_v48 = vld [vmem:[%s4499_s19 + $0x70] sm:$0xff]  ;;  %v697_v49 = vld [vmem:[%s4499_s19 + $0x3a] sm:$0xff]  ;;  %v698_v51 = vld [vmem:[%s4499_s19 + $0x42] sm:$0xff] }
  0x20   : > { %v4737_v50 = vld [vmem:[%s4499_s19 + $0x78] sm:$0xff]  ;;  %v4748_v52 = vld [vmem:[%s4499_s19 + $0x80] sm:$0xff]  ;;  %v699_v53 = vld [vmem:[%s4499_s19 + $0x4a] sm:$0xff] }
  0x21   : > { %v4759_v54 = vld [vmem:[%s4499_s19 + $0x88] sm:$0xff]  ;;  %v700_v55 = vld [vmem:[%s4499_s19 + $0x52] sm:$0xff]  ;;  %v701_v57 = vld [vmem:[%s4499_s19 + $0x5a] sm:$0xff] }
  0x22   : > { %3788 = vmatmul.mubr.msk.f32.gmra.mrb[8].mxu0 %vm216_vm2, %v197_v12  ;;  %3830 = vmatmul.mubr.msk.f32.gmra.mrb[8].mxu1 %vm216_vm2, %v211_v13  ;;  %v4770_v56 = vld [vmem:[%s4499_s19 + $0x90] sm:$0xff]  ;;  %v4781_v58 = vld [vmem:[%s4499_s19 + $0x98] sm:$0xff]  ;;  %v702_v59 = vld [vmem:[%s4499_s19 + $0x62] sm:$0xff] }
  0x23   : > { %3790 = vmatprep.mubr.msk.f32.mxu0 %vm4449_vm1, %v4448_v1  ;;  %3832 = vmatprep.mubr.msk.f32.mxu1 %vm4449_vm1, %v4448_v1  ;;  %v4792_v60 = vld [vmem:[%s4499_s19 + $0xa0] sm:$0xff]  ;;  %v703_v61 = vld [vmem:[%s4499_s19 + $0x6a] sm:$0xff]  ;;  %v704_v62 = vld [vmem:[%s4499_s19 + $0x72] sm:$0xff] }
  0x24   : > { %v970_v63 = vld [vmem:[%s4499_s19 + $0xe] sm:$0xff]  ;;  %v705_v2 = vld [vmem:[%s4499_s19 + $0x7a] sm:$0xff]  ;;  %v706_v4 = vld [vmem:[%s4499_s19 + $0x82] sm:$0xff] }
  0x25   : > { %v971_v3 = vld [vmem:[%s4499_s19 + $0x16] sm:$0xff]  ;;  %v4825_v5 = vld [vmem:[%s4499_s19 + $0x1e] sm:$0xff]  ;;  %v707_v6 = vld [vmem:[%s4499_s19 + $0x8a] sm:$0xff] }
  0x26   : > { %3791 = vmatmul.mubr.msk.f32.gmra.mrb[10].mxu0 %vm216_vm2, %v198_v14  ;;  %3833 = vmatmul.mubr.msk.f32.gmra.mrb[10].mxu1 %vm216_vm2, %v212_v15  ;;  %v4836_v7 = vld [vmem:[%s4499_s19 + $0x26] sm:$0xff]  ;;  %v708_v8 = vld [vmem:[%s4499_s19 + $0x92] sm:$0xff]  ;;  %v709_v10 = vld [vmem:[%s4499_s19 + $0x9a] sm:$0xff] }
  0x27   : > { %3793 = vmatprep.mubr.msk.f32.mxu0 %vm4449_vm1, %v4448_v1  ;;  %3835 = vmatprep.mubr.msk.f32.mxu1 %vm4449_vm1, %v4448_v1  ;;  %v4847_v9 = vld [vmem:[%s4499_s19 + $0x2e] sm:$0xff]  ;;  %v4858_v11 = vld [vmem:[%s4499_s19 + $0x36] sm:$0xff]  ;;  %v710_v12 = vld [vmem:[%s4499_s19 + $0xa2] sm:$0xff] }
  0x28   : > { %v4869_v13 = vld [vmem:[%s4499_s19 + $0x3e] sm:$0xff]  ;;  %v4879_v14 = vld [vmem:[%s4499_s19 + $0x46] sm:$0xff]  ;;  %v1250_v15 = vld [vmem:[%s4499_s19 + $0xf] sm:$0xff] }
  0x2a   : > { %3794 = vmatmul.mubr.msk.f32.gmra.mrb[12].mxu0 %vm216_vm2, %v199_v16  ;;  %3836 = vmatmul.mubr.msk.f32.gmra.mrb[12].mxu1 %vm216_vm2, %v213_v17  ;;  %v3467_v16 = vld [vmem:[%s5903_s1 + $0x18] sm:$0x7]  ;;  %v4893_v17 = vld [vmem:[%s4499_s19 + $0x4e] sm:$0xff] }
  0x2b   : > { %3796 = vmatprep.mubr.msk.f32.mxu0 %vm4449_vm1, %v4448_v1  ;;  %3840 = vmatprep.mubr.msk.f32.mxu1 %vm4449_vm1, %v4448_v1 }
  0x2e   : > { %3797 = vmatmul.mubr.msk.f32.gmra.mrb[14].mxu0 %vm216_vm2, %v200_v18  ;;  %3841 = vmatmul.mubr.msk.f32.vlgmr.msra.gmra.mrb[14].mxu1 %vm216_vm2, %v171_v19  ;;  %v1251_v18 = vld [vmem:[%s4499_s19 + $0x17] sm:$0xff] }
  0x2f   : > { %3799 = vmatprep.mubr.msk.f32.mxu0 %vm4449_vm1, %v4448_v1  ;;  %3843 = vmatprep.mubr.msk.f32.mxu1 %vm4449_vm1, %v4448_v1  ;;  %v4906_v19 = vld [vmem:[%s4499_s19 + $0x56] sm:$0xff] }
  0x30   : > { %3969 = vmatpush3.msk.msra.mxu1 %vm280_vm0, %v3398_v20  ;;  %v1252_v20 = vld [vmem:[%s4499_s19 + $0x1f] sm:$0xff] }
  0x31   : > { %4098 = vmatprep.subr.mxu1 %v4448_v1 }
  0x32   : > { %3800 = vmatmul.mubr.msk.f32.gmra.mrb[16].mxu0 %vm216_vm2, %v201_v21  ;;  %3844 = vmatmul.mubr.msk.f32.gmra.mrb[16].mxu1 %vm216_vm2, %v172_v22  ;;  %v4917_v21 = vld [vmem:[%s4499_s19 + $0x5e] sm:$0xff]  ;;  %v1253_v22 = vld [vmem:[%s4499_s19 + $0x27] sm:$0xff] }
  0x33   : > { %3802 = vmatprep.mubr.msk.f32.mxu0 %vm4449_vm1, %v4448_v1  ;;  %3846 = vmatprep.mubr.msk.f32.mxu1 %vm4449_vm1, %v4448_v1 }
  0x36   : > { %3803 = vmatmul.mubr.msk.f32.gmra.mrb[18].mxu0 %vm216_vm2, %v202_v23  ;;  %3847 = vmatmul.mubr.msk.f32.gmra.mrb[18].mxu1 %vm216_vm2, %v4590_v24  ;;  %v4928_v23 = vld [vmem:[%s4499_s19 + $0x66] sm:$0xff] }
  0x37   : > { %3805 = vmatprep.mubr.msk.f32.mxu0 %vm4449_vm1, %v4448_v1  ;;  %3849 = vmatprep.mubr.msk.f32.mxu1 %vm4449_vm1, %v4448_v1 }
  0x3a   : > { %3806 = vmatmul.mubr.msk.f32.gmra.mrb[20].mxu0 %vm216_vm2, %v203_v25  ;;  %3850 = vmatmul.mubr.msk.f32.gmra.mrb[20].mxu1 %vm216_vm2, %v4601_v26  ;;  %v1254_v25 = vld [vmem:[%s4499_s19 + $0x2f] sm:$0xff] }
  0x3b   : > { %3808 = vmatprep.mubr.msk.f32.mxu0 %vm4449_vm1, %v4448_v1  ;;  %3852 = vmatprep.mubr.msk.f32.mxu1 %vm4449_vm1, %v4448_v1 }
  0x3e   : > { %3809 = vmatmul.mubr.msk.f32.gmra.mrb[22].mxu0 %vm216_vm2, %v204_v27  ;;  %3853 = vmatmul.mubr.msk.f32.gmra.mrb[22].mxu1 %vm216_vm2, %v4612_v28  ;;  %v4939_v27 = vld [vmem:[%s4499_s19 + $0x6e] sm:$0xff] }
  0x3f   : > { %3811 = vmatprep.mubr.msk.f32.mxu0 %vm4449_vm1, %v4448_v1  ;;  %3855 = vmatprep.mubr.msk.f32.mxu1 %vm4449_vm1, %v4448_v1 }
  0x42   : > { %3812 = vmatmul.mubr.msk.f32.gmra.mrb[24].mxu0 %vm216_vm2, %v205_v29  ;;  %3856 = vmatmul.mubr.msk.f32.gmra.mrb[24].mxu1 %vm216_vm2, %v4623_v30  ;;  %v1255_v29 = vld [vmem:[%s4499_s19 + $0x37] sm:$0xff] }
  0x43   : > { %3814 = vmatprep.mubr.msk.f32.mxu0 %vm4449_vm1, %v4448_v1  ;;  %3858 = vmatprep.mubr.msk.f32.mxu1 %vm4449_vm1, %v4448_v1 }
  0x46   : > { %3815 = vmatmul.mubr.msk.f32.gmra.mrb[26].mxu0 %vm216_vm2, %v206_v31  ;;  %3859 = vmatmul.mubr.msk.f32.gmra.mrb[26].mxu1 %vm216_vm2, %v4634_v32  ;;  %v4950_v31 = vld [vmem:[%s4499_s19 + $0x76] sm:$0xff] }
  0x47   : > { %3861 = vmatprep.mubr.msk.f32.mxu1 %vm4449_vm1, %v4448_v1  ;;  %3905 = vmatprep.mubr.msk.f32.mxu0 %vm4449_vm1, %v4448_v1 }
  0x4a   : > { %3862 = vmatmul.mubr.msk.f32.gmra.mrb[28].mxu1 %vm216_vm2, %v4644_v33  ;;  %3906 = vmatmul.mubr.msk.f32.vlgmr.msra.gmra.mrb[28].mxu0 %vm216_vm2, %v690_v34  ;;  %v1256_v34 = vld [vmem:[%s4499_s19 + $0x3f] sm:$0xff] }
  0x4b   : > { %3864 = vmatprep.mubr.msk.f32.mxu1 %vm4449_vm1, %v4448_v1  ;;  %3908 = vmatprep.mubr.msk.f32.mxu0 %vm4449_vm1, %v4448_v1 }
  0x4c   : > { %4034 = vmatpush3.msk.msra.mxu0 %vm280_vm0, %v3421_v35  ;;  %v4961_v35 = vld [vmem:[%s4499_s19 + $0x7e] sm:$0xff] }
  0x4d   : > { %4163 = vmatprep.subr.mxu0 %v4448_v1 }
  0x4e   : > { %3865 = vmatmul.mubr.msk.f32.gmra.mrb[30].mxu1 %vm216_vm2, %v4658_v36  ;;  %3909 = vmatmul.mubr.msk.f32.gmra.mrb[30].mxu0 %vm216_vm2, %v691_v37  ;;  %v1257_v37 = vld [vmem:[%s4499_s19 + $0x47] sm:$0xff] }
  0x4f   : > { %3867 = vmatprep.mubr.msk.f32.mxu1 %vm4449_vm1, %v4448_v1  ;;  %3911 = vmatprep.mubr.msk.f32.mxu0 %vm4449_vm1, %v4448_v1 }
  0x52   : > { %3868 = vmatmul.mubr.msk.f32.gmra.mrb[32].mxu1 %vm216_vm2, %v4671_v38  ;;  %3912 = vmatmul.mubr.msk.f32.gmra.mrb[32].mxu0 %vm216_vm2, %v692_v39  ;;  %v4972_v39 = vld [vmem:[%s4499_s19 + $0x86] sm:$0xff] }
  0x53   : > { %3870 = vmatprep.mubr.msk.f32.mxu1 %vm4449_vm1, %v4448_v1  ;;  %3914 = vmatprep.mubr.msk.f32.mxu0 %vm4449_vm1, %v4448_v1 }
  0x56   : > { %3871 = vmatmul.mubr.msk.f32.gmra.mrb[34].mxu1 %vm216_vm2, %v4682_v40  ;;  %3915 = vmatmul.mubr.msk.f32.gmra.mrb[34].mxu0 %vm216_vm2, %v693_v41  ;;  %v1258_v41 = vld [vmem:[%s4499_s19 + $0x4f] sm:$0xff] }
  0x57   : > { %3873 = vmatprep.mubr.msk.f32.mxu1 %vm4449_vm1, %v4448_v1  ;;  %3917 = vmatprep.mubr.msk.f32.mxu0 %vm4449_vm1, %v4448_v1 }
  0x5a   : > { %3874 = vmatmul.mubr.msk.f32.gmra.mrb[36].mxu1 %vm216_vm2, %v4693_v42  ;;  %3918 = vmatmul.mubr.msk.f32.gmra.mrb[36].mxu0 %vm216_vm2, %v694_v43  ;;  %v4983_v43 = vld [vmem:[%s4499_s19 + $0x8e] sm:$0xff] }
  0x5b   : > { %3876 = vmatprep.mubr.msk.f32.mxu1 %vm4449_vm1, %v4448_v1  ;;  %3920 = vmatprep.mubr.msk.f32.mxu0 %vm4449_vm1, %v4448_v1 }
  0x5e   : > { %3877 = vmatmul.mubr.msk.f32.gmra.mrb[38].mxu1 %vm216_vm2, %v4704_v44  ;;  %3921 = vmatmul.mubr.msk.f32.gmra.mrb[38].mxu0 %vm216_vm2, %v695_v45  ;;  %v1259_v45 = vld [vmem:[%s4499_s19 + $0x57] sm:$0xff] }
  0x5f   : > { %3879 = vmatprep.mubr.msk.f32.mxu1 %vm4449_vm1, %v4448_v1  ;;  %3923 = vmatprep.mubr.msk.f32.mxu0 %vm4449_vm1, %v4448_v1 }
  0x62   : > { %3880 = vmatmul.mubr.msk.f32.gmra.mrb[40].mxu1 %vm216_vm2, %v4715_v46  ;;  %3924 = vmatmul.mubr.msk.f32.gmra.mrb[40].mxu0 %vm216_vm2, %v696_v47  ;;  %v4994_v47 = vld [vmem:[%s4499_s19 + $0x96] sm:$0xff] }
  0x63   : > { %3882 = vmatprep.mubr.msk.f32.mxu1 %vm4449_vm1, %v4448_v1  ;;  %3926 = vmatprep.mubr.msk.f32.mxu0 %vm4449_vm1, %v4448_v1 }
  0x66   : > { %3883 = vmatmul.mubr.msk.f32.gmra.mrb[42].mxu1 %vm216_vm2, %v4726_v48  ;;  %3927 = vmatmul.mubr.msk.f32.gmra.mrb[42].mxu0 %vm216_vm2, %v697_v49  ;;  %v1260_v49 = vld [vmem:[%s4499_s19 + $0x5f] sm:$0xff] }
  0x67   : > { %3885 = vmatprep.mubr.msk.f32.mxu1 %vm4449_vm1, %v4448_v1  ;;  %3929 = vmatprep.mubr.msk.f32.mxu0 %vm4449_vm1, %v4448_v1 }
  0x6a   : > { %3886 = vmatmul.mubr.msk.f32.gmra.mrb[44].mxu1 %vm216_vm2, %v4737_v50  ;;  %3930 = vmatmul.mubr.msk.f32.gmra.mrb[44].mxu0 %vm216_vm2, %v698_v51  ;;  %v5005_v51 = vld [vmem:[%s4499_s19 + $0x9e] sm:$0xff] }
  0x6b   : > { %3888 = vmatprep.mubr.msk.f32.mxu1 %vm4449_vm1, %v4448_v1  ;;  %3932 = vmatprep.mubr.msk.f32.mxu0 %vm4449_vm1, %v4448_v1 }
  0x6e   : > { %3889 = vmatmul.mubr.msk.f32.gmra.mrb[46].mxu1 %vm216_vm2, %v4748_v52  ;;  %3933 = vmatmul.mubr.msk.f32.gmra.mrb[46].mxu0 %vm216_vm2, %v699_v53  ;;  %v1261_v53 = vld [vmem:[%s4499_s19 + $0x67] sm:$0xff] }
  0x6f   : > { %3891 = vmatprep.mubr.msk.f32.mxu1 %vm4449_vm1, %v4448_v1  ;;  %3935 = vmatprep.mubr.msk.f32.mxu0 %vm4449_vm1, %v4448_v1 }
  0x72   : > { %3892 = vmatmul.mubr.msk.f32.gmra.mrb[48].mxu1 %vm216_vm2, %v4759_v54  ;;  %3936 = vmatmul.mubr.msk.f32.gmra.mrb[48].mxu0 %vm216_vm2, %v700_v55  ;;  %v5016_v55 = vld [vmem:[%s4499_s19 + $0xa6] sm:$0xff] }
  0x73   : > { %3894 = vmatprep.mubr.msk.f32.mxu1 %vm4449_vm1, %v4448_v1  ;;  %3938 = vmatprep.mubr.msk.f32.mxu0 %vm4449_vm1, %v4448_v1 }
  0x76   : > { %3895 = vmatmul.mubr.msk.f32.gmra.mrb[50].mxu1 %vm216_vm2, %v4770_v56  ;;  %3939 = vmatmul.mubr.msk.f32.gmra.mrb[50].mxu0 %vm216_vm2, %v701_v57  ;;  %v1262_v57 = vld [vmem:[%s4499_s19 + $0x6f] sm:$0xff] }
  0x77   : > { %3897 = vmatprep.mubr.msk.f32.mxu1 %vm4449_vm1, %v4448_v1  ;;  %3941 = vmatprep.mubr.msk.f32.mxu0 %vm4449_vm1, %v4448_v1 }
  0x7a   : > { %3898 = vmatmul.mubr.msk.f32.gmra.mrb[52].mxu1 %vm216_vm2, %v4781_v58  ;;  %3942 = vmatmul.mubr.msk.f32.gmra.mrb[52].mxu0 %vm216_vm2, %v702_v59  ;;  %v5027_v59 = vld [vmem:[%s4499_s19 + $0xae] sm:$0xff] }
  0x7b   : > { %3900 = vmatprep.mubr.msk.f32.mxu1 %vm4449_vm1, %v4448_v1  ;;  %3944 = vmatprep.mubr.msk.f32.mxu0 %vm4449_vm1, %v4448_v1 }
  0x7e   : > { %3901 = vmatmul.mubr.msk.f32.gmra.mrb[54].mxu1 %vm216_vm2, %v4792_v60  ;;  %3945 = vmatmul.mubr.msk.f32.gmra.mrb[54].mxu0 %vm216_vm2, %v703_v61  ;;  %v1263_v61 = vld [vmem:[%s4499_s19 + $0x77] sm:$0xff] }
  0x7f   : > { %3947 = vmatprep.mubr.msk.f32.mxu0 %vm4449_vm1, %v4448_v1  ;;  %3970 = vmatprep.mubr.msk.f32.mxu1 %vm4449_vm1, %v4448_v1 }
  0x82   : > { %3948 = vmatmul.mubr.msk.f32.gmra.mrb[56].mxu0 %vm216_vm2, %v704_v62  ;;  %3971 = vmatmul.mubr.msk.f32.vlgmr.msra.gmra.mrb[56].mxu1 %vm216_vm2, %v970_v63  ;;  %v1264_v62 = vld [vmem:[%s4499_s19 + $0x7f] sm:$0xff]  ;;  %v3490_v63 = vld [vmem:[%s5903_s1 + $0x1c] sm:$0x7] }
  0x83   : > { %3950 = vmatprep.mubr.msk.f32.mxu0 %vm4449_vm1, %v4448_v1  ;;  %3973 = vmatprep.mubr.msk.f32.mxu1 %vm4449_vm1, %v4448_v1 }
  0x84   : > { %4099 = vmatpush3.msk.msra.mxu1 %vm280_vm0, %v3444_v0  ;;  %v1265_v0 = vld [vmem:[%s4499_s19 + $0x87] sm:$0xff] }
  0x85   : > { %4228 = vmatprep.subr.mxu1 %v4448_v1 }
  0x86   : > { %3951 = vmatmul.mubr.msk.f32.gmra.mrb[58].mxu0 %vm216_vm2, %v705_v2  ;;  %3974 = vmatmul.mubr.msk.f32.gmra.mrb[58].mxu1 %vm216_vm2, %v971_v3 }
  0x87   : > { %3953 = vmatprep.mubr.msk.f32.mxu0 %vm4449_vm1, %v4448_v1  ;;  %3976 = vmatprep.mubr.msk.f32.mxu1 %vm4449_vm1, %v4448_v1 }
  0x8a   : > { %3954 = vmatmul.mubr.msk.f32.gmra.mrb[60].mxu0 %vm216_vm2, %v706_v4  ;;  %3977 = vmatmul.mubr.msk.f32.gmra.mrb[60].mxu1 %vm216_vm2, %v4825_v5 }
  0x8b   : > { %3956 = vmatprep.mubr.msk.f32.mxu0 %vm4449_vm1, %v4448_v1  ;;  %3979 = vmatprep.mubr.msk.f32.mxu1 %vm4449_vm1, %v4448_v1 }
  0x8e   : > { %3957 = vmatmul.mubr.msk.f32.gmra.mrb[62].mxu0 %vm216_vm2, %v707_v6  ;;  %3980 = vmatmul.mubr.msk.f32.gmra.mrb[62].mxu1 %vm216_vm2, %v4836_v7 }
  0x8f   : > { %3959 = vmatprep.mubr.msk.f32.mxu0 %vm4449_vm1, %v4448_v1  ;;  %3982 = vmatprep.mubr.msk.f32.mxu1 %vm4449_vm1, %v4448_v1 }
  0x92   : > { %3960 = vmatmul.mubr.msk.f32.gmra.mrb[64].mxu0 %vm216_vm2, %v708_v8  ;;  %3983 = vmatmul.mubr.msk.f32.gmra.mrb[64].mxu1 %vm216_vm2, %v4847_v9 }
  0x93   : > { %3962 = vmatprep.mubr.msk.f32.mxu0 %vm4449_vm1, %v4448_v1  ;;  %3985 = vmatprep.mubr.msk.f32.mxu1 %vm4449_vm1, %v4448_v1 }
  0x96   : > { %3963 = vmatmul.mubr.msk.f32.gmra.mrb[66].mxu0 %vm216_vm2, %v709_v10  ;;  %3986 = vmatmul.mubr.msk.f32.gmra.mrb[66].mxu1 %vm216_vm2, %v4858_v11 }
  0x97   : > { %3965 = vmatprep.mubr.msk.f32.mxu0 %vm4449_vm1, %v4448_v1  ;;  %3988 = vmatprep.mubr.msk.f32.mxu1 %vm4449_vm1, %v4448_v1 }
  0x9a   : > { %3966 = vmatmul.mubr.msk.f32.gmra.mrb[68].mxu0 %vm216_vm2, %v710_v12  ;;  %3989 = vmatmul.mubr.msk.f32.gmra.mrb[68].mxu1 %vm216_vm2, %v4869_v13 }
  0x9b   : > { %3991 = vmatprep.mubr.msk.f32.mxu1 %vm4449_vm1, %v4448_v1  ;;  %4035 = vmatprep.mubr.msk.f32.mxu0 %vm4449_vm1, %v4448_v1 }
  0x9e   : > { %3992 = vmatmul.mubr.msk.f32.gmra.mrb[70].mxu1 %vm216_vm2, %v4879_v14  ;;  %4036 = vmatmul.mubr.msk.f32.vlgmr.msra.gmra.mrb[70].mxu0 %vm216_vm2, %v1250_v15  ;;  %v1270_v15 = vld [vmem:[%s4499_s19 + $0xaf] sm:$0xff] }
  0x9f   : > { %3994 = vmatprep.mubr.msk.f32.mxu1 %vm4449_vm1, %v4448_v1  ;;  %4038 = vmatprep.mubr.msk.f32.mxu0 %vm4449_vm1, %v4448_v1 }
  0xa0   : > { %4164 = vmatpush3.msk.msra.mxu0 %vm280_vm0, %v3467_v16 }
  0xa1   : > { %4293 = vmatprep.subr.mxu0 %v4448_v1 }
  0xa2   : > { %3995 = vmatmul.mubr.msk.f32.gmra.mrb[72].mxu1 %vm216_vm2, %v4893_v17  ;;  %4039 = vmatmul.mubr.msk.f32.gmra.mrb[72].mxu0 %vm216_vm2, %v1251_v18 }
  0xa3   : > { %3997 = vmatprep.mubr.msk.f32.mxu1 %vm4449_vm1, %v4448_v1  ;;  %4041 = vmatprep.mubr.msk.f32.mxu0 %vm4449_vm1, %v4448_v1 }
  0xa6   : > { %3998 = vmatmul.mubr.msk.f32.gmra.mrb[74].mxu1 %vm216_vm2, %v4906_v19  ;;  %4042 = vmatmul.mubr.msk.f32.gmra.mrb[74].mxu0 %vm216_vm2, %v1252_v20 }
  0xa7   : > { %4000 = vmatprep.mubr.msk.f32.mxu1 %vm4449_vm1, %v4448_v1  ;;  %4044 = vmatprep.mubr.msk.f32.mxu0 %vm4449_vm1, %v4448_v1 }
  0xaa   : > { %4001 = vmatmul.mubr.msk.f32.gmra.mrb[76].mxu1 %vm216_vm2, %v4917_v21  ;;  %4045 = vmatmul.mubr.msk.f32.gmra.mrb[76].mxu0 %vm216_vm2, %v1253_v22  ;;  %v1810_v22 = vld [vmem:[%s4499_s19 + $0x1c] sm:$0xff] }
  0xab   : > { %4003 = vmatprep.mubr.msk.f32.mxu1 %vm4449_vm1, %v4448_v1  ;;  %4047 = vmatprep.mubr.msk.f32.mxu0 %vm4449_vm1, %v4448_v1 }
  0xae   : > { %4004 = vmatmul.mubr.msk.f32.gmra.mrb[78].mxu1 %vm216_vm2, %v4928_v23  ;;  %4048 = vmatmul.mubr.msk.f32.gmra.mrb[78].mxu0 %vm216_vm2, %v1254_v25 }
  0xaf   : > { %4006 = vmatprep.mubr.msk.f32.mxu1 %vm4449_vm1, %v4448_v1  ;;  %4050 = vmatprep.mubr.msk.f32.mxu0 %vm4449_vm1, %v4448_v1 }
  0xb2   : > { %4007 = vmatmul.mubr.msk.f32.gmra.mrb[80].mxu1 %vm216_vm2, %v4939_v27  ;;  %4051 = vmatmul.mubr.msk.f32.gmra.mrb[80].mxu0 %vm216_vm2, %v1255_v29 }
  0xb3   : > { %4009 = vmatprep.mubr.msk.f32.mxu1 %vm4449_vm1, %v4448_v1  ;;  %4053 = vmatprep.mubr.msk.f32.mxu0 %vm4449_vm1, %v4448_v1 }
  0xb6   : > { %4010 = vmatmul.mubr.msk.f32.gmra.mrb[82].mxu1 %vm216_vm2, %v4950_v31  ;;  %4054 = vmatmul.mubr.msk.f32.gmra.mrb[82].mxu0 %vm216_vm2, %v1256_v34  ;;  %v3513_v34 = vld [vmem:[%s5903_s1 + $0x20] sm:$0x7] }
  0xb7   : > { %4012 = vmatprep.mubr.msk.f32.mxu1 %vm4449_vm1, %v4448_v1  ;;  %4056 = vmatprep.mubr.msk.f32.mxu0 %vm4449_vm1, %v4448_v1 }
  0xba   : > { %4013 = vmatmul.mubr.msk.f32.gmra.mrb[84].mxu1 %vm216_vm2, %v4961_v35  ;;  %4057 = vmatmul.mubr.msk.f32.gmra.mrb[84].mxu0 %vm216_vm2, %v1257_v37 }
  0xbb   : > { %4015 = vmatprep.mubr.msk.f32.mxu1 %vm4449_vm1, %v4448_v1  ;;  %4059 = vmatprep.mubr.msk.f32.mxu0 %vm4449_vm1, %v4448_v1 }
  0xbe   : > { %4016 = vmatmul.mubr.msk.f32.gmra.mrb[86].mxu1 %vm216_vm2, %v4972_v39  ;;  %4060 = vmatmul.mubr.msk.f32.gmra.mrb[86].mxu0 %vm216_vm2, %v1258_v41  ;;  %v1811_v41 = vld [vmem:[%s4499_s19 + $0x24] sm:$0xff] }
  0xbf   : > { %4018 = vmatprep.mubr.msk.f32.mxu1 %vm4449_vm1, %v4448_v1  ;;  %4062 = vmatprep.mubr.msk.f32.mxu0 %vm4449_vm1, %v4448_v1 }
  0xc2   : > { %4019 = vmatmul.mubr.msk.f32.gmra.mrb[88].mxu1 %vm216_vm2, %v4983_v43  ;;  %4063 = vmatmul.mubr.msk.f32.gmra.mrb[88].mxu0 %vm216_vm2, %v1259_v45 }
  0xc3   : > { %4021 = vmatprep.mubr.msk.f32.mxu1 %vm4449_vm1, %v4448_v1  ;;  %4065 = vmatprep.mubr.msk.f32.mxu0 %vm4449_vm1, %v4448_v1 }
  0xc6   : > { %4022 = vmatmul.mubr.msk.f32.gmra.mrb[90].mxu1 %vm216_vm2, %v4994_v47  ;;  %4066 = vmatmul.mubr.msk.f32.gmra.mrb[90].mxu0 %vm216_vm2, %v1260_v49 }
  0xc7   : > { %4024 = vmatprep.mubr.msk.f32.mxu1 %vm4449_vm1, %v4448_v1  ;;  %4068 = vmatprep.mubr.msk.f32.mxu0 %vm4449_vm1, %v4448_v1 }
  0xca   : > { %4025 = vmatmul.mubr.msk.f32.gmra.mrb[92].mxu1 %vm216_vm2, %v5005_v51  ;;  %4069 = vmatmul.mubr.msk.f32.gmra.mrb[92].mxu0 %vm216_vm2, %v1261_v53 }
  0xcb   : > { %4027 = vmatprep.mubr.msk.f32.mxu1 %vm4449_vm1, %v4448_v1  ;;  %4071 = vmatprep.mubr.msk.f32.mxu0 %vm4449_vm1, %v4448_v1 }
  0xce   : > { %4028 = vmatmul.mubr.msk.f32.gmra.mrb[94].mxu1 %vm216_vm2, %v5016_v55  ;;  %4072 = vmatmul.mubr.msk.f32.gmra.mrb[94].mxu0 %vm216_vm2, %v1262_v57  ;;  %v1812_v57 = vld [vmem:[%s4499_s19 + $0x2c] sm:$0xff] }
  0xcf   : > { %4030 = vmatprep.mubr.msk.f32.mxu1 %vm4449_vm1, %v4448_v1  ;;  %4074 = vmatprep.mubr.msk.f32.mxu0 %vm4449_vm1, %v4448_v1 }
  0xd2   : > { %4031 = vmatmul.mubr.msk.f32.gmra.mrb[96].mxu1 %vm216_vm2, %v5027_v59  ;;  %4075 = vmatmul.mubr.msk.f32.gmra.mrb[96].mxu0 %vm216_vm2, %v1263_v61 }
  0xd3   : > { %4077 = vmatprep.mubr.msk.f32.mxu0 %vm4449_vm1, %v4448_v1  ;;  %4100 = vmatprep.mubr.msk.f32.mxu1 %vm4449_vm1, %v4448_v1 }
  0xd6   : > { %4078 = vmatmul.mubr.msk.f32.gmra.mrb[98].mxu0 %vm216_vm2, %v1264_v62  ;;  %4101 = vmatmul.mubr.msk.f32.vlgmr.msra.gmra.mrb[98].mxu1 %vm216_vm2, %v4590_v24  ;;  %v1266_v24 = vld [vmem:[%s4499_s19 + $0x8f] sm:$0xff] }
  0xd7   : > { %4080 = vmatprep.mubr.msk.f32.mxu0 %vm4449_vm1, %v4448_v1  ;;  %4103 = vmatprep.mubr.msk.f32.mxu1 %vm4449_vm1, %v4448_v1 }
  0xd8   : > { %4229 = vmatpush3.msk.msra.mxu1 %vm280_vm0, %v3490_v63 }
  0xda   : > { %4081 = vmatmul.mubr.msk.f32.gmra.mrb[100].mxu0 %vm216_vm2, %v1265_v0  ;;  %4104 = vmatmul.mubr.msk.f32.gmra.mrb[100].mxu1 %vm216_vm2, %v4601_v26  ;;  %v1267_v26 = vld [vmem:[%s4499_s19 + $0x97] sm:$0xff] }
  0xdb   : > { %4083 = vmatprep.mubr.msk.f32.mxu0 %vm4449_vm1, %v4448_v1  ;;  %4106 = vmatprep.mubr.msk.f32.mxu1 %vm4449_vm1, %v4448_v1  ;;  %v1813_v0 = vld [vmem:[%s4499_s19 + $0x34] sm:$0xff] }
  0xde   : > { %4084 = vmatmul.mubr.msk.f32.gmra.mrb[102].mxu0 %vm216_vm2, %v1266_v24  ;;  %4107 = vmatmul.mubr.msk.f32.gmra.mrb[102].mxu1 %vm216_vm2, %v4612_v28  ;;  %v1268_v28 = vld [vmem:[%s4499_s19 + $0x9f] sm:$0xff] }
  0xdf   : > { %4086 = vmatprep.mubr.msk.f32.mxu0 %vm4449_vm1, %v4448_v1  ;;  %4109 = vmatprep.mubr.msk.f32.mxu1 %vm4449_vm1, %v4448_v1 }
  0xe2   : > { %4087 = vmatmul.mubr.msk.f32.gmra.mrb[104].mxu0 %vm216_vm2, %v1267_v26  ;;  %4110 = vmatmul.mubr.msk.f32.gmra.mrb[104].mxu1 %vm216_vm2, %v4623_v30  ;;  %v1269_v30 = vld [vmem:[%s4499_s19 + $0xa7] sm:$0xff] }
  0xe3   : > { %4089 = vmatprep.mubr.msk.f32.mxu0 %vm4449_vm1, %v4448_v1  ;;  %4112 = vmatprep.mubr.msk.f32.mxu1 %vm4449_vm1, %v4448_v1 }
  0xe5   : > { %v5074_v2 = vpop.f32.mrb[0].mxu0  ;;  %v5076_v3 = vpop.f32.mrb[0].mxu1 }
  0xe6   : > { %v3777_v4 = vpop.f32.mrb[1].mxu0  ;;  %4090 = vmatmul.mubr.msk.f32.gmra.mrb[106].mxu0 %vm216_vm2, %v1268_v28  ;;  %4113 = vmatmul.mubr.msk.f32.gmra.mrb[106].mxu1 %vm216_vm2, %v4634_v32  ;;  %v3819_v6 = vpop.f32.mrb[1].mxu1 }
  0xe7   : > { %4092 = vmatprep.mubr.msk.f32.mxu0 %vm4449_vm1, %v4448_v1  ;;  %4115 = vmatprep.mubr.msk.f32.mxu1 %vm4449_vm1, %v4448_v1  ;;  %v1814_v4 = vld [vmem:[%s4499_s19 + $0x3c] sm:$0xff] }
  0xe9   : > { %v5086_v8 = vpop.f32.mrb[2].mxu0  ;;  %v5088_v10 = vpop.f32.mrb[2].mxu1 }
  0xea   : > { %v3780_v12 = vpop.f32.mrb[3].mxu0  ;;  %4093 = vmatmul.mubr.msk.f32.gmra.mrb[108].mxu0 %vm216_vm2, %v1269_v30  ;;  %4116 = vmatmul.mubr.msk.f32.gmra.mrb[108].mxu1 %vm216_vm2, %v4644_v33  ;;  %v3822_v32 = vpop.f32.mrb[3].mxu1 }
  0xeb   : > { %4095 = vmatprep.mubr.msk.f32.mxu0 %vm4449_vm1, %v4448_v1  ;;  %4118 = vmatprep.mubr.msk.f32.mxu1 %vm4449_vm1, %v4448_v1 }
  0xed   : > { %v5098_v16 = vpop.f32.mrb[4].mxu0  ;;  %v5100_v18 = vpop.f32.mrb[4].mxu1 }
  0xee   : > { %v3783_v20 = vpop.f32.mrb[5].mxu0  ;;  %4096 = vmatmul.mubr.msk.f32.gmra.mrb[110].mxu0 %vm216_vm2, %v1270_v15  ;;  %4119 = vmatmul.mubr.msk.f32.gmra.mrb[110].mxu1 %vm216_vm2, %v4658_v36  ;;  %v3825_v33 = vpop.f32.mrb[5].mxu1  ;;  %v1815_v15 = vld [vmem:[%s4499_s19 + $0x44] sm:$0xff] }
  0xef   : > { %4121 = vmatprep.mubr.msk.f32.mxu1 %vm4449_vm1, %v4448_v1  ;;  %4165 = vmatprep.mubr.msk.f32.mxu0 %vm4449_vm1, %v4448_v1 }
  0xf1   : > { %v5110_v25 = vpop.f32.mrb[6].mxu0  ;;  %v5112_v29 = vpop.f32.mrb[6].mxu1 }
  0xf2   : > { %v3786_v37 = vpop.f32.mrb[7].mxu0  ;;  %4122 = vmatmul.mubr.msk.f32.gmra.mrb[112].mxu1 %vm216_vm2, %v4671_v38  ;;  %4166 = vmatmul.mubr.msk.f32.vlgmr.msra.gmra.mrb[112].mxu0 %vm216_vm2, %v1810_v22  ;;  %v3828_v36 = vpop.f32.mrb[7].mxu1 }
  0xf3   : > { %4124 = vmatprep.mubr.msk.f32.mxu1 %vm4449_vm1, %v4448_v1  ;;  %4168 = vmatprep.mubr.msk.f32.mxu0 %vm4449_vm1, %v4448_v1 }
  0xf4   : > { %4294 = vmatpush3.msk.msra.mxu0 %vm280_vm0, %v3513_v34  ;;  %v1816_v34 = vld [vmem:[%s4499_s19 + $0x4c] sm:$0xff] }
  0xf5   : > { %v5126_v45 = vpop.f32.mrb[8].mxu0  ;;  %v5128_v49 = vpop.f32.mrb[8].mxu1 }
  0xf6   : > { %v3789_v53 = vpop.f32.mrb[9].mxu0  ;;  %4125 = vmatmul.mubr.msk.f32.gmra.mrb[114].mxu1 %vm216_vm2, %v4682_v40  ;;  %4169 = vmatmul.mubr.msk.f32.gmra.mrb[114].mxu0 %vm216_vm2, %v1811_v41  ;;  %v3831_v38 = vpop.f32.mrb[9].mxu1 }
  0xf7   : > { %4127 = vmatprep.mubr.msk.f32.mxu1 %vm4449_vm1, %v4448_v1  ;;  %4171 = vmatprep.mubr.msk.f32.mxu0 %vm4449_vm1, %v4448_v1  ;;  %v1817_v53 = vld [vmem:[%s4499_s19 + $0x54] sm:$0xff] }
  0xf9   : > { %v5138_v61 = vpop.f32.mrb[10].mxu0  ;;  %v5140_v62 = vpop.f32.mrb[10].mxu1 }
  0xfa   : > { %v3792_v63 = vpop.f32.mrb[11].mxu0  ;;  %4128 = vmatmul.mubr.msk.f32.gmra.mrb[116].mxu1 %vm216_vm2, %v4693_v42  ;;  %4172 = vmatmul.mubr.msk.f32.gmra.mrb[116].mxu0 %vm216_vm2, %v1812_v57  ;;  %v3834_v40 = vpop.f32.mrb[11].mxu1 }
  0xfb   : > { %4130 = vmatprep.mubr.msk.f32.mxu1 %vm4449_vm1, %v4448_v1  ;;  %4174 = vmatprep.mubr.msk.f32.mxu0 %vm4449_vm1, %v4448_v1  ;;  %v1818_v40 = vld [vmem:[%s4499_s19 + $0x5c] sm:$0xff] }
  0xfd   : > { %v5150_v24 = vpop.f32.mrb[12].mxu0  ;;  %v5152_v26 = vpop.f32.mrb[12].mxu1 }
  0xfe   : > { %v3795_v28 = vpop.f32.mrb[13].mxu0  ;;  %4131 = vmatmul.mubr.msk.f32.gmra.mrb[118].mxu1 %vm216_vm2, %v4704_v44  ;;  %4175 = vmatmul.mubr.msk.f32.gmra.mrb[118].mxu0 %vm216_vm2, %v1813_v0  ;;  %v3837_v42 = vpop.f32.mrb[13].mxu1 }
  0xff   : > { %4133 = vmatprep.mubr.msk.f32.mxu1 %vm4449_vm1, %v4448_v1  ;;  %4177 = vmatprep.mubr.msk.f32.mxu0 %vm4449_vm1, %v4448_v1 }
 0x101   : > { %v5162_v6 = vpop.f32.mrb[14].mxu0  ;;  %v586_v30 = vpop.f32.mrb[14].mxu1 }
 0x102   : > { %v5165_v12 = vadd.f32 %v586_v30, %v5074_v2  ;;  %v3798_v32 = vpop.f32.mrb[15].mxu0  ;;  %4134 = vmatmul.mubr.msk.f32.gmra.mrb[120].mxu1 %vm216_vm2, %v4715_v46  ;;  %4178 = vmatmul.mubr.msk.f32.gmra.mrb[120].mxu0 %vm216_vm2, %v1814_v4  ;;  %v3842_v44 = vpop.f32.mrb[15].mxu1  ;;  %v1819_v4 = vld [vmem:[%s4499_s19 + $0x64] sm:$0xff] }
 0x103   : > { %4136 = vmatprep.mubr.msk.f32.mxu1 %vm4449_vm1, %v4448_v1  ;;  %4180 = vmatprep.mubr.msk.f32.mxu0 %vm4449_vm1, %v4448_v1 }
 0x105   : > { %v5175_v20 = vpop.f32.mrb[16].mxu0  ;;  %v591_v33 = vpop.f32.mrb[16].mxu1 }
 0x106   : > { %v5178_v2 = vadd.f32 %v591_v33, %v5086_v8  ;;  %v3801_v22 = vpop.f32.mrb[17].mxu0  ;;  %4137 = vmatmul.mubr.msk.f32.gmra.mrb[122].mxu1 %vm216_vm2, %v4726_v48  ;;  %4181 = vmatmul.mubr.msk.f32.gmra.mrb[122].mxu0 %vm216_vm2, %v1815_v15  ;;  %v3845_v46 = vpop.f32.mrb[17].mxu1  ;;  %v1820_v15 = vld [vmem:[%s4499_s19 + $0x6c] sm:$0xff] }
 0x107   : > { %4139 = vmatprep.mubr.msk.f32.mxu1 %vm4449_vm1, %v4448_v1  ;;  %4183 = vmatprep.mubr.msk.f32.mxu0 %vm4449_vm1, %v4448_v1 }
 0x109   : > { %v5188_v37 = vpop.f32.mrb[18].mxu0  ;;  %v596_v36 = vpop.f32.mrb[18].mxu1 }
 0x10a   : > { %v5191_v8 = vadd.f32 %v596_v36, %v5098_v16  ;;  %v3804_v41 = vpop.f32.mrb[19].mxu0  ;;  %4140 = vmatmul.mubr.msk.f32.gmra.mrb[124].mxu1 %vm216_vm2, %v4737_v50  ;;  %4184 = vmatmul.mubr.msk.f32.gmra.mrb[124].mxu0 %vm216_vm2, %v1816_v34  ;;  %v3848_v48 = vpop.f32.mrb[19].mxu1  ;;  %v1821_v34 = vld [vmem:[%s4499_s19 + $0x74] sm:$0xff] }
 0x10b   : > { %4142 = vmatprep.mubr.msk.f32.mxu1 %vm4449_vm1, %v4448_v1  ;;  %4186 = vmatprep.mubr.msk.f32.mxu0 %vm4449_vm1, %v4448_v1 }
 0x10d   : > { %v5201_v38 = vpop.f32.mrb[20].mxu0  ;;  %v601_v57 = vpop.f32.mrb[20].mxu1 }
 0x10e   : > { %v5204_v16 = vadd.f32 %v601_v57, %v5110_v25  ;;  %v3807_v63 = vpop.f32.mrb[21].mxu0  ;;  %4143 = vmatmul.mubr.msk.f32.gmra.mrb[126].mxu1 %vm216_vm2, %v4748_v52  ;;  %4187 = vmatmul.mubr.msk.f32.gmra.mrb[126].mxu0 %vm216_vm2, %v1817_v53  ;;  %v3851_v50 = vpop.f32.mrb[21].mxu1  ;;  %v1822_v57 = vld [vmem:[%s4499_s19 + $0x7c] sm:$0xff] }
 0x10f   : > { %4145 = vmatprep.mubr.msk.f32.mxu1 %vm4449_vm1, %v4448_v1  ;;  %4189 = vmatprep.mubr.msk.f32.mxu0 %vm4449_vm1, %v4448_v1 }
 0x111   : > { %v5214_v0 = vpop.f32.mrb[22].mxu0  ;;  %v606_v28 = vpop.f32.mrb[22].mxu1 }
 0x112   : > { %v5217_v25 = vadd.f32 %v606_v28, %v5126_v45  ;;  %v3810_v42 = vpop.f32.mrb[23].mxu0  ;;  %4146 = vmatmul.mubr.msk.f32.gmra.mrb[128].mxu1 %vm216_vm2, %v4759_v54  ;;  %4190 = vmatmul.mubr.msk.f32.gmra.mrb[128].mxu0 %vm216_vm2, %v1818_v40  ;;  %v3854_v52 = vpop.f32.mrb[23].mxu1 }
 0x113   : > { %4148 = vmatprep.mubr.msk.f32.mxu1 %vm4449_vm1, %v4448_v1  ;;  %4192 = vmatprep.mubr.msk.f32.mxu0 %vm4449_vm1, %v4448_v1  ;;  %v1550_v42 = vld [vmem:[%s4499_s19 + $0xb0] sm:$0xff] }
 0x115   : > { %v5227_v30 = vpop.f32.mrb[24].mxu0  ;;  %v611_v32 = vpop.f32.mrb[24].mxu1 }
 0x116   : > { %v5230_v45 = vadd.f32 %v611_v32, %v5138_v61  ;;  %v3813_v44 = vpop.f32.mrb[25].mxu0  ;;  %4149 = vmatmul.mubr.msk.f32.gmra.mrb[130].mxu1 %vm216_vm2, %v4770_v56  ;;  %4193 = vmatmul.mubr.msk.f32.gmra.mrb[130].mxu0 %vm216_vm2, %v1819_v4  ;;  %v3857_v54 = vpop.f32.mrb[25].mxu1 }
 0x117   : > { %4151 = vmatprep.mubr.msk.f32.mxu1 %vm4449_vm1, %v4448_v1  ;;  %4195 = vmatprep.mubr.msk.f32.mxu0 %vm4449_vm1, %v4448_v1 }
 0x119   : > { %v5240_v33 = vpop.f32.mrb[26].mxu0  ;;  %v616_v22 = vpop.f32.mrb[26].mxu1 }
 0x11a   : > { %v5243_v61 = vadd.f32 %v616_v22, %v5150_v24  ;;  %v3816_v46 = vpop.f32.mrb[27].mxu0  ;;  %4152 = vmatmul.mubr.msk.f32.gmra.mrb[132].mxu1 %vm216_vm2, %v4781_v58  ;;  %4196 = vmatmul.mubr.msk.f32.gmra.mrb[132].mxu0 %vm216_vm2, %v1820_v15  ;;  %v3860_v56 = vpop.f32.mrb[27].mxu1  ;;  %v1824_v15 = vld [vmem:[%s4499_s19 + $0x8c] sm:$0xff] }
 0x11b   : > { %4154 = vmatprep.mubr.msk.f32.mxu1 %vm4449_vm1, %v4448_v1  ;;  %4198 = vmatprep.mubr.msk.f32.mxu0 %vm4449_vm1, %v4448_v1 }
 0x11d   : > { %v621_v36 = vpop.f32.mrb[28].mxu1  ;;  %v845_v41 = vpop.f32.mrb[28].mxu0 }
 0x11e   : > { %v5254_v24 = vadd.f32 %v621_v36, %v5162_v6  ;;  %v5257_v48 = vadd.f32 %v845_v41, %v5165_v12  ;;  %v3907_v58 = vpop.f32.mrb[29].mxu0  ;;  %4155 = vmatmul.mubr.msk.f32.gmra.mrb[134].mxu1 %vm216_vm2, %v4792_v60  ;;  %4199 = vmatmul.mubr.msk.f32.gmra.mrb[134].mxu0 %vm216_vm2, %v1821_v34  ;;  %v3863_v53 = vpop.f32.mrb[29].mxu1  ;;  %v1549_v6 = vld [vmem:[%s4499_s19 + $0xa8] sm:$0xff]  ;;  %v1825_v41 = vld [vmem:[%s4499_s19 + $0x94] sm:$0xff] }
 0x11f   : > { %4157 = vmatprep.mubr.msk.f32.mxu1 %vm4449_vm1, %v4448_v1  ;;  %4201 = vmatprep.mubr.msk.f32.mxu0 %vm4449_vm1, %v4448_v1 }
 0x121   : > { %v626_v63 = vpop.f32.mrb[30].mxu1  ;;  %v850_v12 = vpop.f32.mrb[30].mxu0 }
 0x122   : > { %v5269_v50 = vadd.f32 %v626_v63, %v5175_v20  ;;  %v5272_v60 = vadd.f32 %v850_v12, %v5178_v2  ;;  %v3910_v40 = vpop.f32.mrb[31].mxu0  ;;  %4158 = vmatmul.mubr.msk.f32.gmra.mrb[136].mxu1 %vm216_vm2, %v1549_v6  ;;  %4202 = vmatmul.mubr.msk.f32.gmra.mrb[136].mxu0 %vm216_vm2, %v1822_v57  ;;  %v3866_v28 = vpop.f32.mrb[31].mxu1  ;;  %v1823_v20 = vld [vmem:[%s4499_s19 + $0x84] sm:$0xff]  ;;  %v1826_v12 = vld [vmem:[%s4499_s19 + $0x9c] sm:$0xff] }
 0x123   : > { %4160 = vmatprep.mubr.msk.f32.mxu1 %vm4449_vm1, %v4448_v1  ;;  %4204 = vmatprep.mubr.msk.f32.mxu0 %vm4449_vm1, %v4448_v1 }
 0x125   : > { %v631_v52 = vpop.f32.mrb[32].mxu1  ;;  %v855_v4 = vpop.f32.mrb[32].mxu0 }
 0x126   : > { %v5283_v2 = vadd.f32 %v631_v52, %v5188_v37  ;;  %v5286_v32 = vadd.f32 %v855_v4, %v5191_v8  ;;  %v3913_v44 = vpop.f32.mrb[33].mxu0  ;;  %4161 = vmatmul.mubr.msk.f32.gmra.mrb[138].mxu1 %vm216_vm2, %v1550_v42  ;;  %4205 = vmatmul.mubr.msk.f32.gmra.mrb[138].mxu0 %vm216_vm2, %v1823_v20  ;;  %v3869_v54 = vpop.f32.mrb[33].mxu1  ;;  %v2090_v37 = vld [vmem:[%s4499_s19 + $0x1d] sm:$0xff] }
 0x127   : > { %4207 = vmatprep.mubr.msk.f32.mxu0 %vm4449_vm1, %v4448_v1  ;;  %4230 = vmatprep.mubr.msk.f32.mxu1 %vm4449_vm1, %v4448_v1  ;;  %v1827_v4 = vld [vmem:[%s4499_s19 + $0xa4] sm:$0xff] }
 0x129   : > { %v636_v22 = vpop.f32.mrb[34].mxu1  ;;  %v860_v46 = vpop.f32.mrb[34].mxu0 }
 0x12a   : > { %v5297_v8 = vadd.f32 %v636_v22, %v5201_v38  ;;  %v5300_v56 = vadd.f32 %v860_v46, %v5204_v16  ;;  %v3916_v34 = vpop.f32.mrb[35].mxu0  ;;  %4208 = vmatmul.mubr.msk.f32.gmra.mrb[140].mxu0 %vm216_vm2, %v1824_v15  ;;  %4231 = vmatmul.mubr.msk.f32.vlgmr.msra.gmra.mrb[140].mxu1 %vm216_vm2, %v2090_v37  ;;  %v3872_v36 = vpop.f32.mrb[35].mxu1  ;;  %v2091_v38 = vld [vmem:[%s4499_s19 + $0x25] sm:$0xff] }
 0x12b   : > { %4210 = vmatprep.mubr.msk.f32.mxu0 %vm4449_vm1, %v4448_v1  ;;  %4233 = vmatprep.mubr.msk.f32.mxu1 %vm4449_vm1, %v4448_v1  ;;  %v1828_v46 = vld [vmem:[%s4499_s19 + $0xac] sm:$0xff] }
 0x12d   : > { %v641_v58 = vpop.f32.mrb[36].mxu1  ;;  %v865_v53 = vpop.f32.mrb[36].mxu0 }
 0x12e   : > { %v5311_v16 = vadd.f32 %v641_v58, %v5214_v0  ;;  %v5314_v6 = vadd.f32 %v865_v53, %v5217_v25  ;;  %v3919_v57 = vpop.f32.mrb[37].mxu0  ;;  %4211 = vmatmul.mubr.msk.f32.gmra.mrb[142].mxu0 %vm216_vm2, %v1825_v41  ;;  %4234 = vmatmul.mubr.msk.f32.gmra.mrb[142].mxu1 %vm216_vm2, %v2091_v38  ;;  %v3875_v63 = vpop.f32.mrb[37].mxu1  ;;  %v2092_v0 = vld [vmem:[%s4499_s19 + $0x2d] sm:$0xff] }
 0x12f   : > { %4213 = vmatprep.mubr.msk.f32.mxu0 %vm4449_vm1, %v4448_v1  ;;  %4236 = vmatprep.mubr.msk.f32.mxu1 %vm4449_vm1, %v4448_v1  ;;  %v1829_v53 = vld [vmem:[%s4499_s19 + $0xb4] sm:$0xff] }
 0x131   : > { %v646_v40 = vpop.f32.mrb[38].mxu1  ;;  %v870_v28 = vpop.f32.mrb[38].mxu0 }
 0x132   : > { %v5325_v25 = vadd.f32 %v646_v40, %v5227_v30  ;;  %v5328_v42 = vadd.f32 %v870_v28, %v5230_v45  ;;  %v3922_v20 = vpop.f32.mrb[39].mxu0  ;;  %4214 = vmatmul.mubr.msk.f32.gmra.mrb[144].mxu0 %vm216_vm2, %v1826_v12  ;;  %4237 = vmatmul.mubr.msk.f32.gmra.mrb[144].mxu1 %vm216_vm2, %v2092_v0  ;;  %v3878_v52 = vpop.f32.mrb[39].mxu1  ;;  %v2093_v30 = vld [vmem:[%s4499_s19 + $0x35] sm:$0xff] }
 0x133   : > { %4216 = vmatprep.mubr.msk.f32.mxu0 %vm4449_vm1, %v4448_v1  ;;  %4239 = vmatprep.mubr.msk.f32.mxu1 %vm4449_vm1, %v4448_v1  ;;  %v1830_v28 = vld [vmem:[%s4499_s19 + $0xbc] sm:$0xff]  ;;  %v2096_v20 = vld [vmem:[%s4499_s19 + $0x4d] sm:$0xff] }
 0x135   : > { %v651_v44 = vpop.f32.mrb[40].mxu1  ;;  %v875_v54 = vpop.f32.mrb[40].mxu0 }
 0x136   : > { %v5339_v45 = vadd.f32 %v651_v44, %v5240_v33  ;;  %v5342_v15 = vadd.f32 %v875_v54, %v5243_v61  ;;  %v3925_v37 = vpop.f32.mrb[41].mxu0  ;;  %4217 = vmatmul.mubr.msk.f32.gmra.mrb[146].mxu0 %vm216_vm2, %v1827_v4  ;;  %4240 = vmatmul.mubr.msk.f32.gmra.mrb[146].mxu1 %vm216_vm2, %v2093_v30  ;;  %v3881_v22 = vpop.f32.mrb[41].mxu1  ;;  %v2094_v33 = vld [vmem:[%s4499_s19 + $0x3d] sm:$0xff]  ;;  %v2097_v54 = vld [vmem:[%s4499_s19 + $0x55] sm:$0xff] }
 0x137   : > { %4219 = vmatprep.mubr.msk.f32.mxu0 %vm4449_vm1, %v4448_v1  ;;  %4242 = vmatprep.mubr.msk.f32.mxu1 %vm4449_vm1, %v4448_v1 }
 0x139   : > { %v656_v34 = vpop.f32.mrb[42].mxu1  ;;  %v880_v36 = vpop.f32.mrb[42].mxu0 }
 0x13a   : > { %v5353_v61 = vadd.f32 %v656_v34, %v5076_v3  ;;  %v5356_v41 = vadd.f32 %v880_v36, %v5254_v24  ;;  %v3928_v38 = vpop.f32.mrb[43].mxu0  ;;  %4220 = vmatmul.mubr.msk.f32.gmra.mrb[148].mxu0 %vm216_vm2, %v1828_v46  ;;  %4243 = vmatmul.mubr.msk.f32.gmra.mrb[148].mxu1 %vm216_vm2, %v2094_v33  ;;  %v3884_v58 = vpop.f32.mrb[43].mxu1  ;;  %v2095_v3 = vld [vmem:[%s4499_s19 + $0x45] sm:$0xff]  ;;  %v2098_v34 = vld [vmem:[%s4499_s19 + $0x5d] sm:$0xff] }
 0x13b   : > { %4222 = vmatprep.mubr.msk.f32.mxu0 %vm4449_vm1, %v4448_v1  ;;  %4245 = vmatprep.mubr.msk.f32.mxu1 %vm4449_vm1, %v4448_v1 }
 0x13d   : > { %v661_v57 = vpop.f32.mrb[44].mxu1  ;;  %v885_v63 = vpop.f32.mrb[44].mxu0 }
 0x13e   : > { %v5367_v24 = vadd.f32 %v661_v57, %v5088_v10  ;;  %v5370_v12 = vadd.f32 %v885_v63, %v5269_v50  ;;  %v3931_v0 = vpop.f32.mrb[45].mxu0  ;;  %4223 = vmatmul.mubr.msk.f32.gmra.mrb[150].mxu0 %vm216_vm2, %v1829_v53  ;;  %4246 = vmatmul.mubr.msk.f32.gmra.mrb[150].mxu1 %vm216_vm2, %v2095_v3  ;;  %v3887_v40 = vpop.f32.mrb[45].mxu1  ;;  %v2099_v53 = vld [vmem:[%s4499_s19 + $0x65] sm:$0xff] }
 0x13f   : > { %4225 = vmatprep.mubr.msk.f32.mxu0 %vm4449_vm1, %v4448_v1  ;;  %4248 = vmatprep.mubr.msk.f32.mxu1 %vm4449_vm1, %v4448_v1  ;;  %v2100_v0 = vld [vmem:[%s4499_s19 + $0x6d] sm:$0xff] }
 0x141   : > { %v666_v10 = vpop.f32.mrb[46].mxu1  ;;  %v890_v52 = vpop.f32.mrb[46].mxu0 }
 0x142   : > { %v5381_v50 = vadd.f32 %v666_v10, %v5100_v18  ;;  %v5384_v4 = vadd.f32 %v890_v52, %v5283_v2  ;;  %v3934_v30 = vpop.f32.mrb[47].mxu0  ;;  %4226 = vmatmul.mubr.msk.f32.gmra.mrb[152].mxu0 %vm216_vm2, %v1830_v28  ;;  %4249 = vmatmul.mubr.msk.f32.gmra.mrb[152].mxu1 %vm216_vm2, %v2096_v20  ;;  %v3890_v44 = vpop.f32.mrb[47].mxu1  ;;  %v2101_v10 = vld [vmem:[%s4499_s19 + $0x75] sm:$0xff] }
 0x143   : > { %4251 = vmatprep.mubr.msk.f32.mxu1 %vm4449_vm1, %v4448_v1  ;;  %4295 = vmatprep.mubr.msk.f32.mxu0 %vm4449_vm1, %v4448_v1 }
 0x145   : > { %v671_v37 = vpop.f32.mrb[48].mxu1  ;;  %v895_v18 = vpop.f32.mrb[48].mxu0 }
 0x146   : > { %v5394_v22 = vadd.f32 %v671_v37, %v5112_v29  ;;  %v5397_v2 = vadd.f32 %v895_v18, %v5297_v8  ;;  %v3937_v46 = vpop.f32.mrb[49].mxu0  ;;  %4252 = vmatmul.mubr.msk.f32.gmra.mrb[154].mxu1 %vm216_vm2, %v2097_v54  ;;  %4296 = vmatmul.mubr.msk.f32.vlgmr.msra.gmra.mrb[154].mxu0 %vm216_vm2, %v4825_v5  ;;  %v3893_v33 = vpop.f32.mrb[49].mxu1  ;;  %v2102_v54 = vld [vmem:[%s4499_s19 + $0x7d] sm:$0xff] }
 0x147   : > { %4254 = vmatprep.mubr.msk.f32.mxu1 %vm4449_vm1, %v4448_v1  ;;  %4298 = vmatprep.mubr.msk.f32.mxu0 %vm4449_vm1, %v4448_v1  ;;  %v2103_v33 = vld [vmem:[%s4499_s19 + $0x85] sm:$0xff] }
 0x149   : > { %v676_v29 = vpop.f32.mrb[50].mxu1  ;;  %v900_v36 = vpop.f32.mrb[50].mxu0 }
 0x14a   : > { %v5408_v8 = vadd.f32 %v676_v29, %v5128_v49  ;;  %v5411_v38 = vadd.f32 %v900_v36, %v5311_v16  ;;  %v3940_v58 = vpop.f32.mrb[51].mxu0  ;;  %4255 = vmatmul.mubr.msk.f32.gmra.mrb[156].mxu1 %vm216_vm2, %v2098_v34  ;;  %4299 = vmatmul.mubr.msk.f32.gmra.mrb[156].mxu0 %vm216_vm2, %v4836_v7  ;;  %v3896_v5 = vpop.f32.mrb[51].mxu1 }
 0x14b   : > { %4257 = vmatprep.mubr.msk.f32.mxu1 %vm4449_vm1, %v4448_v1  ;;  %4301 = vmatprep.mubr.msk.f32.mxu0 %vm4449_vm1, %v4448_v1  ;;  %v2104_v58 = vld [vmem:[%s4499_s19 + $0x8d] sm:$0xff] }
 0x14d   : > { %v681_v49 = vpop.f32.mrb[52].mxu1  ;;  %v905_v3 = vpop.f32.mrb[52].mxu0 }
 0x14e   : > { %v5422_v16 = vadd.f32 %v681_v49, %v5140_v62  ;;  %v5425_v57 = vadd.f32 %v905_v3, %v5325_v25  ;;  %v3943_v63 = vpop.f32.mrb[53].mxu0  ;;  %4258 = vmatmul.mubr.msk.f32.gmra.mrb[158].mxu1 %vm216_vm2, %v2099_v53  ;;  %4302 = vmatmul.mubr.msk.f32.gmra.mrb[158].mxu0 %vm216_vm2, %v4847_v9  ;;  %v3899_v7 = vpop.f32.mrb[53].mxu1  ;;  %v2105_v3 = vld [vmem:[%s4499_s19 + $0x95] sm:$0xff] }
 0x14f   : > { %4260 = vmatprep.mubr.msk.f32.mxu1 %vm4449_vm1, %v4448_v1  ;;  %4304 = vmatprep.mubr.msk.f32.mxu0 %vm4449_vm1, %v4448_v1 }
 0x151   : > { %v686_v62 = vpop.f32.mrb[54].mxu1  ;;  %v910_v40 = vpop.f32.mrb[54].mxu0 }
 0x152   : > { %v5436_v25 = vadd.f32 %v686_v62, %v5152_v26  ;;  %v5439_v28 = vadd.f32 %v910_v40, %v5339_v45  ;;  %v3946_v20 = vpop.f32.mrb[55].mxu0  ;;  %4261 = vmatmul.mubr.msk.f32.gmra.mrb[160].mxu1 %vm216_vm2, %v2100_v0  ;;  %4305 = vmatmul.mubr.msk.f32.gmra.mrb[160].mxu0 %vm216_vm2, %v4858_v11  ;;  %v3902_v9 = vpop.f32.mrb[55].mxu1  ;;  %v2106_v62 = vld [vmem:[%s4499_s19 + $0x9d] sm:$0xff] }
 0x153   : > { %4263 = vmatprep.mubr.msk.f32.mxu1 %vm4449_vm1, %v4448_v1  ;;  %4307 = vmatprep.mubr.msk.f32.mxu0 %vm4449_vm1, %v4448_v1 }
 0x155   : > { %v915_v26 = vpop.f32.mrb[56].mxu0  ;;  %v1125_v52 = vpop.f32.mrb[56].mxu1 }
 0x156   : > { %v5450_v45 = vadd.f32 %v915_v26, %v5353_v61  ;;  %v5453_v30 = vadd.f32 %v1125_v52, %v5257_v48  ;;  %v3949_v44 = vpop.f32.mrb[57].mxu0  ;;  %4264 = vmatmul.mubr.msk.f32.gmra.mrb[162].mxu1 %vm216_vm2, %v2101_v10  ;;  %4308 = vmatmul.mubr.msk.f32.gmra.mrb[162].mxu0 %vm216_vm2, %v4869_v13  ;;  %v3972_v11 = vpop.f32.mrb[57].mxu1  ;;  %v2107_v10 = vld [vmem:[%s4499_s19 + $0xa5] sm:$0xff] }
 0x157   : > { %4266 = vmatprep.mubr.msk.f32.mxu1 %vm4449_vm1, %v4448_v1  ;;  %4310 = vmatprep.mubr.msk.f32.mxu0 %vm4449_vm1, %v4448_v1  ;;  %v2108_v11 = vld [vmem:[%s4499_s19 + $0xad] sm:$0xff] }
 0x159   : > { %v920_v61 = vpop.f32.mrb[58].mxu0  ;;  %v1130_v37 = vpop.f32.mrb[58].mxu1 }
 0x15a   : > { %v5464_v48 = vadd.f32 %v920_v61, %v5367_v24  ;;  %v5467_v18 = vadd.f32 %v1130_v37, %v5272_v60  ;;  %v3952_v46 = vpop.f32.mrb[59].mxu0  ;;  %4267 = vmatmul.mubr.msk.f32.gmra.mrb[164].mxu1 %vm216_vm2, %v2102_v54  ;;  %4311 = vmatmul.mubr.msk.f32.gmra.mrb[164].mxu0 %vm216_vm2, %v4879_v14  ;;  %v3975_v13 = vpop.f32.mrb[59].mxu1 }
 0x15b   : > { %4269 = vmatprep.mubr.msk.f32.mxu1 %vm4449_vm1, %v4448_v1  ;;  %4313 = vmatprep.mubr.msk.f32.mxu0 %vm4449_vm1, %v4448_v1  ;;  %v2109_v46 = vld [vmem:[%s4499_s19 + $0xb5] sm:$0xff] }
 0x15d   : > { %v925_v24 = vpop.f32.mrb[60].mxu0  ;;  %v1135_v34 = vpop.f32.mrb[60].mxu1 }
 0x15e   : > { %v5478_v60 = vadd.f32 %v925_v24, %v5381_v50  ;;  %v5481_v29 = vadd.f32 %v1135_v34, %v5286_v32  ;;  %v3955_v36 = vpop.f32.mrb[61].mxu0  ;;  %4270 = vmatmul.mubr.msk.f32.gmra.mrb[166].mxu1 %vm216_vm2, %v2103_v33  ;;  %4314 = vmatmul.mubr.msk.f32.gmra.mrb[166].mxu0 %vm216_vm2, %v4893_v17  ;;  %v3978_v14 = vpop.f32.mrb[61].mxu1  ;;  %v2110_v34 = vld [vmem:[%s4499_s19 + $0xbd] sm:$0xff] }
 0x15f   : > { %4272 = vmatprep.mubr.msk.f32.mxu1 %vm4449_vm1, %v4448_v1  ;;  %4316 = vmatprep.mubr.msk.f32.mxu0 %vm4449_vm1, %v4448_v1 }
 0x161   : > { %v930_v50 = vpop.f32.mrb[62].mxu0  ;;  %v1140_v5 = vpop.f32.mrb[62].mxu1 }
 0x162   : > { %v5492_v32 = vadd.f32 %v930_v50, %v5394_v22  ;;  %v5495_v53 = vadd.f32 %v1140_v5, %v5300_v56  ;;  %v3958_v49 = vpop.f32.mrb[63].mxu0  ;;  %4273 = vmatmul.mubr.msk.f32.gmra.mrb[168].mxu1 %vm216_vm2, %v2104_v58  ;;  %4317 = vmatmul.mubr.msk.f32.gmra.mrb[168].mxu0 %vm216_vm2, %v4906_v19  ;;  %v3981_v17 = vpop.f32.mrb[63].mxu1 }
 0x163   : > { %4275 = vmatprep.mubr.msk.f32.mxu1 %vm4449_vm1, %v4448_v1  ;;  %4319 = vmatprep.mubr.msk.f32.mxu0 %vm4449_vm1, %v4448_v1 }
 0x165   : > { %v935_v22 = vpop.f32.mrb[64].mxu0  ;;  %v1145_v63 = vpop.f32.mrb[64].mxu1 }
 0x166   : > { %v5506_v56 = vadd.f32 %v935_v22, %v5408_v8  ;;  %v5509_v7 = vadd.f32 %v1145_v63, %v5314_v6  ;;  %v3961_v0 = vpop.f32.mrb[65].mxu0  ;;  %4276 = vmatmul.mubr.msk.f32.gmra.mrb[170].mxu1 %vm216_vm2, %v2105_v3  ;;  %4320 = vmatmul.mubr.msk.f32.gmra.mrb[170].mxu0 %vm216_vm2, %v4917_v21  ;;  %v3984_v19 = vpop.f32.mrb[65].mxu1 }
 0x167   : > { %4278 = vmatprep.mubr.msk.f32.mxu1 %vm4449_vm1, %v4448_v1  ;;  %4322 = vmatprep.mubr.msk.f32.mxu0 %vm4449_vm1, %v4448_v1 }
 0x169   : > { %v940_v8 = vpop.f32.mrb[66].mxu0  ;;  %v1150_v40 = vpop.f32.mrb[66].mxu1 }
 0x16a   : > { %v5520_v6 = vadd.f32 %v940_v8, %v5422_v16  ;;  %v5523_v20 = vadd.f32 %v1150_v40, %v5328_v42  ;;  %v3964_v9 = vpop.f32.mrb[67].mxu0  ;;  %4279 = vmatmul.mubr.msk.f32.gmra.mrb[172].mxu1 %vm216_vm2, %v2106_v62  ;;  %4323 = vmatmul.mubr.msk.f32.gmra.mrb[172].mxu0 %vm216_vm2, %v4928_v23  ;;  %v3987_v21 = vpop.f32.mrb[67].mxu1 }
 0x16b   : > { %4281 = vmatprep.mubr.msk.f32.mxu1 %vm4449_vm1, %v4448_v1  ;;  %4325 = vmatprep.mubr.msk.f32.mxu0 %vm4449_vm1, %v4448_v1 }
 0x16d   : > { %v945_v16 = vpop.f32.mrb[68].mxu0  ;;  %v1155_v26 = vpop.f32.mrb[68].mxu1 }
 0x16e   : > { %v5534_v42 = vadd.f32 %v945_v16, %v5436_v25  ;;  %v5537_v52 = vadd.f32 %v1155_v26, %v5342_v15  ;;  %v3967_v44 = vpop.f32.mrb[69].mxu0  ;;  %4282 = vmatmul.mubr.msk.f32.gmra.mrb[174].mxu1 %vm216_vm2, %v2107_v10  ;;  %4326 = vmatmul.mubr.msk.f32.gmra.mrb[174].mxu0 %vm216_vm2, %v4939_v27  ;;  %v3990_v23 = vpop.f32.mrb[69].mxu1 }
 0x16f   : > { %4284 = vmatprep.mubr.msk.f32.mxu1 %vm4449_vm1, %v4448_v1  ;;  %4328 = vmatprep.mubr.msk.f32.mxu0 %vm4449_vm1, %v4448_v1 }
 0x171   : > { %v1160_v25 = vpop.f32.mrb[70].mxu1  ;;  %v1405_v54 = vpop.f32.mrb[70].mxu0 }
 0x172   : > { %v5548_v15 = vadd.f32 %v1160_v25, %v5356_v41  ;;  %v5551_v61 = vadd.f32 %v1405_v54, %v5453_v30  ;;  %v4037_v37 = vpop.f32.mrb[71].mxu0  ;;  %4285 = vmatmul.mubr.msk.f32.gmra.mrb[176].mxu1 %vm216_vm2, %v2108_v11  ;;  %4329 = vmatmul.mubr.msk.f32.gmra.mrb[176].mxu0 %vm216_vm2, %v4950_v31  ;;  %v3993_v27 = vpop.f32.mrb[71].mxu1 }
 0x173   : > { %4287 = vmatprep.mubr.msk.f32.mxu1 %vm4449_vm1, %v4448_v1  ;;  %4331 = vmatprep.mubr.msk.f32.mxu0 %vm4449_vm1, %v4448_v1 }
 0x175   : > { %v1165_v41 = vpop.f32.mrb[72].mxu1  ;;  %v1410_v13 = vpop.f32.mrb[72].mxu0 }
 0x176   : > { %v5562_v30 = vadd.f32 %v1165_v41, %v5370_v12  ;;  %v5565_v33 = vadd.f32 %v1410_v13, %v5467_v18  ;;  %v4040_v24 = vpop.f32.mrb[73].mxu0  ;;  %4288 = vmatmul.mubr.msk.f32.gmra.mrb[178].mxu1 %vm216_vm2, %v2109_v46  ;;  %4332 = vmatmul.mubr.msk.f32.gmra.mrb[178].mxu0 %vm216_vm2, %v4961_v35  ;;  %v3996_v31 = vpop.f32.mrb[73].mxu1 }
 0x177   : > { %4290 = vmatprep.mubr.msk.f32.mxu1 %vm4449_vm1, %v4448_v1  ;;  %4334 = vmatprep.mubr.msk.f32.mxu0 %vm4449_vm1, %v4448_v1 }
 0x179   : > { %v1170_v36 = vpop.f32.mrb[74].mxu1  ;;  %v1415_v12 = vpop.f32.mrb[74].mxu0 }
 0x17a   : > { %v1238_v14 = vadd.f32 %v1170_v36, %v5384_v4  ;;  %v5577_v18 = vadd.f32 %v1415_v12, %v5481_v29  ;;  %v4043_v58 = vpop.f32.mrb[75].mxu0  ;;  %4291 = vmatmul.mubr.msk.f32.gmra.mrb[180].mxu1 %vm216_vm2, %v2110_v34  ;;  %4335 = vmatmul.mubr.msk.f32.gmra.mrb[180].mxu0 %vm216_vm2, %v4972_v39  ;;  %v3999_v35 = vpop.f32.mrb[75].mxu1 }
 0x17b   : > { %4337 = vmatprep.mubr.msk.f32.mxu0 %vm4449_vm1, %v4448_v1  ;;  %4362 = vmatprep.mubr.msk.f32.mxu1 %vm4449_vm1, %v4448_v1 }
 0x17d   : > { %v1175_v50 = vpop.f32.mrb[76].mxu1  ;;  %v1420_v5 = vpop.f32.mrb[76].mxu0 }
 0x17e   : > { %v1239_v4 = vadd.f32 %v1175_v50, %v5397_v2  ;;  %v5588_v29 = vadd.f32 %v1420_v5, %v5495_v53  ;;  %v4046_v49 = vpop.f32.mrb[77].mxu0  ;;  %4338 = vmatmul.mubr.msk.f32.gmra.mrb[182].mxu0 %vm216_vm2, %v4983_v43  ;;  %v4002_v17 = vpop.f32.mrb[77].mxu1 }
 0x17f   : > { %4340 = vmatprep.mubr.msk.f32.mxu0 %vm4449_vm1, %v4448_v1 }
 0x181   : > { %v1180_v39 = vpop.f32.mrb[78].mxu1  ;;  %v1425_v3 = vpop.f32.mrb[78].mxu0 }
 0x182   : > { %v1240_v22 = vadd.f32 %v1180_v39, %v5411_v38  ;;  %v5596_v63 = vadd.f32 %v1425_v3, %v5509_v7  ;;  %v4049_v0 = vpop.f32.mrb[79].mxu0  ;;  %4341 = vmatmul.mubr.msk.f32.gmra.mrb[184].mxu0 %vm216_vm2, %v4994_v47  ;;  %v4005_v2 = vpop.f32.mrb[79].mxu1 }
 0x183   : > { %4343 = vmatprep.mubr.msk.f32.mxu0 %vm4449_vm1, %v4448_v1 }
 0x185   : > { %v1185_v43 = vpop.f32.mrb[80].mxu1  ;;  %v1430_v53 = vpop.f32.mrb[80].mxu0 }
 0x186   : > { %v1241_v19 = vadd.f32 %v1185_v43, %v5425_v57  ;;  %v5604_v62 = vadd.f32 %v1430_v53, %v5523_v20  ;;  %v4052_v8 = vpop.f32.mrb[81].mxu0  ;;  %4344 = vmatmul.mubr.msk.f32.gmra.mrb[186].mxu0 %vm216_vm2, %v5005_v51  ;;  %v4008_v38 = vpop.f32.mrb[81].mxu1 }
 0x187   : > { %4346 = vmatprep.mubr.msk.f32.mxu0 %vm4449_vm1, %v4448_v1 }
 0x189   : > { %v1190_v47 = vpop.f32.mrb[82].mxu1  ;;  %v1435_v7 = vpop.f32.mrb[82].mxu0 }
 0x18a   : > { %v1242_v40 = vadd.f32 %v1190_v47, %v5439_v28  ;;  %v5612_v9 = vadd.f32 %v1435_v7, %v5537_v52  ;;  %v4055_v57 = vpop.f32.mrb[83].mxu0  ;;  %4347 = vmatmul.mubr.msk.f32.gmra.mrb[188].mxu0 %vm216_vm2, %v5016_v55  ;;  %v4011_v20 = vpop.f32.mrb[83].mxu1  ;;  %v2389_v55 = vld [vmem:[%s4499_s19 + $0xb6] sm:$0xff] }
 0x18b   : > { %4349 = vmatprep.mubr.msk.f32.mxu0 %vm4449_vm1, %v4448_v1 }
 0x18d   : > { %v1195_v51 = vpop.f32.mrb[84].mxu1  ;;  %v1440_v21 = vpop.f32.mrb[84].mxu0 }
 0x18e   : > { %v1243_v10 = vadd.f32 %v1195_v51, %v5450_v45  ;;  %v5620_v16 = vadd.f32 %v1440_v21, %v5548_v15  ;;  %v4058_v28 = vpop.f32.mrb[85].mxu0  ;;  %4350 = vmatmul.mubr.msk.f32.gmra.mrb[190].mxu0 %vm216_vm2, %v5027_v59  ;;  %v4014_v26 = vpop.f32.mrb[85].mxu1  ;;  %v2390_v59 = vld [vmem:[%s4499_s19 + $0xbe] sm:$0xff] }
 0x18f   : > { %4352 = vmatprep.mubr.msk.f32.mxu0 %vm4449_vm1, %v4448_v1 }
 0x191   : > { %v1200_v52 = vpop.f32.mrb[86].mxu1  ;;  %v1445_v44 = vpop.f32.mrb[86].mxu0 }
 0x192   : > { %v1244_v23 = vadd.f32 %v1200_v52, %v5464_v48  ;;  %v5629_v11 = vadd.f32 %v1445_v44, %v5562_v30  ;;  %v4061_v45 = vpop.f32.mrb[87].mxu0  ;;  %4353 = vmatmul.mubr.msk.f32.gmra.mrb[192].mxu0 %vm216_vm2, %v2389_v55  ;;  %v4017_v25 = vpop.f32.mrb[87].mxu1 }
 0x193   : > { %4355 = vmatprep.mubr.msk.f32.mxu0 %vm4449_vm1, %v4448_v1 }
 0x195   : > { %v1205_v54 = vpop.f32.mrb[88].mxu1  ;;  %v1450_v15 = vpop.f32.mrb[88].mxu0 }
 0x196   : > { %v1245_v37 = vadd.f32 %v1205_v54, %v5478_v60  ;;  %v5636_v27 = vadd.f32 %v1450_v15, %v1238_v14  ;;  %v4064_v46 = vpop.f32.mrb[89].mxu0  ;;  %4356 = vmatmul.mubr.msk.f32.gmra.mrb[194].mxu0 %vm216_vm2, %v2390_v59  ;;  %v4020_v48 = vpop.f32.mrb[89].mxu1  ;;  %v4450_v54 = vmov 0.0|0.0  }
 0x197   : > { %4400 = vmatprep.subr.bf16.mxu1 %v4450_v54 }
 0x199   : > { %v1210_v41 = vpop.f32.mrb[90].mxu1  ;;  %v1455_v13 = vpop.f32.mrb[90].mxu0 }
 0x19a   : > { %v1246_v30 = vadd.f32 %v1210_v41, %v5492_v32  ;;  %v5640_v24 = vadd.f32 %v1455_v13, %v1239_v4  ;;  %v4067_v31 = vpop.f32.mrb[91].mxu0  ;;  %v4023_v34 = vpop.f32.mrb[91].mxu1 }
 0x19d   : > { %v1215_v36 = vpop.f32.mrb[92].mxu1  ;;  %v1460_v12 = vpop.f32.mrb[92].mxu0 }
 0x19e   : > { %v1247_v58 = vadd.f32 %v1215_v36, %v5506_v56  ;;  %v5643_v35 = vadd.f32 %v1460_v12, %v1240_v22  ;;  %v4070_v60 = vpop.f32.mrb[93].mxu0  ;;  %v4026_v14 = vpop.f32.mrb[93].mxu1 }
 0x1a1   : > { %v1220_v50 = vpop.f32.mrb[94].mxu1  ;;  %v1465_v5 = vpop.f32.mrb[94].mxu0 }
 0x1a2   : > { %v1248_v49 = vadd.f32 %v1220_v50, %v5520_v6  ;;  %v5646_v17 = vadd.f32 %v1465_v5, %v1241_v19  ;;  %v4073_v39 = vpop.f32.mrb[95].mxu0  ;;  %v4029_v32 = vpop.f32.mrb[95].mxu1 }
 0x1a5   : > { %v1225_v4 = vpop.f32.mrb[96].mxu1  ;;  %v1470_v3 = vpop.f32.mrb[96].mxu0 }
 0x1a6   : > { %v1249_v0 = vadd.f32 %v1225_v4, %v5534_v42  ;;  %v5649_v2 = vadd.f32 %v1470_v3, %v1242_v40  ;;  %v4076_v43 = vpop.f32.mrb[97].mxu0  ;;  %v4032_v56 = vpop.f32.mrb[97].mxu1 }
 0x1a9   : > { %v1475_v22 = vpop.f32.mrb[98].mxu0  ;;  %v1685_v53 = vpop.f32.mrb[98].mxu1 }
 0x1aa   : > { %v5651_v8 = vadd.f32 %v1475_v22, %v1243_v10  ;;  %v1789_v38 = vadd.f32 %v1685_v53, %v5551_v61  ;;  %v4079_v47 = vpop.f32.mrb[99].mxu0  ;;  %v4102_v6 = vpop.f32.mrb[99].mxu1 }
 0x1ad   : > { %v1480_v19 = vpop.f32.mrb[100].mxu0  ;;  %v1690_v7 = vpop.f32.mrb[100].mxu1 }
 0x1ae   : > { %v5654_v57 = vadd.f32 %v1480_v19, %v1244_v23  ;;  %v1790_v20 = vadd.f32 %v1690_v7, %v5565_v33  ;;  %v4082_v51 = vpop.f32.mrb[101].mxu0  ;;  %v4105_v42 = vpop.f32.mrb[101].mxu1 }
 0x1b1   : > { %v1485_v40 = vpop.f32.mrb[102].mxu0  ;;  %v1695_v21 = vpop.f32.mrb[102].mxu1 }
 0x1b2   : > { %v5657_v28 = vadd.f32 %v1485_v40, %v1245_v37  ;;  %v1791_v26 = vadd.f32 %v1695_v21, %v5577_v18  ;;  %v4085_v10 = vpop.f32.mrb[103].mxu0  ;;  %v4108_v55 = vpop.f32.mrb[103].mxu1 }
 0x1b5   : > { %v1490_v52 = vpop.f32.mrb[104].mxu0  ;;  %v1700_v61 = vpop.f32.mrb[104].mxu1 }
 0x1b6   : > { %v5660_v44 = vadd.f32 %v1490_v52, %v1246_v30  ;;  %v1792_v45 = vadd.f32 %v1700_v61, %v5588_v29  ;;  %v4088_v23 = vpop.f32.mrb[105].mxu0  ;;  %v4111_v25 = vpop.f32.mrb[105].mxu1 }
 0x1b9   : > { %v1495_v59 = vpop.f32.mrb[106].mxu0  ;;  %v1705_v33 = vpop.f32.mrb[106].mxu1 }
 0x1ba   : > { %v5664_v15 = vadd.f32 %v1495_v59, %v1247_v58  ;;  %v1793_v37 = vadd.f32 %v1705_v33, %v5596_v63  ;;  %v4091_v18 = vpop.f32.mrb[107].mxu0  ;;  %v4114_v46 = vpop.f32.mrb[107].mxu1 }
 0x1bd   : > { %v1500_v48 = vpop.f32.mrb[108].mxu0  ;;  %v1710_v41 = vpop.f32.mrb[108].mxu1 }
 0x1be   : > { %v5667_v13 = vadd.f32 %v1500_v48, %v1248_v49  ;;  %v1794_v30 = vadd.f32 %v1710_v41, %v5604_v62  ;;  %v4094_v29 = vpop.f32.mrb[109].mxu0  ;;  %v4117_v31 = vpop.f32.mrb[109].mxu1 }
 0x1c1   : > { %v1505_v34 = vpop.f32.mrb[110].mxu0  ;;  %v1715_v36 = vpop.f32.mrb[110].mxu1 }
 0x1c2   : > { %v5670_v12 = vadd.f32 %v1505_v34, %v1249_v0  ;;  %v1795_v60 = vadd.f32 %v1715_v36, %v5612_v9  ;;  %v4097_v58 = vpop.f32.mrb[111].mxu0  ;;  %v4120_v14 = vpop.f32.mrb[111].mxu1 }
 0x1c5   : > { %v1720_v50 = vpop.f32.mrb[112].mxu1  ;;  %v1965_v63 = vpop.f32.mrb[112].mxu0 }
 0x1c6   : > { %v1796_v5 = vadd.f32 %v1720_v50, %v5620_v16  ;;  %v5674_v39 = vadd.f32 %v1965_v63, %v1789_v38  ;;  %v4167_v49 = vpop.f32.mrb[113].mxu0  ;;  %v4123_v32 = vpop.f32.mrb[113].mxu1 }
 0x1c9   : > { %v1725_v4 = vpop.f32.mrb[114].mxu1  ;;  %v1970_v62 = vpop.f32.mrb[114].mxu0 }
 0x1ca   : > { %v1797_v3 = vadd.f32 %v1725_v4, %v5629_v11  ;;  %v5677_v43 = vadd.f32 %v1970_v62, %v1790_v20  ;;  %v4170_v0 = vpop.f32.mrb[115].mxu0  ;;  %v4126_v56 = vpop.f32.mrb[115].mxu1 }
 0x1cd   : > { %v1730_v22 = vpop.f32.mrb[116].mxu1  ;;  %v1975_v9 = vpop.f32.mrb[116].mxu0 }
 0x1ce   : > { %v1798_v53 = vadd.f32 %v1730_v22, %v5636_v27  ;;  %v5680_v47 = vadd.f32 %v1975_v9, %v1791_v26  ;;  %v4173_v6 = vpop.f32.mrb[117].mxu0  ;;  %v4129_v16 = vpop.f32.mrb[117].mxu1 }
 0x1d1   : > { %v1735_v38 = vpop.f32.mrb[118].mxu1  ;;  %v1980_v19 = vpop.f32.mrb[118].mxu0 }
 0x1d2   : > { %v1799_v7 = vadd.f32 %v1735_v38, %v5640_v24  ;;  %v5683_v51 = vadd.f32 %v1980_v19, %v1792_v45  ;;  %v4176_v42 = vpop.f32.mrb[119].mxu0  ;;  %v4132_v11 = vpop.f32.mrb[119].mxu1 }
 0x1d5   : > { %v1740_v20 = vpop.f32.mrb[120].mxu1  ;;  %v1985_v40 = vpop.f32.mrb[120].mxu0 }
 0x1d6   : > { %v1800_v21 = vadd.f32 %v1740_v20, %v5643_v35  ;;  %v5686_v10 = vadd.f32 %v1985_v40, %v1793_v37  ;;  %v4179_v55 = vpop.f32.mrb[121].mxu0  ;;  %v4135_v27 = vpop.f32.mrb[121].mxu1 }
 0x1d9   : > { %v1745_v26 = vpop.f32.mrb[122].mxu1  ;;  %v1990_v52 = vpop.f32.mrb[122].mxu0 }
 0x1da   : > { %v1801_v61 = vadd.f32 %v1745_v26, %v5646_v17  ;;  %v5689_v23 = vadd.f32 %v1990_v52, %v1794_v30  ;;  %v4182_v25 = vpop.f32.mrb[123].mxu0  ;;  %v4138_v24 = vpop.f32.mrb[123].mxu1 }
 0x1dd   : > { %v1750_v45 = vpop.f32.mrb[124].mxu1  ;;  %v1995_v59 = vpop.f32.mrb[124].mxu0 }
 0x1de   : > { %v1802_v33 = vadd.f32 %v1750_v45, %v5649_v2  ;;  %v5692_v18 = vadd.f32 %v1995_v59, %v1795_v60  ;;  %v4185_v46 = vpop.f32.mrb[125].mxu0  ;;  %v4141_v35 = vpop.f32.mrb[125].mxu1 }
 0x1e1   : > { %v1755_v37 = vpop.f32.mrb[126].mxu1  ;;  %v2000_v48 = vpop.f32.mrb[126].mxu0 }
 0x1e2   : > { %v1803_v41 = vadd.f32 %v1755_v37, %v5651_v8  ;;  %v5695_v29 = vadd.f32 %v2000_v48, %v1796_v5  ;;  %v4188_v31 = vpop.f32.mrb[127].mxu0  ;;  %v4144_v17 = vpop.f32.mrb[127].mxu1 }
 0x1e5   : > { %v1760_v30 = vpop.f32.mrb[128].mxu1  ;;  %v2005_v34 = vpop.f32.mrb[128].mxu0 }
 0x1e6   : > { %v1804_v36 = vadd.f32 %v1760_v30, %v5654_v57  ;;  %v5698_v58 = vadd.f32 %v2005_v34, %v1797_v3  ;;  %v4191_v14 = vpop.f32.mrb[129].mxu0  ;;  %v4147_v2 = vpop.f32.mrb[129].mxu1 }
 0x1e9   : > { %v1765_v60 = vpop.f32.mrb[130].mxu1  ;;  %v2010_v50 = vpop.f32.mrb[130].mxu0 }
 0x1ea   : > { %v1805_v63 = vadd.f32 %v1765_v60, %v5657_v28  ;;  %v5701_v49 = vadd.f32 %v2010_v50, %v1798_v53  ;;  %v4194_v32 = vpop.f32.mrb[131].mxu0  ;;  %v4150_v8 = vpop.f32.mrb[131].mxu1 }
 0x1ed   : > { %v1770_v5 = vpop.f32.mrb[132].mxu1  ;;  %v2015_v4 = vpop.f32.mrb[132].mxu0 }
 0x1ee   : > { %v1806_v62 = vadd.f32 %v1770_v5, %v5660_v44  ;;  %v5704_v0 = vadd.f32 %v2015_v4, %v1799_v7  ;;  %v4197_v56 = vpop.f32.mrb[133].mxu0  ;;  %v4153_v57 = vpop.f32.mrb[133].mxu1 }
 0x1f1   : > { %v1775_v3 = vpop.f32.mrb[134].mxu1  ;;  %v2020_v22 = vpop.f32.mrb[134].mxu0 }
 0x1f2   : > { %v1807_v9 = vadd.f32 %v1775_v3, %v5664_v15  ;;  %v5707_v6 = vadd.f32 %v2020_v22, %v1800_v21  ;;  %v4200_v16 = vpop.f32.mrb[135].mxu0  ;;  %v4156_v28 = vpop.f32.mrb[135].mxu1 }
 0x1f5   : > { %v1780_v53 = vpop.f32.mrb[136].mxu1  ;;  %v2025_v38 = vpop.f32.mrb[136].mxu0 }
 0x1f6   : > { %v1808_v19 = vadd.f32 %v1780_v53, %v5667_v13  ;;  %v5710_v42 = vadd.f32 %v2025_v38, %v1801_v61  ;;  %v4203_v11 = vpop.f32.mrb[137].mxu0  ;;  %v4159_v44 = vpop.f32.mrb[137].mxu1  ;;  %v5741_v38 = vld [vmem:[%s5904_s2] ss:$0 sm:$0xff] }
 0x1f9   : > { %v1785_v7 = vpop.f32.mrb[138].mxu1  ;;  %v2030_v20 = vpop.f32.mrb[138].mxu0 }
 0x1fa   : > { %v1809_v40 = vadd.f32 %v1785_v7, %v5670_v12  ;;  %v5713_v55 = vadd.f32 %v2030_v20, %v1802_v33  ;;  %v4206_v27 = vpop.f32.mrb[139].mxu0  ;;  %v4162_v15 = vpop.f32.mrb[139].mxu1 }
 0x1fd   : > { %v2035_v21 = vpop.f32.mrb[140].mxu0  ;;  %v2245_v26 = vpop.f32.mrb[140].mxu1 }
 0x1fe   : > { %v5715_v52 = vadd.f32 %v2035_v21, %v1803_v41  ;;  %v2349_v25 = vadd.f32 %v2245_v26, %v5674_v39  ;;  %v4209_v24 = vpop.f32.mrb[141].mxu0  ;;  %v4232_v13 = vpop.f32.mrb[141].mxu1 }
 0x201   : > { %v2040_v61 = vpop.f32.mrb[142].mxu0  ;;  %v2250_v45 = vpop.f32.mrb[142].mxu1 }
 0x202   : > { %v5718_v59 = vadd.f32 %v2040_v61, %v1804_v36  ;;  %v2350_v46 = vadd.f32 %v2250_v45, %v5677_v43  ;;  %v4212_v35 = vpop.f32.mrb[143].mxu0  ;;  %v4235_v12 = vpop.f32.mrb[143].mxu1 }
 0x205   : > { %v2045_v33 = vpop.f32.mrb[144].mxu0  ;;  %v2255_v37 = vpop.f32.mrb[144].mxu1 }
 0x206   : > { %v5721_v48 = vadd.f32 %v2045_v33, %v1805_v63  ;;  %v2351_v31 = vadd.f32 %v2255_v37, %v5680_v47  ;;  %v4215_v41 = vpop.f32.mrb[145].mxu0  ;;  %v4238_v17 = vpop.f32.mrb[145].mxu1 }
 0x209   : > { %v2050_v30 = vpop.f32.mrb[146].mxu0  ;;  %v2260_v39 = vpop.f32.mrb[146].mxu1 }
 0x20a   : > { %v5724_v34 = vadd.f32 %v2050_v30, %v1806_v62  ;;  %v2352_v14 = vadd.f32 %v2260_v39, %v5683_v51  ;;  %v4218_v36 = vpop.f32.mrb[147].mxu0  ;;  %v4241_v2 = vpop.f32.mrb[147].mxu1 }
 0x20d   : > { %v2055_v60 = vpop.f32.mrb[148].mxu0  ;;  %v2265_v43 = vpop.f32.mrb[148].mxu1 }
 0x20e   : > { %v5727_v50 = vadd.f32 %v2055_v60, %v1807_v9  ;;  %v2353_v32 = vadd.f32 %v2265_v43, %v5686_v10  ;;  %v4221_v63 = vpop.f32.mrb[149].mxu0  ;;  %v4244_v8 = vpop.f32.mrb[149].mxu1 }
 0x211   : > { %v2060_v5 = vpop.f32.mrb[150].mxu0  ;;  %v2270_v47 = vpop.f32.mrb[150].mxu1 }
 0x212   : > { %v5730_v4 = vadd.f32 %v2060_v5, %v1808_v19  ;;  %v2354_v56 = vadd.f32 %v2270_v47, %v5689_v23  ;;  %v4224_v62 = vpop.f32.mrb[151].mxu0  ;;  %v4247_v57 = vpop.f32.mrb[151].mxu1 }
 0x215   : > { %v2065_v3 = vpop.f32.mrb[152].mxu0  ;;  %v2275_v51 = vpop.f32.mrb[152].mxu1 }
 0x216   : > { %v5733_v22 = vadd.f32 %v2065_v3, %v1809_v40  ;;  %v5736_v16 = vadd.f32 %v2275_v51, %v5692_v18  ;;  %v4227_v9 = vpop.f32.mrb[153].mxu0  ;;  %v4250_v28 = vpop.f32.mrb[153].mxu1 }
 0x219   : > { %v2280_v10 = vpop.f32.mrb[154].mxu1  ;;  %v2525_v53 = vpop.f32.mrb[154].mxu0 }
 0x21a   : > { %v5744_v23 = vadd.f32 %v2280_v10, %v5695_v29  ;;  %v2629_v19 = vadd.f32 %v2525_v53, %v2349_v25  ;;  %v4297_v11 = vpop.f32.mrb[155].mxu0  ;;  %v4253_v44 = vpop.f32.mrb[155].mxu1 }
 0x21c   : > { %v2657_v7 = vadd.f32 %v5741_v38, %v2629_v19 }
 0x21d   : > { %v2285_v18 = vpop.f32.mrb[156].mxu1  ;;  %v2530_v20 = vpop.f32.mrb[156].mxu0 }
 0x21e   : > { %v2678_v40 = vmax.f32 %v2657_v7, 0.0  ;;  %v5748_v27 = vadd.f32 %v2285_v18, %v5698_v58  ;;  %v2630_v15 = vadd.f32 %v2530_v20, %v2350_v46  ;;  %v4300_v21 = vpop.f32.mrb[157].mxu0  ;;  %v4256_v26 = vpop.f32.mrb[157].mxu1 }
 0x220   : > { %2700 = vst.msk [vmem:[#allocation2] sm:$0xff] %vm2699_vm3, %v2678_v40  ;;  %v2658_v29 = vadd.f32 %v5741_v38, %v2630_v15 }
 0x221   : > { %v2290_v24 = vpop.f32.mrb[158].mxu1  ;;  %v2535_v25 = vpop.f32.mrb[158].mxu0 }
 0x222   : > { %v2679_v13 = vmax.f32 %v2658_v29, 0.0  ;;  %v5753_v61 = vadd.f32 %v2290_v24, %v5701_v49  ;;  %v2631_v45 = vadd.f32 %v2535_v25, %v2351_v31  ;;  %v4303_v35 = vpop.f32.mrb[159].mxu0  ;;  %v4259_v12 = vpop.f32.mrb[159].mxu1  ;;  %v2721_v31 = vlaneseq }
 0x224   : > { %2701 = vst.msk [vmem:[#allocation2 + $0x8] sm:$0xff] %vm2699_vm3, %v2679_v13  ;;  %v2659_v58 = vadd.f32 %v5741_v38, %v2631_v45  ;;  %v2722_v19 = vand.u32 127, %v2721_v31 }
 0x225   : > { %v2295_v46 = vpop.f32.mrb[160].mxu1  ;;  %v2540_v33 = vpop.f32.mrb[160].mxu0 }
 0x226   : > { %v2680_v37 = vmax.f32 %v2659_v58, 0.0  ;;  %v5758_v41 = vadd.f32 %v2295_v46, %v5704_v0  ;;  %v2632_v17 = vadd.f32 %v2540_v33, %v2352_v14  ;;  %v4306_v30 = vpop.f32.mrb[161].mxu0  ;;  %v4262_v39 = vpop.f32.mrb[161].mxu1  ;;  %v2724_v14 = vshrl.u32 %v2721_v31, 7 }
 0x227   : > { %v2729_v29 = vld [vmem:[#allocation2] sm:$0xff] }
 0x228   : > { %2702 = vst.msk [vmem:[#allocation2 + $0x10] sm:$0xff] %vm2699_vm3, %v2680_v37  ;;  %v2660_v49 = vadd.f32 %v5741_v38, %v2632_v17  ;;  %v2725_v11 = vmul.u32 2, %v2724_v14 }
 0x229   : > { %v2300_v36 = vpop.f32.mrb[162].mxu1  ;;  %v2545_v2 = vpop.f32.mrb[162].mxu0 }
 0x22a   : > { %v2681_v60 = vmax.f32 %v2660_v49, 0.0  ;;  %v5763_v43 = vadd.f32 %v2300_v36, %v5707_v6  ;;  %v2633_v63 = vadd.f32 %v2545_v2, %v2353_v32  ;;  %v4265_v8 = vpop.f32.mrb[163].mxu1  ;;  %v4309_v5 = vpop.f32.mrb[163].mxu0  ;;  %vm2726_vm5 = vcmp.eq.s32.totalorder %v2722_v19, %v2725_v11 }
 0x22b   : > { %v2731_v53 = vld [vmem:[#allocation2 + $0x1] sm:$0xff]  ;;  %v2732_v20 = vld [vmem:[#allocation2 + $0x9] sm:$0xf] }
 0x22c   : > { %2703 = vst.msk [vmem:[#allocation2 + $0x18] sm:$0xff] %vm2699_vm3, %v2681_v60  ;;  %v2661_v0 = vadd.f32 %v5741_v38, %v2633_v63  ;;  %v2730_v18 = vld [vmem:[#allocation2 + $0x8] sm:$0xf]  ;;  %v2737_v13 = vmax.f32 %v2729_v29, %v2731_v53 }
 0x22d   : > { %v2305_v47 = vpop.f32.mrb[164].mxu1  ;;  %v2550_v62 = vpop.f32.mrb[164].mxu0  ;;  %v2738_v35 = vmax.f32 %v2730_v18, %v2732_v20 }
 0x22e   : > { %v2682_v57 = vmax.f32 %v2661_v0, 0.0  ;;  %v5768_v3 = vadd.f32 %v2305_v47, %v5710_v42  ;;  %v2634_v51 = vadd.f32 %v2550_v62, %v2354_v56  ;;  %v4268_v9 = vpop.f32.mrb[165].mxu1  ;;  %v4312_v28 = vpop.f32.mrb[165].mxu0 }
 0x22f   : > { %v2733_v10 = vld [vmem:[#allocation2 + $0xe] sm:$0xff] }
 0x230   : > { %v2735_v6 = vld [vmem:[#allocation2 + $0xf] sm:$0xff]  ;;  %2704 = vst.msk [vmem:[#allocation2 + $0x20] sm:$0xff] %vm2699_vm3, %v2682_v57  ;;  %v2662_v32 = vadd.f32 %v5741_v38, %v2634_v51 }
 0x231   : > { %v2310_v44 = vpop.f32.mrb[166].mxu1  ;;  %v2555_v7 = vpop.f32.mrb[166].mxu0  ;;  %v2739_v40 = vmax.f32 %v2733_v10, %v2735_v6 }
 0x232   : > { %v2683_v15 = vmax.f32 %v2662_v32, 0.0  ;;  %v5773_v42 = vadd.f32 %v2310_v44, %v5713_v55  ;;  %v2635_v56 = vadd.f32 %v2555_v7, %v5736_v16  ;;  %v4271_v21 = vpop.f32.mrb[167].mxu1  ;;  %v4315_v26 = vpop.f32.mrb[167].mxu0 }
 0x233   : > { %v2734_v24 = vld [vmem:[#allocation2 + $0x16] sm:$0xf]  ;;  %v2741_v33 = vmax.f32 %v2737_v13, %v2739_v40 }
 0x234   : > { %v2736_v25 = vld [vmem:[#allocation2 + $0x17] sm:$0xf]  ;;  %2705 = vst.msk [vmem:[#allocation2 + $0x28] sm:$0xff] %vm2699_vm3, %v2683_v15  ;;  %v2663_v45 = vadd.f32 %v5741_v38, %v2635_v56 }
 0x235   : > { %v2740_v12 = vmax.f32 %v2734_v24, %v2736_v25  ;;  %v2315_v58 = vpop.f32.mrb[168].mxu1  ;;  %v2560_v46 = vpop.f32.mrb[168].mxu0 }
 0x236   : > { %v2684_v55 = vmax.f32 %v2663_v45, 0.0  ;;  %v5779_v16 = vadd.f32 %v2315_v58, %v5715_v52  ;;  %v2636_v37 = vadd.f32 %v2560_v46, %v5744_v23  ;;  %v4274_v17 = vpop.f32.mrb[169].mxu1  ;;  %v4318_v30 = vpop.f32.mrb[169].mxu0  ;;  %v5790_v52 = vsel %vm2726_vm5, 1.0, %v4448_v1 }
 0x237   : > { %v2742_v39 = vmax.f32 %v2738_v35, %v2740_v12  ;;  %v2825_v57 = vld [vmem:[#allocation2 + $0x1d] sm:$0xff] }
 0x238   : > { %2706 = vst.msk [vmem:[#allocation2 + $0x30] sm:$0xff] %vm2699_vm3, %v2684_v55  ;;  %v2664_v31 = vadd.f32 %v5741_v38, %v2636_v37  ;;  %v2824_v44 = vld [vmem:[#allocation2 + $0x24] sm:$0xf] }
 0x239   : > { %v4401_v36 = vpack.c.bf16 %v2742_v39, %v2741_v33  ;;  %v2320_v2 = vpop.f32.mrb[170].mxu1  ;;  %v2565_v60 = vpop.f32.mrb[170].mxu0 }
 0x23a   : > { %v2685_v23 = vmax.f32 %v2664_v31, 0.0  ;;  %v5793_v63 = vadd.f32 %v2320_v2, %v5718_v59  ;;  %v2637_v8 = vadd.f32 %v2565_v60, %v5748_v27  ;;  %v4277_v5 = vpop.f32.mrb[171].mxu1  ;;  %v4321_v0 = vpop.f32.mrb[171].mxu0  ;;  %v2823_v59 = vld [vmem:[#allocation2 + $0x1c] sm:$0xff] }
 0x23b   : > { %4403 = vmatpush3.bf16.msk.msra.mxu1 %vm5783_vm7, %v4401_v36  ;;  %v2826_v6 = vld [vmem:[#allocation2 + $0x25] sm:$0xf]  ;;  %v2831_v18 = vmax.f32 %v2823_v59, %v2825_v57 }
 0x23c   : > { %4404 = vmatprep.subr.bf16.mxu1 %v4450_v54  ;;  %2707 = vst.msk [vmem:[#allocation2 + $0x38] sm:$0xff] %vm2699_vm3, %v2685_v23  ;;  %v2665_v14 = vadd.f32 %v5741_v38, %v2637_v8 }
 0x23d   : > { %v2325_v47 = vpop.f32.mrb[172].mxu1  ;;  %v2570_v62 = vpop.f32.mrb[172].mxu0 }
 0x23e   : > { %4363 = vmatmul.mubr.msk.f32.vlgmr.msra.gmra.mrb[182].mxu1 %vm2743_vm8, %v5790_v52  ;;  %v2686_v27 = vmax.f32 %v2665_v14, 0.0  ;;  %v5804_v51 = vadd.f32 %v2325_v47, %v5721_v48  ;;  %v2638_v9 = vadd.f32 %v2570_v62, %v5753_v61  ;;  %v4280_v28 = vpop.f32.mrb[173].mxu1  ;;  %v4324_v10 = vpop.f32.mrb[173].mxu0  ;;  %v2832_v61 = vmax.f32 %v2824_v44, %v2826_v6 }
 0x23f   : > { %4369 = vmatprep.mubr.msk.f32.mxu1 %vm4449_vm1, %v4448_v1  ;;  %v2827_v32 = vld [vmem:[#allocation2 + $0x2a] sm:$0xff]  ;;  %v2828_v53 = vld [vmem:[#allocation2 + $0x32] sm:$0xf] }
 0x240   : > { %v2829_v19 = vld [vmem:[#allocation2 + $0x2b] sm:$0xff]  ;;  %2708 = vst.msk [vmem:[#allocation2 + $0x40] sm:$0xff] %vm2699_vm3, %v2686_v27  ;;  %v2666_v11 = vadd.f32 %v5741_v38, %v2638_v9  ;;  %v2830_v7 = vld [vmem:[#allocation2 + $0x33] sm:$0xf] }
 0x241   : > { %v2833_v48 = vmax.f32 %v2827_v32, %v2829_v19  ;;  %v2330_v20 = vpop.f32.mrb[174].mxu1  ;;  %v2575_v40 = vpop.f32.mrb[174].mxu0  ;;  %v2834_v15 = vmax.f32 %v2828_v53, %v2830_v7 }
 0x242   : > { %v2687_v56 = vmax.f32 %v2666_v11, 0.0  ;;  %v5812_v21 = vadd.f32 %v2330_v20, %v5724_v34  ;;  %v2639_v26 = vadd.f32 %v2575_v40, %v5758_v41  ;;  %v4283_v29 = vpop.f32.mrb[175].mxu1  ;;  %v4327_v24 = vpop.f32.mrb[175].mxu0 }
 0x243   : > { %v2835_v25 = vmax.f32 %v2831_v18, %v2833_v48  ;;  %v2836_v13 = vmax.f32 %v2832_v61, %v2834_v15  ;;  %v2912_v9 = vld [vmem:[#allocation2 + $0x38] sm:$0xff] }
 0x244   : > { %2709 = vst.msk [vmem:[#allocation2 + $0x48] sm:$0xff] %vm2699_vm3, %v2687_v56  ;;  %v2667_v45 = vadd.f32 %v5741_v38, %v2639_v26 }
 0x245   : > { %v2335_v35 = vpop.f32.mrb[176].mxu1  ;;  %v2580_v12 = vpop.f32.mrb[176].mxu0  ;;  %v4405_v58 = vpack.c.bf16 %v2836_v13, %v2835_v25 }
 0x246   : > { %v2688_v46 = vmax.f32 %v2667_v45, 0.0  ;;  %v5818_v33 = vadd.f32 %v2335_v35, %v5727_v50  ;;  %v2640_v34 = vadd.f32 %v2580_v12, %v5763_v43  ;;  %v4286_v55 = vpop.f32.mrb[177].mxu1  ;;  %v4330_v37 = vpop.f32.mrb[177].mxu0 }
 0x247   : > { %4407 = vmatpush3.bf16.msk.msra.mxu1 %vm5783_vm7, %v4405_v58  ;;  %v2913_v8 = vld [vmem:[#allocation2 + $0x40] sm:$0xf] }
 0x248   : > { %2710 = vst.msk [vmem:[#allocation2 + $0x50] sm:$0xff] %vm2699_vm3, %v2688_v46  ;;  %v2668_v41 = vadd.f32 %v5741_v38, %v2640_v34  ;;  %4408 = vmatprep.subr.bf16.mxu1 %v4450_v54  ;;  %v2914_v0 = vld [vmem:[#allocation2 + $0x39] sm:$0xff]  ;;  %v2915_v14 = vld [vmem:[#allocation2 + $0x41] sm:$0xf] }
 0x249   : > { %v2340_v17 = vpop.f32.mrb[178].mxu1  ;;  %v2585_v30 = vpop.f32.mrb[178].mxu0  ;;  %v2920_v32 = vmax.f32 %v2912_v9, %v2914_v0  ;;  %v2921_v53 = vmax.f32 %v2913_v8, %v2915_v14 }
 0x24a   : > { %v2689_v39 = vmax.f32 %v2668_v41, 0.0  ;;  %v5827_v31 = vadd.f32 %v2340_v17, %v5730_v4  ;;  %v2641_v50 = vadd.f32 %v2585_v30, %v5768_v3  ;;  %v4289_v43 = vpop.f32.mrb[179].mxu1  ;;  %v4333_v36 = vpop.f32.mrb[179].mxu0  ;;  %4370 = vmatmul.mubr.msk.f32.vlgmr.msra.gmra.mrb[184].mxu1 %vm2743_vm8, %v5790_v52 }
 0x24b   : > { %v2916_v2 = vld [vmem:[#allocation2 + $0x46] sm:$0xff]  ;;  %4376 = vmatprep.mubr.msk.f32.mxu1 %vm4449_vm1, %v4448_v1 }
 0x24c   : > { %v2918_v60 = vld [vmem:[#allocation2 + $0x47] sm:$0xff]  ;;  %2711 = vst.msk [vmem:[#allocation2 + $0x58] sm:$0xff] %vm2699_vm3, %v2689_v39  ;;  %v2669_v23 = vadd.f32 %v5741_v38, %v2641_v50 }
 0x24d   : > { %v2345_v5 = vpop.f32.mrb[180].mxu1  ;;  %v2590_v4 = vpop.f32.mrb[180].mxu0  ;;  %v2922_v57 = vmax.f32 %v2916_v2, %v2918_v60 }
 0x24e   : > { %v2690_v3 = vmax.f32 %v2669_v23, 0.0  ;;  %v5837_v47 = vadd.f32 %v2345_v5, %v5733_v22  ;;  %v2642_v62 = vadd.f32 %v2590_v4, %v5773_v42  ;;  %v4336_v59 = vpop.f32.mrb[181].mxu0  ;;  %v4292_v27 = vpop.f32.mrb[181].mxu1 }
 0x24f   : > { %v2917_v28 = vld [vmem:[#allocation2 + $0x4e] sm:$0xf]  ;;  %v2924_v18 = vmax.f32 %v2920_v32, %v2922_v57 }
 0x250   : > { %v2919_v10 = vld [vmem:[#allocation2 + $0x4f] sm:$0xf]  ;;  %2712 = vst.msk [vmem:[#allocation2 + $0x60] sm:$0xff] %vm2699_vm3, %v2690_v3  ;;  %v2670_v6 = vadd.f32 %v5741_v38, %v2642_v62 }
 0x251   : > { %v2923_v19 = vmax.f32 %v2917_v28, %v2919_v10  ;;  %v2595_v11 = vpop.f32.mrb[182].mxu0 }
 0x252   : > { %v2691_v44 = vmax.f32 %v2670_v6, 0.0  ;;  %v2643_v22 = vadd.f32 %v2595_v11, %v5779_v16  ;;  %v4339_v7 = vpop.f32.mrb[183].mxu0 }
 0x253   : > { %v2925_v42 = vmax.f32 %v2921_v53, %v2923_v19  ;;  %v3001_v29 = vld [vmem:[#allocation2 + $0x54] sm:$0xff]  ;;  %v3002_v34 = vld [vmem:[#allocation2 + $0x5c] sm:$0xf] }
 0x254   : > { %2713 = vst.msk [vmem:[#allocation2 + $0x68] sm:$0xff] %vm2699_vm3, %v2691_v44  ;;  %v2671_v48 = vadd.f32 %v5741_v38, %v2643_v22  ;;  %v3003_v24 = vld [vmem:[#allocation2 + $0x55] sm:$0xff] }
 0x255   : > { %v4409_v20 = vpack.c.bf16 %v2925_v42, %v2924_v18  ;;  %v2600_v40 = vpop.f32.mrb[184].mxu0  ;;  %v3009_v37 = vmax.f32 %v3001_v29, %v3003_v24 }
 0x256   : > { %v2692_v61 = vmax.f32 %v2671_v48, 0.0  ;;  %v2644_v15 = vadd.f32 %v2600_v40, %v5793_v63  ;;  %v4342_v56 = vpop.f32.mrb[185].mxu0 }
 0x257   : > { %4411 = vmatpush3.bf16.msk.msra.mxu1 %vm5783_vm7, %v4409_v20  ;;  %v3004_v45 = vld [vmem:[#allocation2 + $0x5d] sm:$0xf] }
 0x258   : > { %4412 = vmatprep.subr.bf16.mxu1 %v4450_v54  ;;  %2714 = vst.msk [vmem:[#allocation2 + $0x70] sm:$0xff] %vm2699_vm3, %v2692_v61  ;;  %v2672_v16 = vadd.f32 %v5741_v38, %v2644_v15  ;;  %v3010_v30 = vmax.f32 %v3002_v34, %v3004_v45 }
 0x259   : > { %v2605_v26 = vpop.f32.mrb[186].mxu0 }
 0x25a   : > { %4377 = vmatmul.mubr.msk.f32.vlgmr.msra.gmra.mrb[186].mxu1 %vm2743_vm8, %v5790_v52  ;;  %v2693_v25 = vmax.f32 %v2672_v16, 0.0  ;;  %v2645_v13 = vadd.f32 %v2605_v26, %v5804_v51  ;;  %v4345_v63 = vpop.f32.mrb[187].mxu0 }
 0x25b   : > { %4383 = vmatprep.mubr.msk.f32.mxu1 %vm4449_vm1, %v4448_v1  ;;  %v3005_v35 = vld [vmem:[#allocation2 + $0x62] sm:$0xff]  ;;  %v3006_v12 = vld [vmem:[#allocation2 + $0x6a] sm:$0xf] }
 0x25c   : > { %v3007_v58 = vld [vmem:[#allocation2 + $0x63] sm:$0xff]  ;;  %2715 = vst.msk [vmem:[#allocation2 + $0x78] sm:$0xff] %vm2699_vm3, %v2693_v25  ;;  %v2673_v46 = vadd.f32 %v5741_v38, %v2645_v13  ;;  %v3008_v55 = vld [vmem:[#allocation2 + $0x6b] sm:$0xf] }
 0x25d   : > { %v3011_v41 = vmax.f32 %v3005_v35, %v3007_v58  ;;  %v2610_v17 = vpop.f32.mrb[188].mxu0  ;;  %v3012_v39 = vmax.f32 %v3006_v12, %v3008_v55 }
 0x25e   : > { %v2694_v51 = vmax.f32 %v2673_v46, 0.0  ;;  %v2646_v50 = vadd.f32 %v2610_v17, %v5812_v21  ;;  %v4348_v43 = vpop.f32.mrb[189].mxu0 }
 0x25f   : > { %v3013_v36 = vmax.f32 %v3009_v37, %v3011_v41  ;;  %v3014_v2 = vmax.f32 %v3010_v30, %v3012_v39  ;;  %v3090_v11 = vld [vmem:[#allocation2 + $0x70] sm:$0xff] }
 0x260   : > { %2716 = vst.msk [vmem:[#allocation2 + $0x80] sm:$0xff] %vm2699_vm3, %v2694_v51  ;;  %v2674_v60 = vadd.f32 %v5741_v38, %v2646_v50 }
 0x261   : > { %v2615_v23 = vpop.f32.mrb[190].mxu0  ;;  %v4413_v8 = vpack.c.bf16 %v3014_v2, %v3013_v36 }
 0x262   : > { %v2695_v5 = vmax.f32 %v2674_v60, 0.0  ;;  %v2647_v4 = vadd.f32 %v2615_v23, %v5818_v33  ;;  %v4351_v0 = vpop.f32.mrb[191].mxu0 }
 0x263   : > { %4415 = vmatpush3.bf16.msk.msra.mxu1 %vm5783_vm7, %v4413_v8  ;;  %v3091_v28 = vld [vmem:[#allocation2 + $0x78] sm:$0xf] }
 0x264   : > { %2717 = vst.msk [vmem:[#allocation2 + $0x88] sm:$0xff] %vm2699_vm3, %v2695_v5  ;;  %v2675_v21 = vadd.f32 %v5741_v38, %v2647_v4  ;;  %4416 = vmatprep.subr.bf16.mxu1 %v4450_v54  ;;  %v3092_v10 = vld [vmem:[#allocation2 + $0x71] sm:$0xff]  ;;  %v3093_v6 = vld [vmem:[#allocation2 + $0x79] sm:$0xf] }
 0x265   : > { %v2620_v14 = vpop.f32.mrb[192].mxu0  ;;  %v3098_v18 = vmax.f32 %v3090_v11, %v3092_v10  ;;  %v3099_v42 = vmax.f32 %v3091_v28, %v3093_v6 }
 0x266   : > { %v2696_v3 = vmax.f32 %v2675_v21, 0.0  ;;  %v2648_v62 = vadd.f32 %v2620_v14, %v5827_v31  ;;  %v4354_v59 = vpop.f32.mrb[193].mxu0  ;;  %4384 = vmatmul.mubr.msk.f32.vlgmr.msra.gmra.mrb[188].mxu1 %vm2743_vm8, %v5790_v52 }
 0x267   : > { %v3094_v57 = vld [vmem:[#allocation2 + $0x7e] sm:$0xff]  ;;  %4390 = vmatprep.mubr.msk.f32.mxu1 %vm4449_vm1, %v4448_v1 }
 0x268   : > { %v3096_v33 = vld [vmem:[#allocation2 + $0x7f] sm:$0xff]  ;;  %2718 = vst.msk [vmem:[#allocation2 + $0x90] sm:$0xff] %vm2699_vm3, %v2696_v3  ;;  %v2676_v27 = vadd.f32 %v5741_v38, %v2648_v62 }
 0x269   : > { %v2625_v9 = vpop.f32.mrb[194].mxu0  ;;  %v3100_v53 = vmax.f32 %v3094_v57, %v3096_v33 }
 0x26a   : > { %v2697_v32 = vmax.f32 %v2676_v27, 0.0  ;;  %v2649_v31 = vadd.f32 %v2625_v9, %v5837_v47  ;;  %v4357_v19 = vpop.f32.mrb[195].mxu0 }
 0x26b   : > { %v3095_v44 = vld [vmem:[#allocation2 + $0x86] sm:$0xf]  ;;  %v3102_v40 = vmax.f32 %v3098_v18, %v3100_v53 }
 0x26c   : > { %v3097_v22 = vld [vmem:[#allocation2 + $0x87] sm:$0xf]  ;;  %2719 = vst.msk [vmem:[#allocation2 + $0x98] sm:$0xff] %vm2699_vm3, %v2697_v32  ;;  %v2677_v7 = vadd.f32 %v5741_v38, %v2649_v31 }
 0x26d   : > { %v3101_v48 = vmax.f32 %v3095_v44, %v3097_v22 }
 0x26e   : > { %v2698_v20 = vmax.f32 %v2677_v7, 0.0 }
 0x26f   : > { %v3103_v61 = vmax.f32 %v3099_v42, %v3101_v48  ;;  %v3179_v47 = vld [vmem:[#allocation2 + $0x8c] sm:$0xff]  ;;  %v3180_v24 = vld [vmem:[#allocation2 + $0x94] sm:$0xf] }
 0x270   : > { %2720 = vst.msk [vmem:[#allocation2 + $0xa0] sm:$0xff] %vm2699_vm3, %v2698_v20  ;;  %v3181_v56 = vld [vmem:[#allocation2 + $0x8d] sm:$0xff] }
 0x271   : > { %v4417_v15 = vpack.c.bf16 %v3103_v61, %v3102_v40  ;;  %v3187_v13 = vmax.f32 %v3179_v47, %v3181_v56 }
 0x273   : > { %4419 = vmatpush3.bf16.msk.msra.mxu1 %vm5783_vm7, %v4417_v15  ;;  %v3182_v38 = vld [vmem:[#allocation2 + $0x95] sm:$0xf] }
 0x274   : > { %4420 = vmatprep.subr.bf16.mxu1 %v4450_v54  ;;  %v3188_v45 = vmax.f32 %v3180_v24, %v3182_v38 }
 0x276   : > { %4391 = vmatmul.mubr.msk.f32.vlgmr.msra.gmra.mrb[190].mxu1 %vm2743_vm8, %v5790_v52 }
 0x277   : > { %4397 = vmatprep.mubr.msk.f32.mxu1 %vm4449_vm1, %v4448_v1  ;;  %v3183_v16 = vld [vmem:[#allocation2 + $0x9a] sm:$0xff]  ;;  %v3184_v26 = vld [vmem:[#allocation2 + $0xa2] sm:$0xf] }
 0x278   : > { %v3185_v29 = vld [vmem:[#allocation2 + $0x9b] sm:$0xff]  ;;  %v3186_v25 = vld [vmem:[#allocation2 + $0xa3] sm:$0xf] }
 0x279   : > { %v3189_v63 = vmax.f32 %v3183_v16, %v3185_v29  ;;  %v3190_v35 = vmax.f32 %v3184_v26, %v3186_v25 }
 0x27b   : > { %v3191_v54 = vmax.f32 %v3187_v13, %v3189_v63  ;;  %v3192_v12 = vmax.f32 %v3188_v45, %v3190_v35 }
 0x27d   : > { %v4421_v58 = vpack.c.bf16 %v3192_v12, %v3191_v54 }
 0x27f   : > { %4423 = vmatpush3.bf16.msk.msra.mxu1 %vm5783_vm7, %v4421_v58 }
 0x282   : > { %4398 = vmatmul.mubr.msk.f32.vlgmr.msra.gmra.mrb[192].mxu1 %vm2743_vm8, %v5790_v52 }
 0x311   : > { %v2817_v1 = vpop.f32.mrb[182].mxu1 }
 0x312   : > { %2822 = vst.msk [vmem:[%s170_s16] sm:$0x3f] %vm2821_vm9, %v2817_v1  ;;  %v4364_v46 = vpop.f32.mrb[183].mxu1 }
 0x31d   : > { %v2906_v34 = vpop.f32.mrb[184].mxu1 }
 0x31e   : > { %3542 = vst.msk [vmem:[%s170_s16 + $0x8] sm:$0x3f] %vm2821_vm9, %v2906_v34  ;;  %v4371_v55 = vpop.f32.mrb[185].mxu1 }
 0x32d   : > { %v2995_v37 = vpop.f32.mrb[186].mxu1 }
 0x32e   : > { %3545 = vst.msk [vmem:[%s170_s16 + $0x10] sm:$0x3f] %vm2821_vm9, %v2995_v37  ;;  %v4378_v49 = vpop.f32.mrb[187].mxu1 }
 0x339   : > { %v3084_v41 = vpop.f32.mrb[188].mxu1 }
 0x33a   : > { %3548 = vst.msk [vmem:[%s170_s16 + $0x18] sm:$0x3f] %vm2821_vm9, %v3084_v41  ;;  %v4385_v52 = vpop.f32.mrb[189].mxu1 }
 0x349   : > { %v3173_v17 = vpop.f32.mrb[190].mxu1 }
 0x34a   : > { %3551 = vst.msk [vmem:[%s170_s16 + $0x20] sm:$0x3f] %vm2821_vm9, %v3173_v17  ;;  %v4392_v30 = vpop.f32.mrb[191].mxu1 }
 0x355   : > { %v3262_v39 = vpop.f32.mrb[192].mxu1 }
 0x356   : > { %3554 = vst.msk [vmem:[%s170_s16 + $0x28] sm:$0x3f] %vm2821_vm9, %v3262_v39  ;;  %v4399_v51 = vpop.f32.mrb[193].mxu1 }
 0x357 PF: > { %s13_s12 = sadd.s32 1, %s4446_s12  }
 0x358   : > { %p10_p4 = scmp.ge.s32.totalorder %s13_s12, 4  }
 0x35a   :  { %12 = sbr.rel (!%p10_p4) target bundleno = 1 (0x1), region = 75 }

</bundles_post_ra>
